<compile_context>
chip_gen: v5e
topology: v5e:2x2
jax: 0.10.0
libtpu: 0.0.40
codegen_flags: <defaults>
</compile_context>

<pallas_src>
import functools

import jax
import jax.numpy as jnp
import numpy as np
from jax import lax
from jax.experimental import pallas as pl
from jax.experimental.pallas import tpu as pltpu

LANE = 128
SUBLANE = 8


def _round_up(x, m):
    return ((x + m - 1) // m) * m


# ------------------------------ fused kernel ---------------------------------
def _ctclstm_fused_kernel(L, T, Bp, H, O,
                          x_ref, wx_ref, wh_ref, b_ref, dec_w_ref, dec_b_ref,
                          out_ref):
    G = 4 * H

    # Hoisted per-lane constants for the fused gate nonlinearity:
    #   sigmoid(x) = 0.5*tanh(0.5*x) + 0.5  on i/f/o lanes;  tanh(x) on g lanes.
    col = lax.broadcasted_iota(jnp.int32, (Bp, G), 1)
    is_g = jnp.logical_and(col >= 2 * H, col < 3 * H)
    pre = jnp.where(is_g, jnp.float32(1.0), jnp.float32(0.5))   # tanh-arg scale == post-scale
    post = jnp.where(is_g, jnp.float32(0.0), jnp.float32(0.5))  # affine offset

    # Load packed per-layer weights once; register allocator decides residency.
    wx = [wx_ref[l] for l in range(L)]                            # (Kmax, 4H)
    wh = [wh_ref[l] for l in range(L)]                            # (H,    4H)
    bias = [jnp.broadcast_to(b_ref[l], (Bp, G)) for l in range(L)]  # hoisted broadcast

    # Layer-0 input projection hoisted over all timesteps (input is fully available).
    gx0 = jnp.dot(x_ref[...], wx[0], preferred_element_type=jnp.float32) + b_ref[0]

    # Wavefront recurrence: step s runs timestep t = s - l for every live layer l.
    h = [jnp.zeros((Bp, H), jnp.float32) for _ in range(L)]
    c = [jnp.zeros((Bp, H), jnp.float32) for _ in range(L)]
    out_rows = [None] * T

    for s in range(T + L - 1):
        live = [l for l in range(L) if 0 <= s - l < T]

        # Phase 1: independent per-layer gate matmuls (back-to-back MXU pushes).
        gates = {}
        for l in live:
            t = s - l
            if l == 0:
                gx = gx0[t * Bp:(t + 1) * Bp, :]            # aligned 8-row vreg slice
            else:
                # input = h of layer l-1 at timestep t (produced at wavefront step s-1)
                gx = jnp.dot(h[l - 1], wx[l][:H, :],
                             preferred_element_type=jnp.float32) + bias[l]
            gates[l] = gx + jnp.dot(h[l], wh[l],
                                    preferred_element_type=jnp.float32)

        # Phase 2: fused nonlinearity (single tanh over the 4H block) + state update.
        for l in live:
            t = s - l
            g = jnp.tanh(gates[l] * pre) * pre + post
            i_g = g[:, 0 * H:1 * H]
            f_g = g[:, 1 * H:2 * H]
            g_g = g[:, 2 * H:3 * H]
            o_g = g[:, 3 * H:4 * H]
            c[l] = f_g * c[l] + i_g * g_g
            h[l] = o_g * jnp.tanh(c[l])
            if l == L - 1:
                out_rows[t] = h[l]

    acts = jnp.concatenate(out_rows, axis=0)                 # (T*Bp, H), values only

    # Decoder (lane-dense padded width) + masked log-softmax, one dense store.
    logits = (jnp.dot(acts, dec_w_ref[...], preferred_element_type=jnp.float32)
              + dec_b_ref[...])                              # (T*Bp, OP)
    ccol = lax.broadcasted_iota(jnp.int32, logits.shape, 1)
    valid = ccol < O
    logits = jnp.where(valid, logits, jnp.float32(-1e30))
    m = jnp.max(logits, axis=-1, keepdims=True)
    shifted = logits - m
    e = jnp.where(valid, jnp.exp(shifted), 0.0)
    lse = jnp.log(jnp.sum(e, axis=-1, keepdims=True))
    out_ref[...] = shifted - lse


# ------------------------------- forward wrapper ------------------------------
def ctclstm_forward(sequences, params):
    """sequences: (B, T, input_size) -> (B, T, output_size + 1) log-probs."""
    B, T, D = sequences.shape
    wx_all = params["wx_all"]        # (L, Kmax, 4H)
    wh_all = params["wh_all"]        # (L, H,    4H)
    b_all = params["b_all"]          # (L, 1,    4H)
    dec_w = params["dec_w_pad"]      # (H, OP)
    dec_b = params["dec_b_pad"]      # (1, OP)
    O = params["num_classes"]

    L, Kmax, G = wx_all.shape
    H = wh_all.shape[1]
    OP = dec_w.shape[1]
    Bp = _round_up(B, SUBLANE)       # pad batch to a full sublane group

    # time-major rows (row = t*Bp + b), batch padded to Bp, feature dim padded to Kmax
    x = jnp.swapaxes(sequences, 0, 1)                             # (T, B, D)
    x = jnp.pad(x, ((0, 0), (0, Bp - B), (0, Kmax - D)))
    x2d = x.reshape(T * Bp, Kmax).astype(jnp.float32)

    kernel = functools.partial(_ctclstm_fused_kernel, L, T, Bp, H, O)

    out = pl.pallas_call(
        kernel,
        out_shape=jax.ShapeDtypeStruct((T * Bp, OP), jnp.float32),
        grid_spec=pltpu.PrefetchScalarGridSpec(
            num_scalar_prefetch=0,
            grid=(1,),
            in_specs=[
                pl.BlockSpec((T * Bp, Kmax), lambda i: (0, 0)),
                pl.BlockSpec((L, Kmax, G), lambda i: (0, 0, 0)),
                pl.BlockSpec((L, H, G), lambda i: (0, 0, 0)),
                pl.BlockSpec((L, 1, G), lambda i: (0, 0, 0)),
                pl.BlockSpec((H, OP), lambda i: (0, 0)),
                pl.BlockSpec((1, OP), lambda i: (0, 0)),
            ],
            out_specs=pl.BlockSpec((T * Bp, OP), lambda i: (0, 0)),
        ),
        compiler_params=pltpu.CompilerParams(
            dimension_semantics=("arbitrary",)),
    )(x2d, wx_all, wh_all, b_all, dec_w, dec_b)

    out = out.reshape(T, Bp, OP)[:, :B, :O]     # drop batch and class padding
    return jnp.swapaxes(out, 0, 1)              # back to (B, T, O)


# ---------------------------- pure-JAX reference ------------------------------
def ctclstm_reference(sequences, raw_params):
    x = sequences  # (B, T, D)
    B = x.shape[0]
    for (w_ih, w_hh, b_ih, b_hh) in raw_params["lstm"]:
        H = w_hh.shape[1]

        def step(carry, xt):
            h, c = carry
            gates = xt @ w_ih.T + h @ w_hh.T + b_ih + b_hh
            i_g, f_g, g_g, o_g = jnp.split(gates, 4, axis=-1)
            i_g = jax.nn.sigmoid(i_g)
            f_g = jax.nn.sigmoid(f_g)
            g_g = jnp.tanh(g_g)
            o_g = jax.nn.sigmoid(o_g)
            c = f_g * c + i_g * g_g
            h = o_g * jnp.tanh(c)
            return (h, c), h

        x_t = jnp.swapaxes(x, 0, 1)  # (T, B, D)
        _, ys = jax.lax.scan(
            step, (jnp.zeros((B, H), jnp.float32), jnp.zeros((B, H), jnp.float32)), x_t
        )
        x = jnp.swapaxes(ys, 0, 1)
    logits = x @ raw_params["dec_w"].T + raw_params["dec_b"]
    return jax.nn.log_softmax(logits, axis=2)


# ------------------------------- param init -----------------------------------
def init_params(key, input_size, output_size, hidden_size):
    osz = output_size + 1      # number of classes AND number of LSTM layers (module quirk)
    H = hidden_size
    scale = 1.0 / np.sqrt(H)

    raw_lstm = []
    d_in = input_size
    for _ in range(osz):
        key, k1, k2, k3, k4 = jax.random.split(key, 5)
        w_ih = jax.random.uniform(k1, (4 * H, d_in), jnp.float32, -scale, scale)
        w_hh = jax.random.uniform(k2, (4 * H, H), jnp.float32, -scale, scale)
        b_ih = jax.random.uniform(k3, (4 * H,), jnp.float32, -scale, scale)
        b_hh = jax.random.uniform(k4, (4 * H,), jnp.float32, -scale, scale)
        raw_lstm.append((w_ih, w_hh, b_ih, b_hh))
        d_in = H

    key, k1, k2 = jax.random.split(key, 3)
    dec_w = jax.random.uniform(k1, (osz, H), jnp.float32, -scale, scale)
    dec_b = jax.random.uniform(k2, (osz,), jnp.float32, -scale, scale)

    raw = {"lstm": raw_lstm, "dec_w": dec_w, "dec_b": dec_b}

    # ---- packed + padded kernel params (done once here, not per forward call) ----
    L = osz
    G = 4 * H
    Kmax = _round_up(max(input_size, H), SUBLANE)
    wx_all = np.zeros((L, Kmax, G), np.float32)
    wh_all = np.zeros((L, H, G), np.float32)
    b_all = np.zeros((L, 1, G), np.float32)
    for l, (w_ih, w_hh, b_ih, b_hh) in enumerate(raw_lstm):
        k = w_ih.shape[1]
        wx_all[l, :k, :] = np.asarray(w_ih).T
        wh_all[l, :, :] = np.asarray(w_hh).T
        b_all[l, 0, :] = np.asarray(b_ih + b_hh)

    OP = _round_up(osz, LANE)                      # lane-dense padded class width
    dec_w_pad = np.zeros((H, OP), np.float32)
    dec_w_pad[:, :osz] = np.asarray(dec_w).T
    dec_b_pad = np.zeros((1, OP), np.float32)
    dec_b_pad[0, :osz] = np.asarray(dec_b)

    kernel_params = {
        "wx_all": jnp.asarray(wx_all),
        "wh_all": jnp.asarray(wh_all),
        "b_all": jnp.asarray(b_all),
        "dec_w_pad": jnp.asarray(dec_w_pad),
        "dec_b_pad": jnp.asarray(dec_b_pad),
        "num_classes": osz,
    }
    return raw, kernel_params


# ----------------------------------- main --------------------------------------
if __name__ == "__main__":
    INPUT_SIZE = 16
    OUTPUT_SIZE = 3          # -> osz = 4 classes and 4 LSTM layers
    HIDDEN_SIZE = 32
    B, T = 2, 8

    key = jax.random.PRNGKey(0)
    key, kx = jax.random.split(key)
    sequences = jax.random.normal(kx, (B, T, INPUT_SIZE), jnp.float32)

    raw_params, kernel_params = init_params(key, INPUT_SIZE, OUTPUT_SIZE, HIDDEN_SIZE)

    out = ctclstm_forward(sequences, kernel_params)
    out = jax.block_until_ready(out)

    ref = ctclstm_reference(sequences, raw_params)
    ref = jax.block_until_ready(ref)

    assert out.shape == (B, T, OUTPUT_SIZE + 1), out.shape
    assert jnp.allclose(out, ref, atol=1e-5, rtol=1e-5), float(jnp.max(jnp.abs(out - ref)))

    print("KERNEL_OK")
</pallas_src>

<mosaic_0001>
module attributes {stable_mosaic.version = 11 : i64} {
  func.func @_ctclstm_fused_kernel(%arg0: i32, %arg1: memref<64x32xf32, #tpu.memory_space<vmem>>, %arg2: memref<4x32x128xf32, #tpu.memory_space<vmem>>, %arg3: memref<4x32x128xf32, #tpu.memory_space<vmem>>, %arg4: memref<4x1x128xf32, #tpu.memory_space<vmem>>, %arg5: memref<32x128xf32, #tpu.memory_space<vmem>>, %arg6: memref<1x128xf32, #tpu.memory_space<vmem>>, %arg7: memref<64x128xf32, #tpu.memory_space<vmem>>) attributes {dimension_semantics = [#tpu.dimension_semantics<arbitrary>], iteration_bounds = array<i64: 1>, scalar_prefetch = 0 : i64, scratch_operands = 0 : i64, tpu.core_type = #tpu.core_type<tc>, window_params = [{pipeline_mode = #tpu.pipeline_mode<synchronous>, transform_indices = @transform_0, window_bounds = array<i64: 64, 32>}, {pipeline_mode = #tpu.pipeline_mode<synchronous>, transform_indices = @transform_1, window_bounds = array<i64: 4, 32, 128>}, {pipeline_mode = #tpu.pipeline_mode<synchronous>, transform_indices = @transform_2, window_bounds = array<i64: 4, 32, 128>}, {pipeline_mode = #tpu.pipeline_mode<synchronous>, transform_indices = @transform_3, window_bounds = array<i64: 4, 1, 128>}, {pipeline_mode = #tpu.pipeline_mode<synchronous>, transform_indices = @transform_4, window_bounds = array<i64: 32, 128>}, {pipeline_mode = #tpu.pipeline_mode<synchronous>, transform_indices = @transform_5, window_bounds = array<i64: 1, 128>}, {pipeline_mode = #tpu.pipeline_mode<synchronous>, transform_indices = @transform_6, window_bounds = array<i64: 64, 128>}]} {
    %0 = tpu.iota {dimensions = array<i32: 1>} : vector<8x128xi32>
    %c64_i32 = arith.constant 64 : i32
    %1 = vector.broadcast %c64_i32 : i32 to vector<8x128xi32>
    %2 = arith.cmpi sge, %0, %1 : vector<8x128xi32>
    %c96_i32 = arith.constant 96 : i32
    %3 = vector.broadcast %c96_i32 : i32 to vector<8x128xi32>
    %4 = arith.cmpi slt, %0, %3 : vector<8x128xi32>
    %5 = arith.andi %2, %4 : vector<8x128xi1>
    %cst = arith.constant 1.000000e+00 : f32
    %cst_0 = arith.constant 5.000000e-01 : f32
    %6 = vector.broadcast %cst : f32 to vector<8x128xf32>
    %7 = vector.broadcast %cst_0 : f32 to vector<8x128xf32>
    %8 = arith.select %5, %6, %7 : vector<8x128xi1>, vector<8x128xf32>
    %cst_1 = arith.constant 0.000000e+00 : f32
    %cst_2 = arith.constant 5.000000e-01 : f32
    %9 = vector.broadcast %cst_1 : f32 to vector<8x128xf32>
    %10 = vector.broadcast %cst_2 : f32 to vector<8x128xf32>
    %11 = arith.select %5, %9, %10 : vector<8x128xi1>, vector<8x128xf32>
    %c0 = arith.constant 0 : index
    %c0_3 = arith.constant 0 : index
    %c0_4 = arith.constant 0 : index
    %12 = vector.load %arg2[%c0, %c0_3, %c0_4] : memref<4x32x128xf32, #tpu.memory_space<vmem>>, vector<1x32x128xf32>
    %13 = vector.shape_cast %12 : vector<1x32x128xf32> to vector<32x128xf32>
    %c1 = arith.constant 1 : index
    %c0_5 = arith.constant 0 : index
    %c0_6 = arith.constant 0 : index
    %14 = vector.load %arg2[%c1, %c0_5, %c0_6] : memref<4x32x128xf32, #tpu.memory_space<vmem>>, vector<1x32x128xf32>
    %15 = vector.shape_cast %14 : vector<1x32x128xf32> to vector<32x128xf32>
    %c2 = arith.constant 2 : index
    %c0_7 = arith.constant 0 : index
    %c0_8 = arith.constant 0 : index
    %16 = vector.load %arg2[%c2, %c0_7, %c0_8] : memref<4x32x128xf32, #tpu.memory_space<vmem>>, vector<1x32x128xf32>
    %17 = vector.shape_cast %16 : vector<1x32x128xf32> to vector<32x128xf32>
    %c3 = arith.constant 3 : index
    %c0_9 = arith.constant 0 : index
    %c0_10 = arith.constant 0 : index
    %18 = vector.load %arg2[%c3, %c0_9, %c0_10] : memref<4x32x128xf32, #tpu.memory_space<vmem>>, vector<1x32x128xf32>
    %19 = vector.shape_cast %18 : vector<1x32x128xf32> to vector<32x128xf32>
    %c0_11 = arith.constant 0 : index
    %c0_12 = arith.constant 0 : index
    %c0_13 = arith.constant 0 : index
    %20 = vector.load %arg3[%c0_11, %c0_12, %c0_13] : memref<4x32x128xf32, #tpu.memory_space<vmem>>, vector<1x32x128xf32>
    %21 = vector.shape_cast %20 : vector<1x32x128xf32> to vector<32x128xf32>
    %c1_14 = arith.constant 1 : index
    %c0_15 = arith.constant 0 : index
    %c0_16 = arith.constant 0 : index
    %22 = vector.load %arg3[%c1_14, %c0_15, %c0_16] : memref<4x32x128xf32, #tpu.memory_space<vmem>>, vector<1x32x128xf32>
    %23 = vector.shape_cast %22 : vector<1x32x128xf32> to vector<32x128xf32>
    %c2_17 = arith.constant 2 : index
    %c0_18 = arith.constant 0 : index
    %c0_19 = arith.constant 0 : index
    %24 = vector.load %arg3[%c2_17, %c0_18, %c0_19] : memref<4x32x128xf32, #tpu.memory_space<vmem>>, vector<1x32x128xf32>
    %25 = vector.shape_cast %24 : vector<1x32x128xf32> to vector<32x128xf32>
    %c3_20 = arith.constant 3 : index
    %c0_21 = arith.constant 0 : index
    %c0_22 = arith.constant 0 : index
    %26 = vector.load %arg3[%c3_20, %c0_21, %c0_22] : memref<4x32x128xf32, #tpu.memory_space<vmem>>, vector<1x32x128xf32>
    %27 = vector.shape_cast %26 : vector<1x32x128xf32> to vector<32x128xf32>
    %c1_23 = arith.constant 1 : index
    %c0_24 = arith.constant 0 : index
    %c0_25 = arith.constant 0 : index
    %28 = vector.load %arg4[%c1_23, %c0_24, %c0_25] : memref<4x1x128xf32, #tpu.memory_space<vmem>>, vector<1x1x128xf32>
    %29 = vector.shape_cast %28 : vector<1x1x128xf32> to vector<1x128xf32>
    %30 = vector.shape_cast %29 : vector<1x128xf32> to vector<1x128xf32>
    %31 = vector.broadcast %30 : vector<1x128xf32> to vector<8x128xf32>
    %c2_26 = arith.constant 2 : index
    %c0_27 = arith.constant 0 : index
    %c0_28 = arith.constant 0 : index
    %32 = vector.load %arg4[%c2_26, %c0_27, %c0_28] : memref<4x1x128xf32, #tpu.memory_space<vmem>>, vector<1x1x128xf32>
    %33 = vector.shape_cast %32 : vector<1x1x128xf32> to vector<1x128xf32>
    %34 = vector.shape_cast %33 : vector<1x128xf32> to vector<1x128xf32>
    %35 = vector.broadcast %34 : vector<1x128xf32> to vector<8x128xf32>
    %c3_29 = arith.constant 3 : index
    %c0_30 = arith.constant 0 : index
    %c0_31 = arith.constant 0 : index
    %36 = vector.load %arg4[%c3_29, %c0_30, %c0_31] : memref<4x1x128xf32, #tpu.memory_space<vmem>>, vector<1x1x128xf32>
    %37 = vector.shape_cast %36 : vector<1x1x128xf32> to vector<1x128xf32>
    %38 = vector.shape_cast %37 : vector<1x128xf32> to vector<1x128xf32>
    %39 = vector.broadcast %38 : vector<1x128xf32> to vector<8x128xf32>
    %c0_32 = arith.constant 0 : index
    %c0_33 = arith.constant 0 : index
    %40 = vector.load %arg1[%c0_32, %c0_33] : memref<64x32xf32, #tpu.memory_space<vmem>>, vector<64x32xf32>
    %cst_34 = arith.constant dense<0.000000e+00> : vector<64x128xf32>
    %41 = tpu.matmul %40, %13, %cst_34 {dimension_numbers = #tpu.dot_dimension_numbers<[1], [0], [0], [1], [0, 0, 1, 1], [], []>} : vector<64x32xf32>, vector<32x128xf32>, vector<64x128xf32> -> vector<64x128xf32>
    %c0_35 = arith.constant 0 : index
    %c0_36 = arith.constant 0 : index
    %c0_37 = arith.constant 0 : index
    %42 = vector.load %arg4[%c0_35, %c0_36, %c0_37] : memref<4x1x128xf32, #tpu.memory_space<vmem>>, vector<1x1x128xf32>
    %43 = vector.shape_cast %42 : vector<1x1x128xf32> to vector<1x128xf32>
    %44 = vector.broadcast %43 : vector<1x128xf32> to vector<64x128xf32>
    %45 = arith.addf %41, %44 : vector<64x128xf32>
    %cst_38 = arith.constant 0.000000e+00 : f32
    %46 = vector.broadcast %cst_38 : f32 to vector<8x32xf32>
    %cst_39 = arith.constant 0.000000e+00 : f32
    %47 = vector.broadcast %cst_39 : f32 to vector<8x32xf32>
    %cst_40 = arith.constant 0.000000e+00 : f32
    %48 = vector.broadcast %cst_40 : f32 to vector<8x32xf32>
    %cst_41 = arith.constant 0.000000e+00 : f32
    %49 = vector.broadcast %cst_41 : f32 to vector<8x32xf32>
    %cst_42 = arith.constant 0.000000e+00 : f32
    %50 = vector.broadcast %cst_42 : f32 to vector<8x32xf32>
    %cst_43 = arith.constant 0.000000e+00 : f32
    %51 = vector.broadcast %cst_43 : f32 to vector<8x32xf32>
    %cst_44 = arith.constant 0.000000e+00 : f32
    %52 = vector.broadcast %cst_44 : f32 to vector<8x32xf32>
    %cst_45 = arith.constant 0.000000e+00 : f32
    %53 = vector.broadcast %cst_45 : f32 to vector<8x32xf32>
    %54 = vector.extract_strided_slice %45 {offsets = [0, 0], sizes = [8, 128], strides = [1, 1]} : vector<64x128xf32> to vector<8x128xf32>
    %cst_46 = arith.constant dense<0.000000e+00> : vector<8x128xf32>
    %55 = tpu.matmul %46, %21, %cst_46 {dimension_numbers = #tpu.dot_dimension_numbers<[1], [0], [0], [1], [0, 0, 1, 1], [], []>} : vector<8x32xf32>, vector<32x128xf32>, vector<8x128xf32> -> vector<8x128xf32>
    %56 = arith.addf %54, %55 : vector<8x128xf32>
    %57 = arith.mulf %56, %8 : vector<8x128xf32>
    %58 = math.tanh %57 : vector<8x128xf32>
    %59 = arith.mulf %58, %8 : vector<8x128xf32>
    %60 = arith.addf %59, %11 : vector<8x128xf32>
    %61 = vector.extract_strided_slice %60 {offsets = [0, 0], sizes = [8, 32], strides = [1, 1]} : vector<8x128xf32> to vector<8x32xf32>
    %62 = vector.extract_strided_slice %60 {offsets = [0, 32], sizes = [8, 32], strides = [1, 1]} : vector<8x128xf32> to vector<8x32xf32>
    %63 = vector.extract_strided_slice %60 {offsets = [0, 64], sizes = [8, 32], strides = [1, 1]} : vector<8x128xf32> to vector<8x32xf32>
    %64 = vector.extract_strided_slice %60 {offsets = [0, 96], sizes = [8, 32], strides = [1, 1]} : vector<8x128xf32> to vector<8x32xf32>
    %65 = arith.mulf %62, %50 : vector<8x32xf32>
    %66 = arith.mulf %61, %63 : vector<8x32xf32>
    %67 = arith.addf %65, %66 : vector<8x32xf32>
    %68 = math.tanh %67 : vector<8x32xf32>
    %69 = arith.mulf %64, %68 : vector<8x32xf32>
    %70 = vector.extract_strided_slice %45 {offsets = [8, 0], sizes = [8, 128], strides = [1, 1]} : vector<64x128xf32> to vector<8x128xf32>
    %cst_47 = arith.constant dense<0.000000e+00> : vector<8x128xf32>
    %71 = tpu.matmul %69, %21, %cst_47 {dimension_numbers = #tpu.dot_dimension_numbers<[1], [0], [0], [1], [0, 0, 1, 1], [], []>} : vector<8x32xf32>, vector<32x128xf32>, vector<8x128xf32> -> vector<8x128xf32>
    %72 = arith.addf %70, %71 : vector<8x128xf32>
    %cst_48 = arith.constant dense<0.000000e+00> : vector<8x128xf32>
    %73 = tpu.matmul %69, %15, %cst_48 {dimension_numbers = #tpu.dot_dimension_numbers<[1], [0], [0], [1], [0, 0, 1, 1], [], []>} : vector<8x32xf32>, vector<32x128xf32>, vector<8x128xf32> -> vector<8x128xf32>
    %74 = arith.addf %73, %31 : vector<8x128xf32>
    %cst_49 = arith.constant dense<0.000000e+00> : vector<8x128xf32>
    %75 = tpu.matmul %47, %23, %cst_49 {dimension_numbers = #tpu.dot_dimension_numbers<[1], [0], [0], [1], [0, 0, 1, 1], [], []>} : vector<8x32xf32>, vector<32x128xf32>, vector<8x128xf32> -> vector<8x128xf32>
    %76 = arith.addf %74, %75 : vector<8x128xf32>
    %77 = arith.mulf %72, %8 : vector<8x128xf32>
    %78 = math.tanh %77 : vector<8x128xf32>
    %79 = arith.mulf %78, %8 : vector<8x128xf32>
    %80 = arith.addf %79, %11 : vector<8x128xf32>
    %81 = vector.extract_strided_slice %80 {offsets = [0, 0], sizes = [8, 32], strides = [1, 1]} : vector<8x128xf32> to vector<8x32xf32>
    %82 = vector.extract_strided_slice %80 {offsets = [0, 32], sizes = [8, 32], strides = [1, 1]} : vector<8x128xf32> to vector<8x32xf32>
    %83 = vector.extract_strided_slice %80 {offsets = [0, 64], sizes = [8, 32], strides = [1, 1]} : vector<8x128xf32> to vector<8x32xf32>
    %84 = vector.extract_strided_slice %80 {offsets = [0, 96], sizes = [8, 32], strides = [1, 1]} : vector<8x128xf32> to vector<8x32xf32>
    %85 = arith.mulf %82, %67 : vector<8x32xf32>
    %86 = arith.mulf %81, %83 : vector<8x32xf32>
    %87 = arith.addf %85, %86 : vector<8x32xf32>
    %88 = math.tanh %87 : vector<8x32xf32>
    %89 = arith.mulf %84, %88 : vector<8x32xf32>
    %90 = arith.mulf %76, %8 : vector<8x128xf32>
    %91 = math.tanh %90 : vector<8x128xf32>
    %92 = arith.mulf %91, %8 : vector<8x128xf32>
    %93 = arith.addf %92, %11 : vector<8x128xf32>
    %94 = vector.extract_strided_slice %93 {offsets = [0, 0], sizes = [8, 32], strides = [1, 1]} : vector<8x128xf32> to vector<8x32xf32>
    %95 = vector.extract_strided_slice %93 {offsets = [0, 32], sizes = [8, 32], strides = [1, 1]} : vector<8x128xf32> to vector<8x32xf32>
    %96 = vector.extract_strided_slice %93 {offsets = [0, 64], sizes = [8, 32], strides = [1, 1]} : vector<8x128xf32> to vector<8x32xf32>
    %97 = vector.extract_strided_slice %93 {offsets = [0, 96], sizes = [8, 32], strides = [1, 1]} : vector<8x128xf32> to vector<8x32xf32>
    %98 = arith.mulf %95, %51 : vector<8x32xf32>
    %99 = arith.mulf %94, %96 : vector<8x32xf32>
    %100 = arith.addf %98, %99 : vector<8x32xf32>
    %101 = math.tanh %100 : vector<8x32xf32>
    %102 = arith.mulf %97, %101 : vector<8x32xf32>
    %103 = vector.extract_strided_slice %45 {offsets = [16, 0], sizes = [8, 128], strides = [1, 1]} : vector<64x128xf32> to vector<8x128xf32>
    %cst_50 = arith.constant dense<0.000000e+00> : vector<8x128xf32>
    %104 = tpu.matmul %89, %21, %cst_50 {dimension_numbers = #tpu.dot_dimension_numbers<[1], [0], [0], [1], [0, 0, 1, 1], [], []>} : vector<8x32xf32>, vector<32x128xf32>, vector<8x128xf32> -> vector<8x128xf32>
    %105 = arith.addf %103, %104 : vector<8x128xf32>
    %cst_51 = arith.constant dense<0.000000e+00> : vector<8x128xf32>
    %106 = tpu.matmul %89, %15, %cst_51 {dimension_numbers = #tpu.dot_dimension_numbers<[1], [0], [0], [1], [0, 0, 1, 1], [], []>} : vector<8x32xf32>, vector<32x128xf32>, vector<8x128xf32> -> vector<8x128xf32>
    %107 = arith.addf %106, %31 : vector<8x128xf32>
    %cst_52 = arith.constant dense<0.000000e+00> : vector<8x128xf32>
    %108 = tpu.matmul %102, %23, %cst_52 {dimension_numbers = #tpu.dot_dimension_numbers<[1], [0], [0], [1], [0, 0, 1, 1], [], []>} : vector<8x32xf32>, vector<32x128xf32>, vector<8x128xf32> -> vector<8x128xf32>
    %109 = arith.addf %107, %108 : vector<8x128xf32>
    %cst_53 = arith.constant dense<0.000000e+00> : vector<8x128xf32>
    %110 = tpu.matmul %102, %17, %cst_53 {dimension_numbers = #tpu.dot_dimension_numbers<[1], [0], [0], [1], [0, 0, 1, 1], [], []>} : vector<8x32xf32>, vector<32x128xf32>, vector<8x128xf32> -> vector<8x128xf32>
    %111 = arith.addf %110, %35 : vector<8x128xf32>
    %cst_54 = arith.constant dense<0.000000e+00> : vector<8x128xf32>
    %112 = tpu.matmul %48, %25, %cst_54 {dimension_numbers = #tpu.dot_dimension_numbers<[1], [0], [0], [1], [0, 0, 1, 1], [], []>} : vector<8x32xf32>, vector<32x128xf32>, vector<8x128xf32> -> vector<8x128xf32>
    %113 = arith.addf %111, %112 : vector<8x128xf32>
    %114 = arith.mulf %105, %8 : vector<8x128xf32>
    %115 = math.tanh %114 : vector<8x128xf32>
    %116 = arith.mulf %115, %8 : vector<8x128xf32>
    %117 = arith.addf %116, %11 : vector<8x128xf32>
    %118 = vector.extract_strided_slice %117 {offsets = [0, 0], sizes = [8, 32], strides = [1, 1]} : vector<8x128xf32> to vector<8x32xf32>
    %119 = vector.extract_strided_slice %117 {offsets = [0, 32], sizes = [8, 32], strides = [1, 1]} : vector<8x128xf32> to vector<8x32xf32>
    %120 = vector.extract_strided_slice %117 {offsets = [0, 64], sizes = [8, 32], strides = [1, 1]} : vector<8x128xf32> to vector<8x32xf32>
    %121 = vector.extract_strided_slice %117 {offsets = [0, 96], sizes = [8, 32], strides = [1, 1]} : vector<8x128xf32> to vector<8x32xf32>
    %122 = arith.mulf %119, %87 : vector<8x32xf32>
    %123 = arith.mulf %118, %120 : vector<8x32xf32>
    %124 = arith.addf %122, %123 : vector<8x32xf32>
    %125 = math.tanh %124 : vector<8x32xf32>
    %126 = arith.mulf %121, %125 : vector<8x32xf32>
    %127 = arith.mulf %109, %8 : vector<8x128xf32>
    %128 = math.tanh %127 : vector<8x128xf32>
    %129 = arith.mulf %128, %8 : vector<8x128xf32>
    %130 = arith.addf %129, %11 : vector<8x128xf32>
    %131 = vector.extract_strided_slice %130 {offsets = [0, 0], sizes = [8, 32], strides = [1, 1]} : vector<8x128xf32> to vector<8x32xf32>
    %132 = vector.extract_strided_slice %130 {offsets = [0, 32], sizes = [8, 32], strides = [1, 1]} : vector<8x128xf32> to vector<8x32xf32>
    %133 = vector.extract_strided_slice %130 {offsets = [0, 64], sizes = [8, 32], strides = [1, 1]} : vector<8x128xf32> to vector<8x32xf32>
    %134 = vector.extract_strided_slice %130 {offsets = [0, 96], sizes = [8, 32], strides = [1, 1]} : vector<8x128xf32> to vector<8x32xf32>
    %135 = arith.mulf %132, %100 : vector<8x32xf32>
    %136 = arith.mulf %131, %133 : vector<8x32xf32>
    %137 = arith.addf %135, %136 : vector<8x32xf32>
    %138 = math.tanh %137 : vector<8x32xf32>
    %139 = arith.mulf %134, %138 : vector<8x32xf32>
    %140 = arith.mulf %113, %8 : vector<8x128xf32>
    %141 = math.tanh %140 : vector<8x128xf32>
    %142 = arith.mulf %141, %8 : vector<8x128xf32>
    %143 = arith.addf %142, %11 : vector<8x128xf32>
    %144 = vector.extract_strided_slice %143 {offsets = [0, 0], sizes = [8, 32], strides = [1, 1]} : vector<8x128xf32> to vector<8x32xf32>
    %145 = vector.extract_strided_slice %143 {offsets = [0, 32], sizes = [8, 32], strides = [1, 1]} : vector<8x128xf32> to vector<8x32xf32>
    %146 = vector.extract_strided_slice %143 {offsets = [0, 64], sizes = [8, 32], strides = [1, 1]} : vector<8x128xf32> to vector<8x32xf32>
    %147 = vector.extract_strided_slice %143 {offsets = [0, 96], sizes = [8, 32], strides = [1, 1]} : vector<8x128xf32> to vector<8x32xf32>
    %148 = arith.mulf %145, %52 : vector<8x32xf32>
    %149 = arith.mulf %144, %146 : vector<8x32xf32>
    %150 = arith.addf %148, %149 : vector<8x32xf32>
    %151 = math.tanh %150 : vector<8x32xf32>
    %152 = arith.mulf %147, %151 : vector<8x32xf32>
    %153 = vector.extract_strided_slice %45 {offsets = [24, 0], sizes = [8, 128], strides = [1, 1]} : vector<64x128xf32> to vector<8x128xf32>
    %cst_55 = arith.constant dense<0.000000e+00> : vector<8x128xf32>
    %154 = tpu.matmul %126, %21, %cst_55 {dimension_numbers = #tpu.dot_dimension_numbers<[1], [0], [0], [1], [0, 0, 1, 1], [], []>} : vector<8x32xf32>, vector<32x128xf32>, vector<8x128xf32> -> vector<8x128xf32>
    %155 = arith.addf %153, %154 : vector<8x128xf32>
    %cst_56 = arith.constant dense<0.000000e+00> : vector<8x128xf32>
    %156 = tpu.matmul %126, %15, %cst_56 {dimension_numbers = #tpu.dot_dimension_numbers<[1], [0], [0], [1], [0, 0, 1, 1], [], []>} : vector<8x32xf32>, vector<32x128xf32>, vector<8x128xf32> -> vector<8x128xf32>
    %157 = arith.addf %156, %31 : vector<8x128xf32>
    %cst_57 = arith.constant dense<0.000000e+00> : vector<8x128xf32>
    %158 = tpu.matmul %139, %23, %cst_57 {dimension_numbers = #tpu.dot_dimension_numbers<[1], [0], [0], [1], [0, 0, 1, 1], [], []>} : vector<8x32xf32>, vector<32x128xf32>, vector<8x128xf32> -> vector<8x128xf32>
    %159 = arith.addf %157, %158 : vector<8x128xf32>
    %cst_58 = arith.constant dense<0.000000e+00> : vector<8x128xf32>
    %160 = tpu.matmul %139, %17, %cst_58 {dimension_numbers = #tpu.dot_dimension_numbers<[1], [0], [0], [1], [0, 0, 1, 1], [], []>} : vector<8x32xf32>, vector<32x128xf32>, vector<8x128xf32> -> vector<8x128xf32>
    %161 = arith.addf %160, %35 : vector<8x128xf32>
    %cst_59 = arith.constant dense<0.000000e+00> : vector<8x128xf32>
    %162 = tpu.matmul %152, %25, %cst_59 {dimension_numbers = #tpu.dot_dimension_numbers<[1], [0], [0], [1], [0, 0, 1, 1], [], []>} : vector<8x32xf32>, vector<32x128xf32>, vector<8x128xf32> -> vector<8x128xf32>
    %163 = arith.addf %161, %162 : vector<8x128xf32>
    %cst_60 = arith.constant dense<0.000000e+00> : vector<8x128xf32>
    %164 = tpu.matmul %152, %19, %cst_60 {dimension_numbers = #tpu.dot_dimension_numbers<[1], [0], [0], [1], [0, 0, 1, 1], [], []>} : vector<8x32xf32>, vector<32x128xf32>, vector<8x128xf32> -> vector<8x128xf32>
    %165 = arith.addf %164, %39 : vector<8x128xf32>
    %cst_61 = arith.constant dense<0.000000e+00> : vector<8x128xf32>
    %166 = tpu.matmul %49, %27, %cst_61 {dimension_numbers = #tpu.dot_dimension_numbers<[1], [0], [0], [1], [0, 0, 1, 1], [], []>} : vector<8x32xf32>, vector<32x128xf32>, vector<8x128xf32> -> vector<8x128xf32>
    %167 = arith.addf %165, %166 : vector<8x128xf32>
    %168 = arith.mulf %155, %8 : vector<8x128xf32>
    %169 = math.tanh %168 : vector<8x128xf32>
    %170 = arith.mulf %169, %8 : vector<8x128xf32>
    %171 = arith.addf %170, %11 : vector<8x128xf32>
    %172 = vector.extract_strided_slice %171 {offsets = [0, 0], sizes = [8, 32], strides = [1, 1]} : vector<8x128xf32> to vector<8x32xf32>
    %173 = vector.extract_strided_slice %171 {offsets = [0, 32], sizes = [8, 32], strides = [1, 1]} : vector<8x128xf32> to vector<8x32xf32>
    %174 = vector.extract_strided_slice %171 {offsets = [0, 64], sizes = [8, 32], strides = [1, 1]} : vector<8x128xf32> to vector<8x32xf32>
    %175 = vector.extract_strided_slice %171 {offsets = [0, 96], sizes = [8, 32], strides = [1, 1]} : vector<8x128xf32> to vector<8x32xf32>
    %176 = arith.mulf %173, %124 : vector<8x32xf32>
    %177 = arith.mulf %172, %174 : vector<8x32xf32>
    %178 = arith.addf %176, %177 : vector<8x32xf32>
    %179 = math.tanh %178 : vector<8x32xf32>
    %180 = arith.mulf %175, %179 : vector<8x32xf32>
    %181 = arith.mulf %159, %8 : vector<8x128xf32>
    %182 = math.tanh %181 : vector<8x128xf32>
    %183 = arith.mulf %182, %8 : vector<8x128xf32>
    %184 = arith.addf %183, %11 : vector<8x128xf32>
    %185 = vector.extract_strided_slice %184 {offsets = [0, 0], sizes = [8, 32], strides = [1, 1]} : vector<8x128xf32> to vector<8x32xf32>
    %186 = vector.extract_strided_slice %184 {offsets = [0, 32], sizes = [8, 32], strides = [1, 1]} : vector<8x128xf32> to vector<8x32xf32>
    %187 = vector.extract_strided_slice %184 {offsets = [0, 64], sizes = [8, 32], strides = [1, 1]} : vector<8x128xf32> to vector<8x32xf32>
    %188 = vector.extract_strided_slice %184 {offsets = [0, 96], sizes = [8, 32], strides = [1, 1]} : vector<8x128xf32> to vector<8x32xf32>
    %189 = arith.mulf %186, %137 : vector<8x32xf32>
    %190 = arith.mulf %185, %187 : vector<8x32xf32>
    %191 = arith.addf %189, %190 : vector<8x32xf32>
    %192 = math.tanh %191 : vector<8x32xf32>
    %193 = arith.mulf %188, %192 : vector<8x32xf32>
    %194 = arith.mulf %163, %8 : vector<8x128xf32>
    %195 = math.tanh %194 : vector<8x128xf32>
    %196 = arith.mulf %195, %8 : vector<8x128xf32>
    %197 = arith.addf %196, %11 : vector<8x128xf32>
    %198 = vector.extract_strided_slice %197 {offsets = [0, 0], sizes = [8, 32], strides = [1, 1]} : vector<8x128xf32> to vector<8x32xf32>
    %199 = vector.extract_strided_slice %197 {offsets = [0, 32], sizes = [8, 32], strides = [1, 1]} : vector<8x128xf32> to vector<8x32xf32>
    %200 = vector.extract_strided_slice %197 {offsets = [0, 64], sizes = [8, 32], strides = [1, 1]} : vector<8x128xf32> to vector<8x32xf32>
    %201 = vector.extract_strided_slice %197 {offsets = [0, 96], sizes = [8, 32], strides = [1, 1]} : vector<8x128xf32> to vector<8x32xf32>
    %202 = arith.mulf %199, %150 : vector<8x32xf32>
    %203 = arith.mulf %198, %200 : vector<8x32xf32>
    %204 = arith.addf %202, %203 : vector<8x32xf32>
    %205 = math.tanh %204 : vector<8x32xf32>
    %206 = arith.mulf %201, %205 : vector<8x32xf32>
    %207 = arith.mulf %167, %8 : vector<8x128xf32>
    %208 = math.tanh %207 : vector<8x128xf32>
    %209 = arith.mulf %208, %8 : vector<8x128xf32>
    %210 = arith.addf %209, %11 : vector<8x128xf32>
    %211 = vector.extract_strided_slice %210 {offsets = [0, 0], sizes = [8, 32], strides = [1, 1]} : vector<8x128xf32> to vector<8x32xf32>
    %212 = vector.extract_strided_slice %210 {offsets = [0, 32], sizes = [8, 32], strides = [1, 1]} : vector<8x128xf32> to vector<8x32xf32>
    %213 = vector.extract_strided_slice %210 {offsets = [0, 64], sizes = [8, 32], strides = [1, 1]} : vector<8x128xf32> to vector<8x32xf32>
    %214 = vector.extract_strided_slice %210 {offsets = [0, 96], sizes = [8, 32], strides = [1, 1]} : vector<8x128xf32> to vector<8x32xf32>
    %215 = arith.mulf %212, %53 : vector<8x32xf32>
    %216 = arith.mulf %211, %213 : vector<8x32xf32>
    %217 = arith.addf %215, %216 : vector<8x32xf32>
    %218 = math.tanh %217 : vector<8x32xf32>
    %219 = arith.mulf %214, %218 : vector<8x32xf32>
    %220 = vector.extract_strided_slice %45 {offsets = [32, 0], sizes = [8, 128], strides = [1, 1]} : vector<64x128xf32> to vector<8x128xf32>
    %cst_62 = arith.constant dense<0.000000e+00> : vector<8x128xf32>
    %221 = tpu.matmul %180, %21, %cst_62 {dimension_numbers = #tpu.dot_dimension_numbers<[1], [0], [0], [1], [0, 0, 1, 1], [], []>} : vector<8x32xf32>, vector<32x128xf32>, vector<8x128xf32> -> vector<8x128xf32>
    %222 = arith.addf %220, %221 : vector<8x128xf32>
    %cst_63 = arith.constant dense<0.000000e+00> : vector<8x128xf32>
    %223 = tpu.matmul %180, %15, %cst_63 {dimension_numbers = #tpu.dot_dimension_numbers<[1], [0], [0], [1], [0, 0, 1, 1], [], []>} : vector<8x32xf32>, vector<32x128xf32>, vector<8x128xf32> -> vector<8x128xf32>
    %224 = arith.addf %223, %31 : vector<8x128xf32>
    %cst_64 = arith.constant dense<0.000000e+00> : vector<8x128xf32>
    %225 = tpu.matmul %193, %23, %cst_64 {dimension_numbers = #tpu.dot_dimension_numbers<[1], [0], [0], [1], [0, 0, 1, 1], [], []>} : vector<8x32xf32>, vector<32x128xf32>, vector<8x128xf32> -> vector<8x128xf32>
    %226 = arith.addf %224, %225 : vector<8x128xf32>
    %cst_65 = arith.constant dense<0.000000e+00> : vector<8x128xf32>
    %227 = tpu.matmul %193, %17, %cst_65 {dimension_numbers = #tpu.dot_dimension_numbers<[1], [0], [0], [1], [0, 0, 1, 1], [], []>} : vector<8x32xf32>, vector<32x128xf32>, vector<8x128xf32> -> vector<8x128xf32>
    %228 = arith.addf %227, %35 : vector<8x128xf32>
    %cst_66 = arith.constant dense<0.000000e+00> : vector<8x128xf32>
    %229 = tpu.matmul %206, %25, %cst_66 {dimension_numbers = #tpu.dot_dimension_numbers<[1], [0], [0], [1], [0, 0, 1, 1], [], []>} : vector<8x32xf32>, vector<32x128xf32>, vector<8x128xf32> -> vector<8x128xf32>
    %230 = arith.addf %228, %229 : vector<8x128xf32>
    %cst_67 = arith.constant dense<0.000000e+00> : vector<8x128xf32>
    %231 = tpu.matmul %206, %19, %cst_67 {dimension_numbers = #tpu.dot_dimension_numbers<[1], [0], [0], [1], [0, 0, 1, 1], [], []>} : vector<8x32xf32>, vector<32x128xf32>, vector<8x128xf32> -> vector<8x128xf32>
    %232 = arith.addf %231, %39 : vector<8x128xf32>
    %cst_68 = arith.constant dense<0.000000e+00> : vector<8x128xf32>
    %233 = tpu.matmul %219, %27, %cst_68 {dimension_numbers = #tpu.dot_dimension_numbers<[1], [0], [0], [1], [0, 0, 1, 1], [], []>} : vector<8x32xf32>, vector<32x128xf32>, vector<8x128xf32> -> vector<8x128xf32>
    %234 = arith.addf %232, %233 : vector<8x128xf32>
    %235 = arith.mulf %222, %8 : vector<8x128xf32>
    %236 = math.tanh %235 : vector<8x128xf32>
    %237 = arith.mulf %236, %8 : vector<8x128xf32>
    %238 = arith.addf %237, %11 : vector<8x128xf32>
    %239 = vector.extract_strided_slice %238 {offsets = [0, 0], sizes = [8, 32], strides = [1, 1]} : vector<8x128xf32> to vector<8x32xf32>
    %240 = vector.extract_strided_slice %238 {offsets = [0, 32], sizes = [8, 32], strides = [1, 1]} : vector<8x128xf32> to vector<8x32xf32>
    %241 = vector.extract_strided_slice %238 {offsets = [0, 64], sizes = [8, 32], strides = [1, 1]} : vector<8x128xf32> to vector<8x32xf32>
    %242 = vector.extract_strided_slice %238 {offsets = [0, 96], sizes = [8, 32], strides = [1, 1]} : vector<8x128xf32> to vector<8x32xf32>
    %243 = arith.mulf %240, %178 : vector<8x32xf32>
    %244 = arith.mulf %239, %241 : vector<8x32xf32>
    %245 = arith.addf %243, %244 : vector<8x32xf32>
    %246 = math.tanh %245 : vector<8x32xf32>
    %247 = arith.mulf %242, %246 : vector<8x32xf32>
    %248 = arith.mulf %226, %8 : vector<8x128xf32>
    %249 = math.tanh %248 : vector<8x128xf32>
    %250 = arith.mulf %249, %8 : vector<8x128xf32>
    %251 = arith.addf %250, %11 : vector<8x128xf32>
    %252 = vector.extract_strided_slice %251 {offsets = [0, 0], sizes = [8, 32], strides = [1, 1]} : vector<8x128xf32> to vector<8x32xf32>
    %253 = vector.extract_strided_slice %251 {offsets = [0, 32], sizes = [8, 32], strides = [1, 1]} : vector<8x128xf32> to vector<8x32xf32>
    %254 = vector.extract_strided_slice %251 {offsets = [0, 64], sizes = [8, 32], strides = [1, 1]} : vector<8x128xf32> to vector<8x32xf32>
    %255 = vector.extract_strided_slice %251 {offsets = [0, 96], sizes = [8, 32], strides = [1, 1]} : vector<8x128xf32> to vector<8x32xf32>
    %256 = arith.mulf %253, %191 : vector<8x32xf32>
    %257 = arith.mulf %252, %254 : vector<8x32xf32>
    %258 = arith.addf %256, %257 : vector<8x32xf32>
    %259 = math.tanh %258 : vector<8x32xf32>
    %260 = arith.mulf %255, %259 : vector<8x32xf32>
    %261 = arith.mulf %230, %8 : vector<8x128xf32>
    %262 = math.tanh %261 : vector<8x128xf32>
    %263 = arith.mulf %262, %8 : vector<8x128xf32>
    %264 = arith.addf %263, %11 : vector<8x128xf32>
    %265 = vector.extract_strided_slice %264 {offsets = [0, 0], sizes = [8, 32], strides = [1, 1]} : vector<8x128xf32> to vector<8x32xf32>
    %266 = vector.extract_strided_slice %264 {offsets = [0, 32], sizes = [8, 32], strides = [1, 1]} : vector<8x128xf32> to vector<8x32xf32>
    %267 = vector.extract_strided_slice %264 {offsets = [0, 64], sizes = [8, 32], strides = [1, 1]} : vector<8x128xf32> to vector<8x32xf32>
    %268 = vector.extract_strided_slice %264 {offsets = [0, 96], sizes = [8, 32], strides = [1, 1]} : vector<8x128xf32> to vector<8x32xf32>
    %269 = arith.mulf %266, %204 : vector<8x32xf32>
    %270 = arith.mulf %265, %267 : vector<8x32xf32>
    %271 = arith.addf %269, %270 : vector<8x32xf32>
    %272 = math.tanh %271 : vector<8x32xf32>
    %273 = arith.mulf %268, %272 : vector<8x32xf32>
    %274 = arith.mulf %234, %8 : vector<8x128xf32>
    %275 = math.tanh %274 : vector<8x128xf32>
    %276 = arith.mulf %275, %8 : vector<8x128xf32>
    %277 = arith.addf %276, %11 : vector<8x128xf32>
    %278 = vector.extract_strided_slice %277 {offsets = [0, 0], sizes = [8, 32], strides = [1, 1]} : vector<8x128xf32> to vector<8x32xf32>
    %279 = vector.extract_strided_slice %277 {offsets = [0, 32], sizes = [8, 32], strides = [1, 1]} : vector<8x128xf32> to vector<8x32xf32>
    %280 = vector.extract_strided_slice %277 {offsets = [0, 64], sizes = [8, 32], strides = [1, 1]} : vector<8x128xf32> to vector<8x32xf32>
    %281 = vector.extract_strided_slice %277 {offsets = [0, 96], sizes = [8, 32], strides = [1, 1]} : vector<8x128xf32> to vector<8x32xf32>
    %282 = arith.mulf %279, %217 : vector<8x32xf32>
    %283 = arith.mulf %278, %280 : vector<8x32xf32>
    %284 = arith.addf %282, %283 : vector<8x32xf32>
    %285 = math.tanh %284 : vector<8x32xf32>
    %286 = arith.mulf %281, %285 : vector<8x32xf32>
    %287 = vector.extract_strided_slice %45 {offsets = [40, 0], sizes = [8, 128], strides = [1, 1]} : vector<64x128xf32> to vector<8x128xf32>
    %cst_69 = arith.constant dense<0.000000e+00> : vector<8x128xf32>
    %288 = tpu.matmul %247, %21, %cst_69 {dimension_numbers = #tpu.dot_dimension_numbers<[1], [0], [0], [1], [0, 0, 1, 1], [], []>} : vector<8x32xf32>, vector<32x128xf32>, vector<8x128xf32> -> vector<8x128xf32>
    %289 = arith.addf %287, %288 : vector<8x128xf32>
    %cst_70 = arith.constant dense<0.000000e+00> : vector<8x128xf32>
    %290 = tpu.matmul %247, %15, %cst_70 {dimension_numbers = #tpu.dot_dimension_numbers<[1], [0], [0], [1], [0, 0, 1, 1], [], []>} : vector<8x32xf32>, vector<32x128xf32>, vector<8x128xf32> -> vector<8x128xf32>
    %291 = arith.addf %290, %31 : vector<8x128xf32>
    %cst_71 = arith.constant dense<0.000000e+00> : vector<8x128xf32>
    %292 = tpu.matmul %260, %23, %cst_71 {dimension_numbers = #tpu.dot_dimension_numbers<[1], [0], [0], [1], [0, 0, 1, 1], [], []>} : vector<8x32xf32>, vector<32x128xf32>, vector<8x128xf32> -> vector<8x128xf32>
    %293 = arith.addf %291, %292 : vector<8x128xf32>
    %cst_72 = arith.constant dense<0.000000e+00> : vector<8x128xf32>
    %294 = tpu.matmul %260, %17, %cst_72 {dimension_numbers = #tpu.dot_dimension_numbers<[1], [0], [0], [1], [0, 0, 1, 1], [], []>} : vector<8x32xf32>, vector<32x128xf32>, vector<8x128xf32> -> vector<8x128xf32>
    %295 = arith.addf %294, %35 : vector<8x128xf32>
    %cst_73 = arith.constant dense<0.000000e+00> : vector<8x128xf32>
    %296 = tpu.matmul %273, %25, %cst_73 {dimension_numbers = #tpu.dot_dimension_numbers<[1], [0], [0], [1], [0, 0, 1, 1], [], []>} : vector<8x32xf32>, vector<32x128xf32>, vector<8x128xf32> -> vector<8x128xf32>
    %297 = arith.addf %295, %296 : vector<8x128xf32>
    %cst_74 = arith.constant dense<0.000000e+00> : vector<8x128xf32>
    %298 = tpu.matmul %273, %19, %cst_74 {dimension_numbers = #tpu.dot_dimension_numbers<[1], [0], [0], [1], [0, 0, 1, 1], [], []>} : vector<8x32xf32>, vector<32x128xf32>, vector<8x128xf32> -> vector<8x128xf32>
    %299 = arith.addf %298, %39 : vector<8x128xf32>
    %cst_75 = arith.constant dense<0.000000e+00> : vector<8x128xf32>
    %300 = tpu.matmul %286, %27, %cst_75 {dimension_numbers = #tpu.dot_dimension_numbers<[1], [0], [0], [1], [0, 0, 1, 1], [], []>} : vector<8x32xf32>, vector<32x128xf32>, vector<8x128xf32> -> vector<8x128xf32>
    %301 = arith.addf %299, %300 : vector<8x128xf32>
    %302 = arith.mulf %289, %8 : vector<8x128xf32>
    %303 = math.tanh %302 : vector<8x128xf32>
    %304 = arith.mulf %303, %8 : vector<8x128xf32>
    %305 = arith.addf %304, %11 : vector<8x128xf32>
    %306 = vector.extract_strided_slice %305 {offsets = [0, 0], sizes = [8, 32], strides = [1, 1]} : vector<8x128xf32> to vector<8x32xf32>
    %307 = vector.extract_strided_slice %305 {offsets = [0, 32], sizes = [8, 32], strides = [1, 1]} : vector<8x128xf32> to vector<8x32xf32>
    %308 = vector.extract_strided_slice %305 {offsets = [0, 64], sizes = [8, 32], strides = [1, 1]} : vector<8x128xf32> to vector<8x32xf32>
    %309 = vector.extract_strided_slice %305 {offsets = [0, 96], sizes = [8, 32], strides = [1, 1]} : vector<8x128xf32> to vector<8x32xf32>
    %310 = arith.mulf %307, %245 : vector<8x32xf32>
    %311 = arith.mulf %306, %308 : vector<8x32xf32>
    %312 = arith.addf %310, %311 : vector<8x32xf32>
    %313 = math.tanh %312 : vector<8x32xf32>
    %314 = arith.mulf %309, %313 : vector<8x32xf32>
    %315 = arith.mulf %293, %8 : vector<8x128xf32>
    %316 = math.tanh %315 : vector<8x128xf32>
    %317 = arith.mulf %316, %8 : vector<8x128xf32>
    %318 = arith.addf %317, %11 : vector<8x128xf32>
    %319 = vector.extract_strided_slice %318 {offsets = [0, 0], sizes = [8, 32], strides = [1, 1]} : vector<8x128xf32> to vector<8x32xf32>
    %320 = vector.extract_strided_slice %318 {offsets = [0, 32], sizes = [8, 32], strides = [1, 1]} : vector<8x128xf32> to vector<8x32xf32>
    %321 = vector.extract_strided_slice %318 {offsets = [0, 64], sizes = [8, 32], strides = [1, 1]} : vector<8x128xf32> to vector<8x32xf32>
    %322 = vector.extract_strided_slice %318 {offsets = [0, 96], sizes = [8, 32], strides = [1, 1]} : vector<8x128xf32> to vector<8x32xf32>
    %323 = arith.mulf %320, %258 : vector<8x32xf32>
    %324 = arith.mulf %319, %321 : vector<8x32xf32>
    %325 = arith.addf %323, %324 : vector<8x32xf32>
    %326 = math.tanh %325 : vector<8x32xf32>
    %327 = arith.mulf %322, %326 : vector<8x32xf32>
    %328 = arith.mulf %297, %8 : vector<8x128xf32>
    %329 = math.tanh %328 : vector<8x128xf32>
    %330 = arith.mulf %329, %8 : vector<8x128xf32>
    %331 = arith.addf %330, %11 : vector<8x128xf32>
    %332 = vector.extract_strided_slice %331 {offsets = [0, 0], sizes = [8, 32], strides = [1, 1]} : vector<8x128xf32> to vector<8x32xf32>
    %333 = vector.extract_strided_slice %331 {offsets = [0, 32], sizes = [8, 32], strides = [1, 1]} : vector<8x128xf32> to vector<8x32xf32>
    %334 = vector.extract_strided_slice %331 {offsets = [0, 64], sizes = [8, 32], strides = [1, 1]} : vector<8x128xf32> to vector<8x32xf32>
    %335 = vector.extract_strided_slice %331 {offsets = [0, 96], sizes = [8, 32], strides = [1, 1]} : vector<8x128xf32> to vector<8x32xf32>
    %336 = arith.mulf %333, %271 : vector<8x32xf32>
    %337 = arith.mulf %332, %334 : vector<8x32xf32>
    %338 = arith.addf %336, %337 : vector<8x32xf32>
    %339 = math.tanh %338 : vector<8x32xf32>
    %340 = arith.mulf %335, %339 : vector<8x32xf32>
    %341 = arith.mulf %301, %8 : vector<8x128xf32>
    %342 = math.tanh %341 : vector<8x128xf32>
    %343 = arith.mulf %342, %8 : vector<8x128xf32>
    %344 = arith.addf %343, %11 : vector<8x128xf32>
    %345 = vector.extract_strided_slice %344 {offsets = [0, 0], sizes = [8, 32], strides = [1, 1]} : vector<8x128xf32> to vector<8x32xf32>
    %346 = vector.extract_strided_slice %344 {offsets = [0, 32], sizes = [8, 32], strides = [1, 1]} : vector<8x128xf32> to vector<8x32xf32>
    %347 = vector.extract_strided_slice %344 {offsets = [0, 64], sizes = [8, 32], strides = [1, 1]} : vector<8x128xf32> to vector<8x32xf32>
    %348 = vector.extract_strided_slice %344 {offsets = [0, 96], sizes = [8, 32], strides = [1, 1]} : vector<8x128xf32> to vector<8x32xf32>
    %349 = arith.mulf %346, %284 : vector<8x32xf32>
    %350 = arith.mulf %345, %347 : vector<8x32xf32>
    %351 = arith.addf %349, %350 : vector<8x32xf32>
    %352 = math.tanh %351 : vector<8x32xf32>
    %353 = arith.mulf %348, %352 : vector<8x32xf32>
    %354 = vector.extract_strided_slice %45 {offsets = [48, 0], sizes = [8, 128], strides = [1, 1]} : vector<64x128xf32> to vector<8x128xf32>
    %cst_76 = arith.constant dense<0.000000e+00> : vector<8x128xf32>
    %355 = tpu.matmul %314, %21, %cst_76 {dimension_numbers = #tpu.dot_dimension_numbers<[1], [0], [0], [1], [0, 0, 1, 1], [], []>} : vector<8x32xf32>, vector<32x128xf32>, vector<8x128xf32> -> vector<8x128xf32>
    %356 = arith.addf %354, %355 : vector<8x128xf32>
    %cst_77 = arith.constant dense<0.000000e+00> : vector<8x128xf32>
    %357 = tpu.matmul %314, %15, %cst_77 {dimension_numbers = #tpu.dot_dimension_numbers<[1], [0], [0], [1], [0, 0, 1, 1], [], []>} : vector<8x32xf32>, vector<32x128xf32>, vector<8x128xf32> -> vector<8x128xf32>
    %358 = arith.addf %357, %31 : vector<8x128xf32>
    %cst_78 = arith.constant dense<0.000000e+00> : vector<8x128xf32>
    %359 = tpu.matmul %327, %23, %cst_78 {dimension_numbers = #tpu.dot_dimension_numbers<[1], [0], [0], [1], [0, 0, 1, 1], [], []>} : vector<8x32xf32>, vector<32x128xf32>, vector<8x128xf32> -> vector<8x128xf32>
    %360 = arith.addf %358, %359 : vector<8x128xf32>
    %cst_79 = arith.constant dense<0.000000e+00> : vector<8x128xf32>
    %361 = tpu.matmul %327, %17, %cst_79 {dimension_numbers = #tpu.dot_dimension_numbers<[1], [0], [0], [1], [0, 0, 1, 1], [], []>} : vector<8x32xf32>, vector<32x128xf32>, vector<8x128xf32> -> vector<8x128xf32>
    %362 = arith.addf %361, %35 : vector<8x128xf32>
    %cst_80 = arith.constant dense<0.000000e+00> : vector<8x128xf32>
    %363 = tpu.matmul %340, %25, %cst_80 {dimension_numbers = #tpu.dot_dimension_numbers<[1], [0], [0], [1], [0, 0, 1, 1], [], []>} : vector<8x32xf32>, vector<32x128xf32>, vector<8x128xf32> -> vector<8x128xf32>
    %364 = arith.addf %362, %363 : vector<8x128xf32>
    %cst_81 = arith.constant dense<0.000000e+00> : vector<8x128xf32>
    %365 = tpu.matmul %340, %19, %cst_81 {dimension_numbers = #tpu.dot_dimension_numbers<[1], [0], [0], [1], [0, 0, 1, 1], [], []>} : vector<8x32xf32>, vector<32x128xf32>, vector<8x128xf32> -> vector<8x128xf32>
    %366 = arith.addf %365, %39 : vector<8x128xf32>
    %cst_82 = arith.constant dense<0.000000e+00> : vector<8x128xf32>
    %367 = tpu.matmul %353, %27, %cst_82 {dimension_numbers = #tpu.dot_dimension_numbers<[1], [0], [0], [1], [0, 0, 1, 1], [], []>} : vector<8x32xf32>, vector<32x128xf32>, vector<8x128xf32> -> vector<8x128xf32>
    %368 = arith.addf %366, %367 : vector<8x128xf32>
    %369 = arith.mulf %356, %8 : vector<8x128xf32>
    %370 = math.tanh %369 : vector<8x128xf32>
    %371 = arith.mulf %370, %8 : vector<8x128xf32>
    %372 = arith.addf %371, %11 : vector<8x128xf32>
    %373 = vector.extract_strided_slice %372 {offsets = [0, 0], sizes = [8, 32], strides = [1, 1]} : vector<8x128xf32> to vector<8x32xf32>
    %374 = vector.extract_strided_slice %372 {offsets = [0, 32], sizes = [8, 32], strides = [1, 1]} : vector<8x128xf32> to vector<8x32xf32>
    %375 = vector.extract_strided_slice %372 {offsets = [0, 64], sizes = [8, 32], strides = [1, 1]} : vector<8x128xf32> to vector<8x32xf32>
    %376 = vector.extract_strided_slice %372 {offsets = [0, 96], sizes = [8, 32], strides = [1, 1]} : vector<8x128xf32> to vector<8x32xf32>
    %377 = arith.mulf %374, %312 : vector<8x32xf32>
    %378 = arith.mulf %373, %375 : vector<8x32xf32>
    %379 = arith.addf %377, %378 : vector<8x32xf32>
    %380 = math.tanh %379 : vector<8x32xf32>
    %381 = arith.mulf %376, %380 : vector<8x32xf32>
    %382 = arith.mulf %360, %8 : vector<8x128xf32>
    %383 = math.tanh %382 : vector<8x128xf32>
    %384 = arith.mulf %383, %8 : vector<8x128xf32>
    %385 = arith.addf %384, %11 : vector<8x128xf32>
    %386 = vector.extract_strided_slice %385 {offsets = [0, 0], sizes = [8, 32], strides = [1, 1]} : vector<8x128xf32> to vector<8x32xf32>
    %387 = vector.extract_strided_slice %385 {offsets = [0, 32], sizes = [8, 32], strides = [1, 1]} : vector<8x128xf32> to vector<8x32xf32>
    %388 = vector.extract_strided_slice %385 {offsets = [0, 64], sizes = [8, 32], strides = [1, 1]} : vector<8x128xf32> to vector<8x32xf32>
    %389 = vector.extract_strided_slice %385 {offsets = [0, 96], sizes = [8, 32], strides = [1, 1]} : vector<8x128xf32> to vector<8x32xf32>
    %390 = arith.mulf %387, %325 : vector<8x32xf32>
    %391 = arith.mulf %386, %388 : vector<8x32xf32>
    %392 = arith.addf %390, %391 : vector<8x32xf32>
    %393 = math.tanh %392 : vector<8x32xf32>
    %394 = arith.mulf %389, %393 : vector<8x32xf32>
    %395 = arith.mulf %364, %8 : vector<8x128xf32>
    %396 = math.tanh %395 : vector<8x128xf32>
    %397 = arith.mulf %396, %8 : vector<8x128xf32>
    %398 = arith.addf %397, %11 : vector<8x128xf32>
    %399 = vector.extract_strided_slice %398 {offsets = [0, 0], sizes = [8, 32], strides = [1, 1]} : vector<8x128xf32> to vector<8x32xf32>
    %400 = vector.extract_strided_slice %398 {offsets = [0, 32], sizes = [8, 32], strides = [1, 1]} : vector<8x128xf32> to vector<8x32xf32>
    %401 = vector.extract_strided_slice %398 {offsets = [0, 64], sizes = [8, 32], strides = [1, 1]} : vector<8x128xf32> to vector<8x32xf32>
    %402 = vector.extract_strided_slice %398 {offsets = [0, 96], sizes = [8, 32], strides = [1, 1]} : vector<8x128xf32> to vector<8x32xf32>
    %403 = arith.mulf %400, %338 : vector<8x32xf32>
    %404 = arith.mulf %399, %401 : vector<8x32xf32>
    %405 = arith.addf %403, %404 : vector<8x32xf32>
    %406 = math.tanh %405 : vector<8x32xf32>
    %407 = arith.mulf %402, %406 : vector<8x32xf32>
    %408 = arith.mulf %368, %8 : vector<8x128xf32>
    %409 = math.tanh %408 : vector<8x128xf32>
    %410 = arith.mulf %409, %8 : vector<8x128xf32>
    %411 = arith.addf %410, %11 : vector<8x128xf32>
    %412 = vector.extract_strided_slice %411 {offsets = [0, 0], sizes = [8, 32], strides = [1, 1]} : vector<8x128xf32> to vector<8x32xf32>
    %413 = vector.extract_strided_slice %411 {offsets = [0, 32], sizes = [8, 32], strides = [1, 1]} : vector<8x128xf32> to vector<8x32xf32>
    %414 = vector.extract_strided_slice %411 {offsets = [0, 64], sizes = [8, 32], strides = [1, 1]} : vector<8x128xf32> to vector<8x32xf32>
    %415 = vector.extract_strided_slice %411 {offsets = [0, 96], sizes = [8, 32], strides = [1, 1]} : vector<8x128xf32> to vector<8x32xf32>
    %416 = arith.mulf %413, %351 : vector<8x32xf32>
    %417 = arith.mulf %412, %414 : vector<8x32xf32>
    %418 = arith.addf %416, %417 : vector<8x32xf32>
    %419 = math.tanh %418 : vector<8x32xf32>
    %420 = arith.mulf %415, %419 : vector<8x32xf32>
    %421 = vector.extract_strided_slice %45 {offsets = [56, 0], sizes = [8, 128], strides = [1, 1]} : vector<64x128xf32> to vector<8x128xf32>
    %cst_83 = arith.constant dense<0.000000e+00> : vector<8x128xf32>
    %422 = tpu.matmul %381, %21, %cst_83 {dimension_numbers = #tpu.dot_dimension_numbers<[1], [0], [0], [1], [0, 0, 1, 1], [], []>} : vector<8x32xf32>, vector<32x128xf32>, vector<8x128xf32> -> vector<8x128xf32>
    %423 = arith.addf %421, %422 : vector<8x128xf32>
    %cst_84 = arith.constant dense<0.000000e+00> : vector<8x128xf32>
    %424 = tpu.matmul %381, %15, %cst_84 {dimension_numbers = #tpu.dot_dimension_numbers<[1], [0], [0], [1], [0, 0, 1, 1], [], []>} : vector<8x32xf32>, vector<32x128xf32>, vector<8x128xf32> -> vector<8x128xf32>
    %425 = arith.addf %424, %31 : vector<8x128xf32>
    %cst_85 = arith.constant dense<0.000000e+00> : vector<8x128xf32>
    %426 = tpu.matmul %394, %23, %cst_85 {dimension_numbers = #tpu.dot_dimension_numbers<[1], [0], [0], [1], [0, 0, 1, 1], [], []>} : vector<8x32xf32>, vector<32x128xf32>, vector<8x128xf32> -> vector<8x128xf32>
    %427 = arith.addf %425, %426 : vector<8x128xf32>
    %cst_86 = arith.constant dense<0.000000e+00> : vector<8x128xf32>
    %428 = tpu.matmul %394, %17, %cst_86 {dimension_numbers = #tpu.dot_dimension_numbers<[1], [0], [0], [1], [0, 0, 1, 1], [], []>} : vector<8x32xf32>, vector<32x128xf32>, vector<8x128xf32> -> vector<8x128xf32>
    %429 = arith.addf %428, %35 : vector<8x128xf32>
    %cst_87 = arith.constant dense<0.000000e+00> : vector<8x128xf32>
    %430 = tpu.matmul %407, %25, %cst_87 {dimension_numbers = #tpu.dot_dimension_numbers<[1], [0], [0], [1], [0, 0, 1, 1], [], []>} : vector<8x32xf32>, vector<32x128xf32>, vector<8x128xf32> -> vector<8x128xf32>
    %431 = arith.addf %429, %430 : vector<8x128xf32>
    %cst_88 = arith.constant dense<0.000000e+00> : vector<8x128xf32>
    %432 = tpu.matmul %407, %19, %cst_88 {dimension_numbers = #tpu.dot_dimension_numbers<[1], [0], [0], [1], [0, 0, 1, 1], [], []>} : vector<8x32xf32>, vector<32x128xf32>, vector<8x128xf32> -> vector<8x128xf32>
    %433 = arith.addf %432, %39 : vector<8x128xf32>
    %cst_89 = arith.constant dense<0.000000e+00> : vector<8x128xf32>
    %434 = tpu.matmul %420, %27, %cst_89 {dimension_numbers = #tpu.dot_dimension_numbers<[1], [0], [0], [1], [0, 0, 1, 1], [], []>} : vector<8x32xf32>, vector<32x128xf32>, vector<8x128xf32> -> vector<8x128xf32>
    %435 = arith.addf %433, %434 : vector<8x128xf32>
    %436 = arith.mulf %423, %8 : vector<8x128xf32>
    %437 = math.tanh %436 : vector<8x128xf32>
    %438 = arith.mulf %437, %8 : vector<8x128xf32>
    %439 = arith.addf %438, %11 : vector<8x128xf32>
    %440 = vector.extract_strided_slice %439 {offsets = [0, 0], sizes = [8, 32], strides = [1, 1]} : vector<8x128xf32> to vector<8x32xf32>
    %441 = vector.extract_strided_slice %439 {offsets = [0, 32], sizes = [8, 32], strides = [1, 1]} : vector<8x128xf32> to vector<8x32xf32>
    %442 = vector.extract_strided_slice %439 {offsets = [0, 64], sizes = [8, 32], strides = [1, 1]} : vector<8x128xf32> to vector<8x32xf32>
    %443 = vector.extract_strided_slice %439 {offsets = [0, 96], sizes = [8, 32], strides = [1, 1]} : vector<8x128xf32> to vector<8x32xf32>
    %444 = arith.mulf %441, %379 : vector<8x32xf32>
    %445 = arith.mulf %440, %442 : vector<8x32xf32>
    %446 = arith.addf %444, %445 : vector<8x32xf32>
    %447 = math.tanh %446 : vector<8x32xf32>
    %448 = arith.mulf %443, %447 : vector<8x32xf32>
    %449 = arith.mulf %427, %8 : vector<8x128xf32>
    %450 = math.tanh %449 : vector<8x128xf32>
    %451 = arith.mulf %450, %8 : vector<8x128xf32>
    %452 = arith.addf %451, %11 : vector<8x128xf32>
    %453 = vector.extract_strided_slice %452 {offsets = [0, 0], sizes = [8, 32], strides = [1, 1]} : vector<8x128xf32> to vector<8x32xf32>
    %454 = vector.extract_strided_slice %452 {offsets = [0, 32], sizes = [8, 32], strides = [1, 1]} : vector<8x128xf32> to vector<8x32xf32>
    %455 = vector.extract_strided_slice %452 {offsets = [0, 64], sizes = [8, 32], strides = [1, 1]} : vector<8x128xf32> to vector<8x32xf32>
    %456 = vector.extract_strided_slice %452 {offsets = [0, 96], sizes = [8, 32], strides = [1, 1]} : vector<8x128xf32> to vector<8x32xf32>
    %457 = arith.mulf %454, %392 : vector<8x32xf32>
    %458 = arith.mulf %453, %455 : vector<8x32xf32>
    %459 = arith.addf %457, %458 : vector<8x32xf32>
    %460 = math.tanh %459 : vector<8x32xf32>
    %461 = arith.mulf %456, %460 : vector<8x32xf32>
    %462 = arith.mulf %431, %8 : vector<8x128xf32>
    %463 = math.tanh %462 : vector<8x128xf32>
    %464 = arith.mulf %463, %8 : vector<8x128xf32>
    %465 = arith.addf %464, %11 : vector<8x128xf32>
    %466 = vector.extract_strided_slice %465 {offsets = [0, 0], sizes = [8, 32], strides = [1, 1]} : vector<8x128xf32> to vector<8x32xf32>
    %467 = vector.extract_strided_slice %465 {offsets = [0, 32], sizes = [8, 32], strides = [1, 1]} : vector<8x128xf32> to vector<8x32xf32>
    %468 = vector.extract_strided_slice %465 {offsets = [0, 64], sizes = [8, 32], strides = [1, 1]} : vector<8x128xf32> to vector<8x32xf32>
    %469 = vector.extract_strided_slice %465 {offsets = [0, 96], sizes = [8, 32], strides = [1, 1]} : vector<8x128xf32> to vector<8x32xf32>
    %470 = arith.mulf %467, %405 : vector<8x32xf32>
    %471 = arith.mulf %466, %468 : vector<8x32xf32>
    %472 = arith.addf %470, %471 : vector<8x32xf32>
    %473 = math.tanh %472 : vector<8x32xf32>
    %474 = arith.mulf %469, %473 : vector<8x32xf32>
    %475 = arith.mulf %435, %8 : vector<8x128xf32>
    %476 = math.tanh %475 : vector<8x128xf32>
    %477 = arith.mulf %476, %8 : vector<8x128xf32>
    %478 = arith.addf %477, %11 : vector<8x128xf32>
    %479 = vector.extract_strided_slice %478 {offsets = [0, 0], sizes = [8, 32], strides = [1, 1]} : vector<8x128xf32> to vector<8x32xf32>
    %480 = vector.extract_strided_slice %478 {offsets = [0, 32], sizes = [8, 32], strides = [1, 1]} : vector<8x128xf32> to vector<8x32xf32>
    %481 = vector.extract_strided_slice %478 {offsets = [0, 64], sizes = [8, 32], strides = [1, 1]} : vector<8x128xf32> to vector<8x32xf32>
    %482 = vector.extract_strided_slice %478 {offsets = [0, 96], sizes = [8, 32], strides = [1, 1]} : vector<8x128xf32> to vector<8x32xf32>
    %483 = arith.mulf %480, %418 : vector<8x32xf32>
    %484 = arith.mulf %479, %481 : vector<8x32xf32>
    %485 = arith.addf %483, %484 : vector<8x32xf32>
    %486 = math.tanh %485 : vector<8x32xf32>
    %487 = arith.mulf %482, %486 : vector<8x32xf32>
    %cst_90 = arith.constant dense<0.000000e+00> : vector<8x128xf32>
    %488 = tpu.matmul %448, %15, %cst_90 {dimension_numbers = #tpu.dot_dimension_numbers<[1], [0], [0], [1], [0, 0, 1, 1], [], []>} : vector<8x32xf32>, vector<32x128xf32>, vector<8x128xf32> -> vector<8x128xf32>
    %489 = arith.addf %488, %31 : vector<8x128xf32>
    %cst_91 = arith.constant dense<0.000000e+00> : vector<8x128xf32>
    %490 = tpu.matmul %461, %23, %cst_91 {dimension_numbers = #tpu.dot_dimension_numbers<[1], [0], [0], [1], [0, 0, 1, 1], [], []>} : vector<8x32xf32>, vector<32x128xf32>, vector<8x128xf32> -> vector<8x128xf32>
    %491 = arith.addf %489, %490 : vector<8x128xf32>
    %cst_92 = arith.constant dense<0.000000e+00> : vector<8x128xf32>
    %492 = tpu.matmul %461, %17, %cst_92 {dimension_numbers = #tpu.dot_dimension_numbers<[1], [0], [0], [1], [0, 0, 1, 1], [], []>} : vector<8x32xf32>, vector<32x128xf32>, vector<8x128xf32> -> vector<8x128xf32>
    %493 = arith.addf %492, %35 : vector<8x128xf32>
    %cst_93 = arith.constant dense<0.000000e+00> : vector<8x128xf32>
    %494 = tpu.matmul %474, %25, %cst_93 {dimension_numbers = #tpu.dot_dimension_numbers<[1], [0], [0], [1], [0, 0, 1, 1], [], []>} : vector<8x32xf32>, vector<32x128xf32>, vector<8x128xf32> -> vector<8x128xf32>
    %495 = arith.addf %493, %494 : vector<8x128xf32>
    %cst_94 = arith.constant dense<0.000000e+00> : vector<8x128xf32>
    %496 = tpu.matmul %474, %19, %cst_94 {dimension_numbers = #tpu.dot_dimension_numbers<[1], [0], [0], [1], [0, 0, 1, 1], [], []>} : vector<8x32xf32>, vector<32x128xf32>, vector<8x128xf32> -> vector<8x128xf32>
    %497 = arith.addf %496, %39 : vector<8x128xf32>
    %cst_95 = arith.constant dense<0.000000e+00> : vector<8x128xf32>
    %498 = tpu.matmul %487, %27, %cst_95 {dimension_numbers = #tpu.dot_dimension_numbers<[1], [0], [0], [1], [0, 0, 1, 1], [], []>} : vector<8x32xf32>, vector<32x128xf32>, vector<8x128xf32> -> vector<8x128xf32>
    %499 = arith.addf %497, %498 : vector<8x128xf32>
    %500 = arith.mulf %491, %8 : vector<8x128xf32>
    %501 = math.tanh %500 : vector<8x128xf32>
    %502 = arith.mulf %501, %8 : vector<8x128xf32>
    %503 = arith.addf %502, %11 : vector<8x128xf32>
    %504 = vector.extract_strided_slice %503 {offsets = [0, 0], sizes = [8, 32], strides = [1, 1]} : vector<8x128xf32> to vector<8x32xf32>
    %505 = vector.extract_strided_slice %503 {offsets = [0, 32], sizes = [8, 32], strides = [1, 1]} : vector<8x128xf32> to vector<8x32xf32>
    %506 = vector.extract_strided_slice %503 {offsets = [0, 64], sizes = [8, 32], strides = [1, 1]} : vector<8x128xf32> to vector<8x32xf32>
    %507 = vector.extract_strided_slice %503 {offsets = [0, 96], sizes = [8, 32], strides = [1, 1]} : vector<8x128xf32> to vector<8x32xf32>
    %508 = arith.mulf %505, %459 : vector<8x32xf32>
    %509 = arith.mulf %504, %506 : vector<8x32xf32>
    %510 = arith.addf %508, %509 : vector<8x32xf32>
    %511 = math.tanh %510 : vector<8x32xf32>
    %512 = arith.mulf %507, %511 : vector<8x32xf32>
    %513 = arith.mulf %495, %8 : vector<8x128xf32>
    %514 = math.tanh %513 : vector<8x128xf32>
    %515 = arith.mulf %514, %8 : vector<8x128xf32>
    %516 = arith.addf %515, %11 : vector<8x128xf32>
    %517 = vector.extract_strided_slice %516 {offsets = [0, 0], sizes = [8, 32], strides = [1, 1]} : vector<8x128xf32> to vector<8x32xf32>
    %518 = vector.extract_strided_slice %516 {offsets = [0, 32], sizes = [8, 32], strides = [1, 1]} : vector<8x128xf32> to vector<8x32xf32>
    %519 = vector.extract_strided_slice %516 {offsets = [0, 64], sizes = [8, 32], strides = [1, 1]} : vector<8x128xf32> to vector<8x32xf32>
    %520 = vector.extract_strided_slice %516 {offsets = [0, 96], sizes = [8, 32], strides = [1, 1]} : vector<8x128xf32> to vector<8x32xf32>
    %521 = arith.mulf %518, %472 : vector<8x32xf32>
    %522 = arith.mulf %517, %519 : vector<8x32xf32>
    %523 = arith.addf %521, %522 : vector<8x32xf32>
    %524 = math.tanh %523 : vector<8x32xf32>
    %525 = arith.mulf %520, %524 : vector<8x32xf32>
    %526 = arith.mulf %499, %8 : vector<8x128xf32>
    %527 = math.tanh %526 : vector<8x128xf32>
    %528 = arith.mulf %527, %8 : vector<8x128xf32>
    %529 = arith.addf %528, %11 : vector<8x128xf32>
    %530 = vector.extract_strided_slice %529 {offsets = [0, 0], sizes = [8, 32], strides = [1, 1]} : vector<8x128xf32> to vector<8x32xf32>
    %531 = vector.extract_strided_slice %529 {offsets = [0, 32], sizes = [8, 32], strides = [1, 1]} : vector<8x128xf32> to vector<8x32xf32>
    %532 = vector.extract_strided_slice %529 {offsets = [0, 64], sizes = [8, 32], strides = [1, 1]} : vector<8x128xf32> to vector<8x32xf32>
    %533 = vector.extract_strided_slice %529 {offsets = [0, 96], sizes = [8, 32], strides = [1, 1]} : vector<8x128xf32> to vector<8x32xf32>
    %534 = arith.mulf %531, %485 : vector<8x32xf32>
    %535 = arith.mulf %530, %532 : vector<8x32xf32>
    %536 = arith.addf %534, %535 : vector<8x32xf32>
    %537 = math.tanh %536 : vector<8x32xf32>
    %538 = arith.mulf %533, %537 : vector<8x32xf32>
    %cst_96 = arith.constant dense<0.000000e+00> : vector<8x128xf32>
    %539 = tpu.matmul %512, %17, %cst_96 {dimension_numbers = #tpu.dot_dimension_numbers<[1], [0], [0], [1], [0, 0, 1, 1], [], []>} : vector<8x32xf32>, vector<32x128xf32>, vector<8x128xf32> -> vector<8x128xf32>
    %540 = arith.addf %539, %35 : vector<8x128xf32>
    %cst_97 = arith.constant dense<0.000000e+00> : vector<8x128xf32>
    %541 = tpu.matmul %525, %25, %cst_97 {dimension_numbers = #tpu.dot_dimension_numbers<[1], [0], [0], [1], [0, 0, 1, 1], [], []>} : vector<8x32xf32>, vector<32x128xf32>, vector<8x128xf32> -> vector<8x128xf32>
    %542 = arith.addf %540, %541 : vector<8x128xf32>
    %cst_98 = arith.constant dense<0.000000e+00> : vector<8x128xf32>
    %543 = tpu.matmul %525, %19, %cst_98 {dimension_numbers = #tpu.dot_dimension_numbers<[1], [0], [0], [1], [0, 0, 1, 1], [], []>} : vector<8x32xf32>, vector<32x128xf32>, vector<8x128xf32> -> vector<8x128xf32>
    %544 = arith.addf %543, %39 : vector<8x128xf32>
    %cst_99 = arith.constant dense<0.000000e+00> : vector<8x128xf32>
    %545 = tpu.matmul %538, %27, %cst_99 {dimension_numbers = #tpu.dot_dimension_numbers<[1], [0], [0], [1], [0, 0, 1, 1], [], []>} : vector<8x32xf32>, vector<32x128xf32>, vector<8x128xf32> -> vector<8x128xf32>
    %546 = arith.addf %544, %545 : vector<8x128xf32>
    %547 = arith.mulf %542, %8 : vector<8x128xf32>
    %548 = math.tanh %547 : vector<8x128xf32>
    %549 = arith.mulf %548, %8 : vector<8x128xf32>
    %550 = arith.addf %549, %11 : vector<8x128xf32>
    %551 = vector.extract_strided_slice %550 {offsets = [0, 0], sizes = [8, 32], strides = [1, 1]} : vector<8x128xf32> to vector<8x32xf32>
    %552 = vector.extract_strided_slice %550 {offsets = [0, 32], sizes = [8, 32], strides = [1, 1]} : vector<8x128xf32> to vector<8x32xf32>
    %553 = vector.extract_strided_slice %550 {offsets = [0, 64], sizes = [8, 32], strides = [1, 1]} : vector<8x128xf32> to vector<8x32xf32>
    %554 = vector.extract_strided_slice %550 {offsets = [0, 96], sizes = [8, 32], strides = [1, 1]} : vector<8x128xf32> to vector<8x32xf32>
    %555 = arith.mulf %552, %523 : vector<8x32xf32>
    %556 = arith.mulf %551, %553 : vector<8x32xf32>
    %557 = arith.addf %555, %556 : vector<8x32xf32>
    %558 = math.tanh %557 : vector<8x32xf32>
    %559 = arith.mulf %554, %558 : vector<8x32xf32>
    %560 = arith.mulf %546, %8 : vector<8x128xf32>
    %561 = math.tanh %560 : vector<8x128xf32>
    %562 = arith.mulf %561, %8 : vector<8x128xf32>
    %563 = arith.addf %562, %11 : vector<8x128xf32>
    %564 = vector.extract_strided_slice %563 {offsets = [0, 0], sizes = [8, 32], strides = [1, 1]} : vector<8x128xf32> to vector<8x32xf32>
    %565 = vector.extract_strided_slice %563 {offsets = [0, 32], sizes = [8, 32], strides = [1, 1]} : vector<8x128xf32> to vector<8x32xf32>
    %566 = vector.extract_strided_slice %563 {offsets = [0, 64], sizes = [8, 32], strides = [1, 1]} : vector<8x128xf32> to vector<8x32xf32>
    %567 = vector.extract_strided_slice %563 {offsets = [0, 96], sizes = [8, 32], strides = [1, 1]} : vector<8x128xf32> to vector<8x32xf32>
    %568 = arith.mulf %565, %536 : vector<8x32xf32>
    %569 = arith.mulf %564, %566 : vector<8x32xf32>
    %570 = arith.addf %568, %569 : vector<8x32xf32>
    %571 = math.tanh %570 : vector<8x32xf32>
    %572 = arith.mulf %567, %571 : vector<8x32xf32>
    %cst_100 = arith.constant dense<0.000000e+00> : vector<8x128xf32>
    %573 = tpu.matmul %559, %19, %cst_100 {dimension_numbers = #tpu.dot_dimension_numbers<[1], [0], [0], [1], [0, 0, 1, 1], [], []>} : vector<8x32xf32>, vector<32x128xf32>, vector<8x128xf32> -> vector<8x128xf32>
    %574 = arith.addf %573, %39 : vector<8x128xf32>
    %cst_101 = arith.constant dense<0.000000e+00> : vector<8x128xf32>
    %575 = tpu.matmul %572, %27, %cst_101 {dimension_numbers = #tpu.dot_dimension_numbers<[1], [0], [0], [1], [0, 0, 1, 1], [], []>} : vector<8x32xf32>, vector<32x128xf32>, vector<8x128xf32> -> vector<8x128xf32>
    %576 = arith.addf %574, %575 : vector<8x128xf32>
    %577 = arith.mulf %576, %8 : vector<8x128xf32>
    %578 = math.tanh %577 : vector<8x128xf32>
    %579 = arith.mulf %578, %8 : vector<8x128xf32>
    %580 = arith.addf %579, %11 : vector<8x128xf32>
    %581 = vector.extract_strided_slice %580 {offsets = [0, 0], sizes = [8, 32], strides = [1, 1]} : vector<8x128xf32> to vector<8x32xf32>
    %582 = vector.extract_strided_slice %580 {offsets = [0, 32], sizes = [8, 32], strides = [1, 1]} : vector<8x128xf32> to vector<8x32xf32>
    %583 = vector.extract_strided_slice %580 {offsets = [0, 64], sizes = [8, 32], strides = [1, 1]} : vector<8x128xf32> to vector<8x32xf32>
    %584 = vector.extract_strided_slice %580 {offsets = [0, 96], sizes = [8, 32], strides = [1, 1]} : vector<8x128xf32> to vector<8x32xf32>
    %585 = arith.mulf %582, %570 : vector<8x32xf32>
    %586 = arith.mulf %581, %583 : vector<8x32xf32>
    %587 = arith.addf %585, %586 : vector<8x32xf32>
    %588 = math.tanh %587 : vector<8x32xf32>
    %589 = arith.mulf %584, %588 : vector<8x32xf32>
    %590 = tpu.concatenate %219, %286, %353, %420, %487, %538, %572, %589 in 0 : vector<8x32xf32>, vector<8x32xf32>, vector<8x32xf32>, vector<8x32xf32>, vector<8x32xf32>, vector<8x32xf32>, vector<8x32xf32>, vector<8x32xf32> -> vector<64x32xf32>
    %c0_102 = arith.constant 0 : index
    %c0_103 = arith.constant 0 : index
    %591 = vector.load %arg5[%c0_102, %c0_103] : memref<32x128xf32, #tpu.memory_space<vmem>>, vector<32x128xf32>
    %cst_104 = arith.constant dense<0.000000e+00> : vector<64x128xf32>
    %592 = tpu.matmul %590, %591, %cst_104 {dimension_numbers = #tpu.dot_dimension_numbers<[1], [0], [0], [1], [0, 0, 1, 1], [], []>} : vector<64x32xf32>, vector<32x128xf32>, vector<64x128xf32> -> vector<64x128xf32>
    %c0_105 = arith.constant 0 : index
    %c0_106 = arith.constant 0 : index
    %593 = vector.load %arg6[%c0_105, %c0_106] : memref<1x128xf32, #tpu.memory_space<vmem>>, vector<1x128xf32>
    %594 = vector.broadcast %593 : vector<1x128xf32> to vector<64x128xf32>
    %595 = arith.addf %592, %594 : vector<64x128xf32>
    %596 = tpu.iota {dimensions = array<i32: 1>} : vector<64x128xi32>
    %c4_i32 = arith.constant 4 : i32
    %597 = vector.broadcast %c4_i32 : i32 to vector<64x128xi32>
    %598 = arith.cmpi slt, %596, %597 : vector<64x128xi32>
    %cst_107 = arith.constant -1.000000e+30 : f32
    %599 = vector.broadcast %cst_107 : f32 to vector<64x128xf32>
    %600 = arith.select %598, %595, %599 : vector<64x128xi1>, vector<64x128xf32>
    %cst_108 = arith.constant dense<0xFF800000> : vector<64xf32>
    %601 = vector.multi_reduction <maximumf>, %600, %cst_108 [1] : vector<64x128xf32> to vector<64xf32>
    %602 = vector.shape_cast %601 : vector<64xf32> to vector<64x1xf32>
    %603 = vector.broadcast %602 : vector<64x1xf32> to vector<64x128xf32>
    %604 = arith.subf %600, %603 : vector<64x128xf32>
    %605 = math.exp %604 : vector<64x128xf32>
    %cst_109 = arith.constant 0.000000e+00 : f32
    %606 = vector.broadcast %cst_109 : f32 to vector<64x128xf32>
    %607 = arith.select %598, %605, %606 : vector<64x128xi1>, vector<64x128xf32>
    %cst_110 = arith.constant dense<0.000000e+00> : vector<64xf32>
    %608 = vector.multi_reduction <add>, %607, %cst_110 [1] : vector<64x128xf32> to vector<64xf32>
    %609 = vector.shape_cast %608 : vector<64xf32> to vector<64x1xf32>
    %610 = math.log %609 : vector<64x1xf32>
    %611 = vector.broadcast %610 : vector<64x1xf32> to vector<64x128xf32>
    %612 = arith.subf %604, %611 : vector<64x128xf32>
    %c0_111 = arith.constant 0 : index
    %c0_112 = arith.constant 0 : index
    %613 = vector.load %arg7[%c0_111, %c0_112] : memref<64x128xf32, #tpu.memory_space<vmem>>, vector<64x128xf32>
    tpu.vector_store %arg7[%c0_111, %c0_112], %612 {strides = array<i32>} : memref<64x128xf32, #tpu.memory_space<vmem>>, vector<64x128xf32>,
    return
  }
  func.func @transform_0(%arg0: i32) -> (i32, i32) {
    %c0_i32 = arith.constant 0 : i32
    %c0_i32_0 = arith.constant 0 : i32
    %c0_i32_1 = arith.constant 0 : i32
    return %c0_i32, %c0_i32_0 : i32, i32
  }
  func.func @transform_1(%arg0: i32) -> (i32, i32, i32) {
    %c0_i32 = arith.constant 0 : i32
    %c0_i32_0 = arith.constant 0 : i32
    %c0_i32_1 = arith.constant 0 : i32
    %c0_i32_2 = arith.constant 0 : i32
    return %c0_i32, %c0_i32_0, %c0_i32_1 : i32, i32, i32
  }
  func.func @transform_2(%arg0: i32) -> (i32, i32, i32) {
    %c0_i32 = arith.constant 0 : i32
    %c0_i32_0 = arith.constant 0 : i32
    %c0_i32_1 = arith.constant 0 : i32
    %c0_i32_2 = arith.constant 0 : i32
    return %c0_i32, %c0_i32_0, %c0_i32_1 : i32, i32, i32
  }
  func.func @transform_3(%arg0: i32) -> (i32, i32, i32) {
    %c0_i32 = arith.constant 0 : i32
    %c0_i32_0 = arith.constant 0 : i32
    %c0_i32_1 = arith.constant 0 : i32
    %c0_i32_2 = arith.constant 0 : i32
    return %c0_i32, %c0_i32_0, %c0_i32_1 : i32, i32, i32
  }
  func.func @transform_4(%arg0: i32) -> (i32, i32) {
    %c0_i32 = arith.constant 0 : i32
    %c0_i32_0 = arith.constant 0 : i32
    %c0_i32_1 = arith.constant 0 : i32
    return %c0_i32, %c0_i32_0 : i32, i32
  }
  func.func @transform_5(%arg0: i32) -> (i32, i32) {
    %c0_i32 = arith.constant 0 : i32
    %c0_i32_0 = arith.constant 0 : i32
    %c0_i32_1 = arith.constant 0 : i32
    return %c0_i32, %c0_i32_0 : i32, i32
  }
  func.func @transform_6(%arg0: i32) -> (i32, i32) {
    %c0_i32 = arith.constant 0 : i32
    %c0_i32_0 = arith.constant 0 : i32
    %c0_i32_1 = arith.constant 0 : i32
    return %c0_i32, %c0_i32_0 : i32, i32
  }
}

</mosaic_0001>

<bundles_post_ra>
// kernel: tpu_custom_call.1
= control target key start
LH: loop header
LB: loop body
LE: loop exit
PB: predicated region body
PF: predicated region fallthrough
CT: control target
= control target key end

     0   :  { %11 = vsyncpa [#allocation3], 0  ;;  %s3692_s0 = inlined_call_operand.vmem [shape: f32[64,32], index: 0, kind: input, shape index: {}]   ;;  %s3693_s1 = inlined_call_operand.hbm [shape: f32[4,32,128], index: 1, kind: input, shape index: {}]   ;;  %s3694_s2 = inlined_call_operand.hbm [shape: f32[4,32,128], index: 2, kind: input, shape index: {}]   ;;  %s3695_s3 = inlined_call_operand.vmem [shape: f32[4,1,128], index: 3, kind: input, shape index: {}]   ;;  %s3696_s4 = inlined_call_operand.vmem [shape: f32[32,128], index: 4, kind: input, shape index: {}]   ;;  %s3697_s5 = inlined_call_operand.vmem [shape: f32[1,128], index: 5, kind: input, shape index: {}]   ;;  %s3698_s6 = inlined_call_operand.hbm [shape: f32[64,128], index: 6, kind: output, shape index: {}]  }
   0x1   :  { %12 = vsyncpa [#allocation6], 0 }
   0x2   :  { %13 = vsyncpa [#allocation4], 0  ;;  %s20_s23 = sshll.u32 %s3693_s1, 4  ;;  %s2722_s24 = smov [#allocation2]   ;;  %s21_s23 = int_to_ptr.hbm [resolvable:$true] %s20_s23 }
   0x3   :  { %s22_s25 = sshll.u32 %s2722_s24, 4  ;;  %s33_s28 = sshll.u32 %s3694_s2, 4  ;;  %s23_s25 = int_to_ptr.vmem [resolvable:$true] %s22_s25  ;;  %s34_s28 = int_to_ptr.hbm [resolvable:$true] %s33_s28 }
   0x4   :  { %s2723_s29 = smov 128   ;;  %s2724_s30 = smov 8  }
   0x5   :  { %28 = dma.hbm_to_vmem [thread:$0]  %s21_s23, 2048, %s23_s25, [#allocation3], %s2723_s29, %s2723_s29, %s2724_s30  }
   0x6   :  { %s2725_s7 = smov [#allocation5]  }
   0x7   :  { %s35_s8 = sshll.u32 %s2725_s7, 4  ;;  %s36_s8 = int_to_ptr.vmem [resolvable:$true] %s35_s8 }
   0x8   :  { %41 = dma.hbm_to_vmem [thread:$0]  %s34_s28, 2048, %s36_s8, [#allocation6], %s2723_s29, %s2723_s29, %s2724_s30  }
   0x9   :  { %2716 = dma.done.wait [#allocation3], 2048  }
   0xa   :  { %2717 = vsyncadd [#allocation3], 4294965248 }
   0xb   :  { %2718 = dma.done.wait [#allocation6], 2048  }
   0xc   :  { %2719 = vsyncadd [#allocation6], 4294965248  ;;  %v66_v0 = vld [vmem:[#allocation2 + $0x18] sm:$0xff]  ;;  %v65_v1 = vld [vmem:[#allocation2 + $0x10] sm:$0xff]  ;;  %vm128_vm0 = vcmask 261120   ;;  %v2726_v11 = vmov 0.0   ;;  %v56_v13 = vlaneseq }
   0xd   :  { %2426 = vmatpush.msra.mxu1 %v66_v0  ;;  %165 = vmatpush.msra.mxu0 %v66_v0  ;;  %v64_v2 = vld [vmem:[#allocation2 + $0x8] sm:$0xff]  ;;  %v63_v3 = vld [vmem:[#allocation2] sm:$0xff]  ;;  %v118_v4 = vld [vmem:[%s3692_s0 + $0x10] sm:$0xff]  ;;  %v2727_v19 = vmov 0.5   ;;  %s2728_s15 = smov 64   ;;  %s2729_s16 = smov 32  }
   0xe   :  { %2427 = vmatpush.msra.mxu2 %v66_v0  ;;  %2428 = vmatpush.msra.mxu3 %v66_v0  ;;  %v116_v5 = vld [vmem:[%s3692_s0] sm:$0xff]  ;;  %v2784_v6 = vld [vmem:[#allocation5 + $0x18] sm:$0xff]  ;;  %v2787_v7 = vld [vmem:[#allocation5 + $0x10] sm:$0xff]  ;;  %v2809_v14 = vand.u32 127, %v56_v13 }
   0xf   :  { %2429 = vmatpush.msra.mxu1 %v65_v1  ;;  %166 = vmatpush.msra.mxu0 %v65_v1  ;;  %v2791_v8 = vld [vmem:[#allocation5 + $0x8] sm:$0xff]  ;;  %v2795_v9 = vld [vmem:[#allocation5] sm:$0xff]  ;;  %v119_v10 = vld [vmem:[%s3692_s0 + $0x18] sm:$0xff] }
  0x10   :  { %2430 = vmatpush.msra.mxu2 %v65_v1  ;;  %2431 = vmatpush.msra.mxu3 %v65_v1  ;;  %vm58_vm1 = vcmp.ge.s32.totalorder %v2809_v14, 64  ;;  %vm59_vm2 = vcmp.lt.s32.totalorder %v2809_v14, 96  ;;  %v2818_v17 = vld [vmem:[%s3695_s3] ss:$0 sm:$0xff]  ;;  %v122_v35 = vld [vmem:[%s3692_s0 + $0x30] sm:$0xff]  ;;  %v2840_v36 = vld [vmem:[#allocation2 + $0x38] sm:$0xff] }
  0x11   :  { %2432 = vmatpush.msra.mxu1 %v64_v2  ;;  %167 = vmatpush.msra.mxu0 %v64_v2  ;;  %vm60_vm3 = vmand %vm58_vm1, %vm59_vm2  ;;  %v120_v34 = vld [vmem:[%s3692_s0 + $0x20] sm:$0xff]  ;;  %v2844_v37 = vld [vmem:[#allocation2 + $0x30] sm:$0xff]  ;;  %vm2230_vm4 = vcmp.lt.s32.totalorder %v2809_v14, 4 }
  0x12   :  { %2433 = vmatpush.msra.mxu2 %v64_v2  ;;  %2434 = vmatpush.msra.mxu3 %v64_v2  ;;  %v2821_v20 = vsel %vm60_vm3, 1.0, %v2727_v19  ;;  %v2824_v25 = vsel %vm60_vm3, 0.0, %v2727_v19  ;;  %v2848_v38 = vld [vmem:[#allocation2 + $0x28] sm:$0xff]  ;;  %v2853_v39 = vld [vmem:[#allocation2 + $0x20] sm:$0xff]  ;;  %v123_v41 = vld [vmem:[%s3692_s0 + $0x38] sm:$0xff] }
  0x13   :  { %2435 = vmatpush.msra.mxu1 %v63_v3  ;;  %168 = vmatpush.msra.mxu0 %v63_v3  ;;  %v121_v40 = vld [vmem:[%s3692_s0 + $0x28] sm:$0xff]  ;;  %v2875_v44 = vld [vmem:[#allocation5 + $0x38] sm:$0xff]  ;;  %v2877_v45 = vld [vmem:[#allocation5 + $0x30] sm:$0xff] }
  0x14   :  { %2360 = vmatmul.msk.f32.vlgmr.msra.gmra.mxu1 %vm128_vm0, %v118_v4  ;;  %2358 = vmatmul.msk.f32.vlgmr.msra.gmra.mxu0 %vm128_vm0, %v116_v5  ;;  %v117_v46 = vld [vmem:[%s3692_s0 + $0x8] sm:$0xff]  ;;  %v2887_v48 = vld [vmem:[#allocation5 + $0x20] sm:$0xff]  ;;  %s2341_s0 = sshll.u32 %s3698_s6, 4  ;;  %s2342_s0 = int_to_ptr.hbm [resolvable:$true] %s2341_s0 }
  0x15   :  { %209 = vmatpush.msrb.mxu1 %v2784_v6  ;;  %2436 = vmatpush.msra.mxu2 %v63_v3  ;;  %v2884_v47 = vld [vmem:[#allocation5 + $0x28] sm:$0xff]  ;;  %v2914_v56 = vld [vmem:[%s3695_s3 + $0x1] ss:$0 sm:$0xff] }
  0x16   :  { %2437 = vmatpush.msra.mxu3 %v63_v3  ;;  %2362 = vmatmul.msk.f32.vlgmr.msra.gmra.mxu2 %vm128_vm0, %v120_v34  ;;  %v2938_v34 = vld [vmem:[#allocation2 + $0x58] sm:$0xff] }
  0x17   :  { %256 = vmatpush.msrb.mxu2 %v2784_v6  ;;  %210 = vmatpush.msrb.mxu1 %v2787_v7 }
  0x18   :  { %2364 = vmatmul.msk.f32.vlgmr.msra.gmra.mxu3 %vm128_vm0, %v122_v35  ;;  %1053 = vmatpush.msrb.mxu0 %v2840_v36  ;;  %v2940_v35 = vld [vmem:[#allocation2 + $0x50] sm:$0xff] }
  0x19   :  { %257 = vmatpush.msrb.mxu2 %v2787_v7  ;;  %211 = vmatpush.msrb.mxu1 %v2791_v8 }
  0x1a   :  { %277 = vmatpush.msrb.mxu3 %v2840_v36  ;;  %1054 = vmatpush.msrb.mxu0 %v2844_v37 }
  0x1b   :  { %258 = vmatpush.msrb.mxu2 %v2791_v8  ;;  %212 = vmatpush.msrb.mxu1 %v2795_v9 }
  0x1c   :  { %2361 = vmatmul.msk.f32.gmra.mxu1 %vm128_vm0, %v119_v10  ;;  %278 = vmatpush.msrb.mxu3 %v2844_v37 }
  0x1d   :  { %259 = vmatpush.msrb.mxu2 %v2795_v9  ;;  %1055 = vmatpush.msrb.mxu0 %v2848_v38 }
  0x1e   :  { %279 = vmatpush.msrb.mxu3 %v2848_v38  ;;  %2363 = vmatmul.msk.f32.gmra.mxu2 %vm128_vm0, %v121_v40  ;;  %v2942_v40 = vld [vmem:[#allocation5 + $0x58] sm:$0xff] }
  0x1f   :  { %365 = vmatpush.msra.mxu2 %v2784_v6  ;;  %1056 = vmatpush.msrb.mxu0 %v2853_v39 }
  0x20   :  { %280 = vmatpush.msrb.mxu3 %v2853_v39  ;;  %297 = vmatpush.msra.mxu1 %v2875_v44 }
  0x21   :  { %366 = vmatpush.msra.mxu2 %v2787_v7  ;;  %2365 = vmatmul.msk.f32.gmra.mxu3 %vm128_vm0, %v123_v41  ;;  %v2946_v41 = vld [vmem:[#allocation5 + $0x50] sm:$0xff] }
  0x22   :  { %386 = vmatpush.msra.mxu3 %v2840_v36  ;;  %2359 = vmatmul.msk.f32.gmra.mxu0 %vm128_vm0, %v117_v46  ;;  %v2954_v46 = vld [vmem:[#allocation2 + $0x40] sm:$0xff] }
  0x23   :  { %367 = vmatpush.msra.mxu2 %v2791_v8  ;;  %298 = vmatpush.msra.mxu1 %v2877_v45 }
  0x24   :  { %213 = vmatmul.f32.vlgmr.msrb.gmra.mxu1 %v2726_v11  ;;  %387 = vmatpush.msra.mxu3 %v2844_v37 }
  0x25   :  { %368 = vmatpush.msra.mxu2 %v2795_v9  ;;  %299 = vmatpush.msra.mxu1 %v2884_v47 }
  0x26   :  { %388 = vmatpush.msra.mxu3 %v2848_v38 }
  0x27   :  { %300 = vmatpush.msra.mxu1 %v2887_v48 }
  0x28   :  { %389 = vmatpush.msra.mxu3 %v2853_v39 }
  0x29   :  { %411 = vmatpush.msrb.mxu1 %v2875_v44 }
  0x2b   :  { %412 = vmatpush.msrb.mxu1 %v2877_v45 }
  0x2c   :  { %301 = vmatmul.f32.vlgmr.msra.gmra.mxu1 %v2726_v11 }
  0x2d   :  { %413 = vmatpush.msrb.mxu1 %v2884_v47 }
  0x2f   :  { %414 = vmatpush.msrb.mxu1 %v2887_v48 }
  0x31   :  { %541 = vmatpush.msra.mxu1 %v2784_v6 }
  0x33   :  { %542 = vmatpush.msra.mxu1 %v2787_v7 }
  0x35   :  { %543 = vmatpush.msra.mxu1 %v2791_v8 }
  0x37   :  { %544 = vmatpush.msra.mxu1 %v2795_v9 }
  0x91   :  { %v2807_v12 = vpop.f32.mrf.mxu1  ;;  %v170_v16 = vpop.f32.mrf.mxu0 }
  0x92   :  { %v171_v18 = vadd.f32 %v2818_v17, %v170_v16 }
  0x99   :  { %v2811_v15 = vpop.f32.mrf.mxu1  ;;  %v2902_v50 = vpop.f32.mrf.mxu2 }
  0x9b   :  { %v2904_v51 = vpop.f32.mrf.mxu3 }
  0x9f   :  { %v173_v54 = vpop.f32.mrf.mxu0 }
  0xa0   :  { %v174_v55 = vadd.f32 %v2818_v17, %v173_v54 }
  0xa1   :  { %v214_v21 = vpop.f32.mrf.mxu1  ;;  %v2906_v52 = vpop.f32.mrf.mxu2 }
  0xa2   :  { %v217_v22 = vadd.f32 %v214_v21, %v171_v18 }
  0xa4   :  { %v218_v23 = vmul.f32 %v217_v22, %v2821_v20  ;;  %v2908_v53 = vpop.f32.mrf.mxu3 }
  0xa6   :  { %2452 = vtanh.f32 %v218_v23 }
  0xa9   :  { %v302_v57 = vpop.f32.mrf.mxu1 }
  0xac   :  { %v2453_v24 = vpop.eup %2452 }
  0xad   :  { %v220_v26 = vmul.f32 %v2453_v24, %v2821_v20 }
  0xaf   :  { %v221_v27 = vadd.f32 %v220_v26, %v2824_v25 }
  0xb1   :  { %224 = vrot.lane.b32.xlu0 %v221_v27, %s2728_s15  ;;  %v222_v30 = vmul.f32 0.0, %v221_v27 }
 0x123   :  { %v225_v28 = vpop.permute.xlu0 %224 }
 0x124   :  { %v227_v29 = vmul.f32 %v225_v28, %v221_v27 }
 0x126   :  { %229 = vrot.lane.b32.xlu0 %v227_v29, %s2729_s16 }
 0x198   :  { %v230_v31 = vpop.permute.xlu0 %229 }
 0x199   :  { %v2830_v32 = vadd.f32 %v230_v31, %v222_v30 }
 0x19b   :  { %2454 = vtanh.f32 %v2830_v32 }
 0x1a1   :  { %v2455_v33 = vpop.eup %2454 }
 0x1a2   :  { %235 = vrot.lane.b32.xlu1 %v2455_v33, %s2728_s15 }
 0x214   :  { %v236_v42 = vpop.permute.xlu1 %235 }
 0x215   :  { %v238_v43 = vmul.f32 %v236_v42, %v221_v27  ;;  %v2948_v42 = vld [vmem:[#allocation2 + $0x48] sm:$0xff] }
 0x217   :  { %240 = vrot.lane.b32.xlu1 %v238_v43, %s2729_s16  ;;  %v2950_v43 = vld [vmem:[#allocation5 + $0x48] sm:$0xff] }
 0x289   :  { %v241_v49 = vpop.permute.xlu1 %240 }
 0x28a   :  { %2366 = vmatmul.msk.f32.vlgmr.msrb.gmra.mxu2 %vm128_vm0, %v241_v49  ;;  %2367 = vmatmul.msk.f32.vlgmr.msrb.gmra.mxu3 %vm128_vm0, %v241_v49  ;;  %v2959_v49 = vld [vmem:[#allocation5 + $0x40] sm:$0xff] }
 0x28b   :  { %432 = vmatpush.msrb.mxu2 %v2938_v34  ;;  %452 = vmatpush.msrb.mxu3 %v2942_v40 }
 0x28d   :  { %433 = vmatpush.msrb.mxu2 %v2940_v35  ;;  %453 = vmatpush.msrb.mxu3 %v2946_v41 }
 0x28f   :  { %434 = vmatpush.msrb.mxu2 %v2948_v42  ;;  %454 = vmatpush.msrb.mxu3 %v2950_v43 }
 0x291   :  { %435 = vmatpush.msrb.mxu2 %v2954_v46  ;;  %455 = vmatpush.msrb.mxu3 %v2959_v49 }
 0x30d   :  { %v261_v58 = vpop.f32.mrf.mxu2  ;;  %v282_v59 = vpop.f32.mrf.mxu3 }
 0x30e   :  { %v264_v60 = vadd.f32 %v261_v58, %v174_v55  ;;  %v283_v61 = vadd.f32 %v2914_v56, %v282_v59 }
 0x310   :  { %v306_v62 = vmul.f32 %v264_v60, %v2821_v20  ;;  %v305_v63 = vadd.f32 %v302_v57, %v283_v61  ;;  %v177_v57 = vadd.f32 %v2818_v17, %v2807_v12 }
 0x312   :  { %2456 = vtanh.f32 %v306_v62  ;;  %v327_v0 = vmul.f32 %v305_v63, %v2821_v20 }
 0x314   :  { %2458 = vtanh.f32 %v327_v0 }
 0x318   :  { %v2457_v1 = vpop.eup %2456 }
 0x319   :  { %v308_v2 = vmul.f32 %v2457_v1, %v2821_v20 }
 0x31a   :  { %v2459_v4 = vpop.eup %2458 }
 0x31b   :  { %v309_v3 = vadd.f32 %v308_v2, %v2824_v25  ;;  %v329_v5 = vmul.f32 %v2459_v4, %v2821_v20  ;;  %v2991_v2 = vld [vmem:[%s3695_s3 + $0x2] ss:$0 sm:$0xff] }
 0x31d   :  { %312 = vrot.lane.b32.xlu2 %v309_v3, %s2728_s15  ;;  %v330_v10 = vadd.f32 %v329_v5, %v2824_v25  ;;  %v310_v21 = vmul.f32 %v309_v3, %v2830_v32 }
 0x31f   :  { %v331_v24 = vmul.f32 0.0, %v330_v10 }
 0x325   :  { %333 = vrot.lane.b32.xlu2 %v330_v10, %s2728_s15 }
 0x377   :  { %v313_v13 = vpop.permute.xlu2 %312 }
 0x378   :  { %v315_v16 = vmul.f32 %v313_v13, %v309_v3 }
 0x37a   :  { %317 = vrot.lane.b32.xlu0 %v315_v16, %s2729_s16 }
 0x37f   :  { %v334_v18 = vpop.permute.xlu2 %333 }
 0x380   :  { %v336_v19 = vmul.f32 %v334_v18, %v330_v10 }
 0x382   :  { %338 = vrot.lane.b32.xlu1 %v336_v19, %s2729_s16 }
 0x3ec   :  { %v318_v22 = vpop.permute.xlu0 %317 }
 0x3ed   :  { %v2928_v23 = vadd.f32 %v318_v22, %v310_v21 }
 0x3ef   :  { %2460 = vtanh.f32 %v2928_v23 }
 0x3f4   :  { %v339_v26 = vpop.permute.xlu1 %338 }
 0x3f5   :  { %v2461_v27 = vpop.eup %2460  ;;  %v2931_v28 = vadd.f32 %v339_v26, %v331_v24 }
 0x3f6   :  { %323 = vrot.lane.b32.xlu2 %v2461_v27, %s2728_s15 }
 0x3f7   :  { %2462 = vtanh.f32 %v2931_v28 }
 0x3fd   :  { %v2463_v29 = vpop.eup %2462 }
 0x3fe   :  { %344 = vrot.lane.b32.xlu0 %v2463_v29, %s2728_s15 }
 0x450   :  { %v324_v30 = vpop.permute.xlu2 %323 }
 0x451   :  { %v326_v31 = vmul.f32 %v324_v30, %v309_v3 }
 0x453   :  { %349 = vrot.lane.b32.xlu1 %v326_v31, %s2729_s16 }
 0x470   :  { %v345_v32 = vpop.permute.xlu0 %344 }
 0x471   :  { %v347_v33 = vmul.f32 %v345_v32, %v330_v10 }
 0x473   :  { %395 = vrot.lane.b32.xlu2 %v347_v33, %s2729_s16 }
 0x4c5   :  { %v350_v54 = vpop.permute.xlu1 %349 }
 0x4c6   :  { %2368 = vmatmul.msk.f32.vlgmr.msra.gmra.mxu2 %vm128_vm0, %v350_v54  ;;  %2369 = vmatmul.msk.f32.vlgmr.msra.gmra.mxu3 %vm128_vm0, %v350_v54 }
 0x4c7   :  { %562 = vmatpush.msra.mxu2 %v2840_v36  ;;  %587 = vmatpush.msra.mxu3 %v2875_v44 }
 0x4c9   :  { %563 = vmatpush.msra.mxu2 %v2844_v37  ;;  %588 = vmatpush.msra.mxu3 %v2877_v45 }
 0x4cb   :  { %564 = vmatpush.msra.mxu2 %v2848_v38  ;;  %589 = vmatpush.msra.mxu3 %v2884_v47 }
 0x4cd   :  { %v396_v55 = vpop.permute.xlu2 %395  ;;  %565 = vmatpush.msra.mxu2 %v2853_v39  ;;  %590 = vmatpush.msra.mxu3 %v2887_v48 }
 0x4ce   :  { %2370 = vmatmul.msk.f32.vlgmr.msrb.gmra.mxu1 %vm128_vm0, %v396_v55  ;;  %2371 = vmatmul.msk.f32.vlgmr.msrb.gmra.mxu2 %vm128_vm0, %v396_v55 }
 0x4cf   :  { %456 = vmatmul.f32.vlgmr.msrb.gmra.mxu3 %v2726_v11  ;;  %608 = vmatpush.msrb.mxu1 %v2938_v34 }
 0x4d0   :  { %633 = vmatpush.msrb.mxu2 %v2942_v40 }
 0x4d1   :  { %609 = vmatpush.msrb.mxu1 %v2940_v35 }
 0x4d2   :  { %634 = vmatpush.msrb.mxu2 %v2946_v41 }
 0x4d3   :  { %610 = vmatpush.msrb.mxu1 %v2948_v42 }
 0x4d4   :  { %635 = vmatpush.msrb.mxu2 %v2950_v43 }
 0x4d5   :  { %611 = vmatpush.msrb.mxu1 %v2954_v46 }
 0x4d6   :  { %636 = vmatpush.msrb.mxu2 %v2959_v49 }
 0x549   :  { %v370_v58 = vpop.f32.mrf.mxu2  ;;  %v391_v59 = vpop.f32.mrf.mxu3 }
 0x54a   :  { %v373_v60 = vadd.f32 %v370_v58, %v177_v57  ;;  %v392_v61 = vadd.f32 %v2914_v56, %v391_v59 }
 0x54b   :  { %v416_v62 = vpop.f32.mrf.mxu1 }
 0x54c   :  { %v461_v63 = vmul.f32 %v373_v60, %v2821_v20  ;;  %v419_v0 = vadd.f32 %v416_v62, %v392_v61 }
 0x54e   :  { %2464 = vtanh.f32 %v461_v63  ;;  %v482_v1 = vmul.f32 %v419_v0, %v2821_v20 }
 0x550   :  { %2466 = vtanh.f32 %v482_v1 }
 0x551   :  { %v437_v3 = vpop.f32.mrf.mxu2 }
 0x552   :  { %v438_v12 = vadd.f32 %v2991_v2, %v437_v3  ;;  %v457_v4 = vpop.f32.mrf.mxu3 }
 0x554   :  { %v2465_v5 = vpop.eup %2464  ;;  %v460_v10 = vadd.f32 %v457_v4, %v438_v12 }
 0x555   :  { %v463_v13 = vmul.f32 %v2465_v5, %v2821_v20 }
 0x556   :  { %v2467_v16 = vpop.eup %2466  ;;  %v503_v18 = vmul.f32 %v460_v10, %v2821_v20 }
 0x557   :  { %v464_v19 = vadd.f32 %v463_v13, %v2824_v25  ;;  %v484_v21 = vmul.f32 %v2467_v16, %v2821_v20  ;;  %v3024_v16 = vld [vmem:[#allocation2 + $0x78] sm:$0xff] }
 0x558   :  { %2468 = vtanh.f32 %v503_v18  ;;  %v3026_v18 = vld [vmem:[#allocation2 + $0x70] sm:$0xff]  ;;  %654 = vmatpush.msrb.mxu3 %v3024_v16  ;;  %1145 = vmatpush.msra.mxu0 %v3024_v16 }
 0x559   :  { %467 = vrot.lane.b32.xlu0 %v464_v19, %s2728_s15  ;;  %v485_v22 = vadd.f32 %v484_v21, %v2824_v25  ;;  %v465_v60 = vmul.f32 %v464_v19, %v2928_v23  ;;  %v3030_v21 = vld [vmem:[#allocation2 + $0x68] sm:$0xff] }
 0x55a   :  { %655 = vmatpush.msrb.mxu3 %v3026_v18  ;;  %1146 = vmatpush.msra.mxu0 %v3026_v18 }
 0x55b   :  { %488 = vrot.lane.b32.xlu1 %v485_v22, %s2728_s15  ;;  %v486_v63 = vmul.f32 %v485_v22, %v2931_v28 }
 0x55c   :  { %656 = vmatpush.msrb.mxu3 %v3030_v21  ;;  %1147 = vmatpush.msra.mxu0 %v3030_v21 }
 0x55e   :  { %v2469_v24 = vpop.eup %2468 }
 0x55f   :  { %v505_v26 = vmul.f32 %v2469_v24, %v2821_v20 }
 0x561   :  { %v506_v27 = vadd.f32 %v505_v26, %v2824_v25  ;;  %v3044_v26 = vld [vmem:[#allocation5 + $0x70] sm:$0xff] }
 0x563   :  { %509 = vrot.lane.b32.xlu2 %v506_v27, %s2728_s15  ;;  %v507_v55 = vmul.f32 0.0, %v506_v27 }
 0x5bd   :  { %v510_v29 = vpop.permute.xlu2 %509 }
 0x5be   :  { %v512_v30 = vmul.f32 %v510_v29, %v506_v27  ;;  %v3049_v29 = vld [vmem:[#allocation5 + $0x68] sm:$0xff] }
 0x5c0   :  { %514 = vrot.lane.b32.xlu2 %v512_v30, %s2729_s16  ;;  %v3053_v30 = vld [vmem:[#allocation5 + $0x60] sm:$0xff] }
 0x5cb   :  { %v468_v31 = vpop.permute.xlu0 %467 }
 0x5cc   :  { %v470_v32 = vmul.f32 %v468_v31, %v464_v19 }
 0x5cd   :  { %v489_v33 = vpop.permute.xlu1 %488 }
 0x5ce   :  { %v491_v54 = vmul.f32 %v489_v33, %v485_v22  ;;  %472 = vrot.lane.b32.xlu0 %v470_v32, %s2729_s16  ;;  %v180_v32 = vadd.f32 %v2818_v17, %v2811_v15  ;;  %v3093_v15 = vld [vmem:[%s3695_s3 + $0x3] ss:$0 sm:$0xff] }
 0x5d0   :  { %493 = vrot.lane.b32.xlu1 %v491_v54, %s2729_s16 }
 0x61a   :  { %v515_v57 = vpop.permute.xlu2 %514 }
 0x61b   :  { %v3007_v58 = vadd.f32 %v515_v57, %v507_v55 }
 0x61d   :  { %2470 = vtanh.f32 %v3007_v58 }
 0x623   :  { %v2471_v59 = vpop.eup %2470 }
 0x624   :  { %520 = vrot.lane.b32.xlu2 %v2471_v59, %s2728_s15 }
 0x640   :  { %v473_v61 = vpop.permute.xlu0 %472 }
 0x641   :  { %v3012_v62 = vadd.f32 %v473_v61, %v465_v60 }
 0x642   :  { %v494_v0 = vpop.permute.xlu1 %493 }
 0x643   :  { %2472 = vtanh.f32 %v3012_v62  ;;  %v3016_v1 = vadd.f32 %v494_v0, %v486_v63 }
 0x645   :  { %2474 = vtanh.f32 %v3016_v1 }
 0x649   :  { %v2473_v3 = vpop.eup %2472 }
 0x64a   :  { %478 = vrot.lane.b32.xlu0 %v2473_v3, %s2728_s15 }
 0x64b   :  { %v2475_v12 = vpop.eup %2474 }
 0x64c   :  { %499 = vrot.lane.b32.xlu1 %v2475_v12, %s2728_s15 }
 0x67e   :  { %v521_v4 = vpop.permute.xlu2 %520 }
 0x67f   :  { %v523_v23 = vmul.f32 %v521_v4, %v506_v27 }
 0x681   :  { %617 = vrot.lane.b32.xlu2 %v523_v23, %s2729_s16 }
 0x6bc   :  { %v479_v5 = vpop.permute.xlu0 %478 }
 0x6bd   :  { %v481_v10 = vmul.f32 %v479_v5, %v464_v19  ;;  %v3036_v19 = vld [vmem:[#allocation2 + $0x60] sm:$0xff] }
 0x6be   :  { %v500_v28 = vpop.permute.xlu1 %499  ;;  %657 = vmatpush.msrb.mxu3 %v3036_v19  ;;  %1148 = vmatpush.msra.mxu0 %v3036_v19 }
 0x6bf   :  { %v502_v13 = vmul.f32 %v500_v28, %v485_v22  ;;  %525 = vrot.lane.b32.xlu0 %v481_v10, %s2729_s16  ;;  %v3040_v22 = vld [vmem:[#allocation5 + $0x78] sm:$0xff] }
 0x6c1   :  { %571 = vrot.lane.b32.xlu1 %v502_v13, %s2729_s16 }
 0x6db   :  { %v618_v31 = vpop.permute.xlu2 %617 }
 0x731   :  { %v526_v24 = vpop.permute.xlu0 %525 }
 0x732   :  { %2372 = vmatmul.msk.f32.vlgmr.msra.gmra.mxu1 %vm128_vm0, %v526_v24  ;;  %2373 = vmatmul.msk.f32.vlgmr.msra.gmra.mxu2 %vm128_vm0, %v526_v24 }
 0x733   :  { %v572_v27 = vpop.permute.xlu1 %571  ;;  %674 = vmatpush.msra.mxu1 %v3040_v22  ;;  %784 = vmatpush.msra.mxu2 %v2784_v6 }
 0x734   :  { %2374 = vmatmul.msk.f32.vlgmr.msra.gmra.mxu3 %vm128_vm0, %v572_v27 }
 0x735   :  { %675 = vmatpush.msra.mxu1 %v3044_v26  ;;  %805 = vmatpush.msra.mxu3 %v2840_v36 }
 0x736   :  { %785 = vmatpush.msra.mxu2 %v2787_v7 }
 0x737   :  { %676 = vmatpush.msra.mxu1 %v3049_v29  ;;  %806 = vmatpush.msra.mxu3 %v2844_v37 }
 0x738   :  { %786 = vmatpush.msra.mxu2 %v2791_v8 }
 0x739   :  { %677 = vmatpush.msra.mxu1 %v3053_v30  ;;  %807 = vmatpush.msra.mxu3 %v2848_v38 }
 0x73a   :  { %2375 = vmatmul.msk.f32.vlgmr.msrb.gmra.mxu1 %vm128_vm0, %v572_v27  ;;  %2376 = vmatmul.msk.f32.vlgmr.msrb.gmra.mxu2 %vm128_vm0, %v618_v31 }
 0x73b   :  { %787 = vmatpush.msra.mxu2 %v2795_v9  ;;  %808 = vmatpush.msra.mxu3 %v2853_v39 }
 0x73c   :  { %2377 = vmatmul.msk.f32.vlgmr.msrb.gmra.mxu3 %vm128_vm0, %v618_v31  ;;  %830 = vmatpush.msrb.mxu1 %v2875_v44 }
 0x73d   :  { %851 = vmatpush.msrb.mxu2 %v2938_v34  ;;  %876 = vmatpush.msrb.mxu3 %v2942_v40 }
 0x73e   :  { %831 = vmatpush.msrb.mxu1 %v2877_v45 }
 0x73f   :  { %852 = vmatpush.msrb.mxu2 %v2940_v35  ;;  %877 = vmatpush.msrb.mxu3 %v2946_v41 }
 0x740   :  { %832 = vmatpush.msrb.mxu1 %v2884_v47 }
 0x741   :  { %853 = vmatpush.msrb.mxu2 %v2948_v42  ;;  %878 = vmatpush.msrb.mxu3 %v2950_v43 }
 0x742   :  { %678 = vmatmul.f32.vlgmr.msra.gmra.mxu1 %v2726_v11 }
 0x743   :  { %854 = vmatpush.msrb.mxu2 %v2954_v46  ;;  %833 = vmatpush.msrb.mxu1 %v2887_v48 }
 0x744   :  { %879 = vmatpush.msrb.mxu3 %v2959_v49 }
 0x745   :  { %897 = vmatpush.msra.mxu1 %v3024_v16 }
 0x747   :  { %898 = vmatpush.msra.mxu1 %v3026_v18 }
 0x749   :  { %899 = vmatpush.msra.mxu1 %v3030_v21 }
 0x74b   :  { %900 = vmatpush.msra.mxu1 %v3036_v19 }
 0x7af   :  { %v546_v33 = vpop.f32.mrf.mxu1 }
 0x7b0   :  { %v549_v54 = vadd.f32 %v546_v33, %v180_v32 }
 0x7b2   :  { %v683_v11 = vmul.f32 %v549_v54, %v2821_v20 }
 0x7b4   :  { %2476 = vtanh.f32 %v683_v11 }
 0x7b5   :  { %v567_v55 = vpop.f32.mrf.mxu2 }
 0x7b6   :  { %v568_v57 = vadd.f32 %v2914_v56, %v567_v55 }
 0x7b7   :  { %v592_v59 = vpop.f32.mrf.mxu3  ;;  %v613_v60 = vpop.f32.mrf.mxu1 }
 0x7b8   :  { %v595_v61 = vadd.f32 %v592_v59, %v568_v57  ;;  %v614_v12 = vadd.f32 %v2991_v2, %v613_v60 }
 0x7ba   :  { %v2477_v63 = vpop.eup %2476  ;;  %v704_v0 = vmul.f32 %v595_v61, %v2821_v20 }
 0x7bb   :  { %v685_v3 = vmul.f32 %v2477_v63, %v2821_v20 }
 0x7bc   :  { %2478 = vtanh.f32 %v704_v0 }
 0x7bd   :  { %v638_v4 = vpop.f32.mrf.mxu2  ;;  %v686_v23 = vadd.f32 %v685_v3, %v2824_v25 }
 0x7be   :  { %v641_v5 = vadd.f32 %v638_v4, %v614_v12 }
 0x7bf   :  { %689 = vrot.lane.b32.xlu0 %v686_v23, %s2728_s15  ;;  %v659_v10 = vpop.f32.mrf.mxu3  ;;  %v679_v28 = vpop.f32.mrf.mxu1 }
 0x7c0   :  { %v725_v13 = vmul.f32 %v641_v5, %v2821_v20  ;;  %v660_v24 = vadd.f32 %v3093_v15, %v659_v10 }
 0x7c2   :  { %v2479_v27 = vpop.eup %2478  ;;  %2480 = vtanh.f32 %v725_v13  ;;  %v682_v31 = vadd.f32 %v679_v28, %v660_v24 }
 0x7c3   :  { %v706_v32 = vmul.f32 %v2479_v27, %v2821_v20 }
 0x7c4   :  { %v746_v33 = vmul.f32 %v682_v31, %v2821_v20 }
 0x7c5   :  { %v707_v54 = vadd.f32 %v706_v32, %v2824_v25 }
 0x7c6   :  { %2482 = vtanh.f32 %v746_v33 }
 0x7c7   :  { %710 = vrot.lane.b32.xlu1 %v707_v54, %s2728_s15  ;;  %v708_v13 = vmul.f32 %v707_v54, %v3016_v1 }
 0x7c8   :  { %v2481_v11 = vpop.eup %2480 }
 0x7c9   :  { %v727_v55 = vmul.f32 %v2481_v11, %v2821_v20 }
 0x7cb   :  { %v728_v57 = vadd.f32 %v727_v55, %v2824_v25 }
 0x7cc   :  { %v2483_v59 = vpop.eup %2482 }
 0x7cd   :  { %731 = vrot.lane.b32.xlu2 %v728_v57, %s2728_s15  ;;  %v748_v60 = vmul.f32 %v2483_v59, %v2821_v20  ;;  %v729_v31 = vmul.f32 %v728_v57, %v3007_v58  ;;  %v687_v59 = vmul.f32 %v686_v23, %v3012_v62 }
 0x7cf   :  { %v749_v61 = vadd.f32 %v748_v60, %v2824_v25 }
 0x7d1   :  { %752 = vrot.lane.b32.xlu0 %v749_v61, %s2728_s15  ;;  %v750_v58 = vmul.f32 0.0, %v749_v61 }
 0x827   :  { %v732_v63 = vpop.permute.xlu2 %731 }
 0x828   :  { %v734_v0 = vmul.f32 %v732_v63, %v728_v57 }
 0x82a   :  { %736 = vrot.lane.b32.xlu0 %v734_v0, %s2729_s16 }
 0x831   :  { %v690_v3 = vpop.permute.xlu0 %689 }
 0x832   :  { %v692_v12 = vmul.f32 %v690_v3, %v686_v23 }
 0x834   :  { %694 = vrot.lane.b32.xlu1 %v692_v12, %s2729_s16 }
 0x839   :  { %v711_v4 = vpop.permute.xlu1 %710 }
 0x83a   :  { %v713_v5 = vmul.f32 %v711_v4, %v707_v54 }
 0x83c   :  { %715 = vrot.lane.b32.xlu2 %v713_v5, %s2729_s16 }
 0x843   :  { %v753_v10 = vpop.permute.xlu0 %752 }
 0x844   :  { %v755_v28 = vmul.f32 %v753_v10, %v749_v61 }
 0x846   :  { %757 = vrot.lane.b32.xlu1 %v755_v28, %s2729_s16 }
 0x896   :  { %v716_v24 = vpop.permute.xlu2 %715 }
 0x897   :  { %v3114_v27 = vadd.f32 %v716_v24, %v708_v13 }
 0x899   :  { %2484 = vtanh.f32 %v3114_v27 }
 0x89c   :  { %v737_v32 = vpop.permute.xlu0 %736 }
 0x89d   :  { %v3118_v33 = vadd.f32 %v737_v32, %v729_v31 }
 0x89f   :  { %v2485_v11 = vpop.eup %2484  ;;  %2486 = vtanh.f32 %v3118_v33 }
 0x8a0   :  { %721 = vrot.lane.b32.xlu0 %v2485_v11, %s2728_s15 }
 0x8a5   :  { %v2487_v55 = vpop.eup %2486 }
 0x8a6   :  { %742 = vrot.lane.b32.xlu1 %v2487_v55, %s2728_s15  ;;  %v695_v1 = vpop.permute.xlu1 %694 }
 0x8a7   :  { %v3124_v60 = vadd.f32 %v695_v1, %v687_v59 }
 0x8a9   :  { %2488 = vtanh.f32 %v3124_v60 }
 0x8af   :  { %v2489_v63 = vpop.eup %2488 }
 0x8b0   :  { %700 = vrot.lane.b32.xlu2 %v2489_v63, %s2728_s15 }
 0x8b8   :  { %v758_v0 = vpop.permute.xlu1 %757 }
 0x8b9   :  { %v3128_v3 = vadd.f32 %v758_v0, %v750_v58 }
 0x8bb   :  { %2490 = vtanh.f32 %v3128_v3 }
 0x8c1   :  { %v2491_v12 = vpop.eup %2490 }
 0x8c2   :  { %763 = vrot.lane.b32.xlu2 %v2491_v12, %s2728_s15 }
 0x90a   :  { %v701_v62 = vpop.permute.xlu2 %700 }
 0x90b   :  { %v703_v4 = vmul.f32 %v701_v62, %v686_v23 }
 0x90d   :  { %768 = vrot.lane.b32.xlu0 %v703_v4, %s2729_s16 }
 0x912   :  { %v722_v5 = vpop.permute.xlu0 %721 }
 0x913   :  { %v724_v10 = vmul.f32 %v722_v5, %v707_v54 }
 0x915   :  { %814 = vrot.lane.b32.xlu1 %v724_v10, %s2729_s16 }
 0x918   :  { %v743_v28 = vpop.permute.xlu1 %742 }
 0x919   :  { %v745_v13 = vmul.f32 %v743_v28, %v728_v57 }
 0x91b   :  { %860 = vrot.lane.b32.xlu2 %v745_v13, %s2729_s16 }
 0x91c   :  { %v764_v24 = vpop.permute.xlu2 %763 }
 0x91d   :  { %v766_v31 = vmul.f32 %v764_v24, %v749_v61  ;;  %v183_v61 = vadd.f32 %v2818_v17, %v2902_v50 }
 0x91f   :  { %906 = vrot.lane.b32.xlu0 %v766_v31, %s2729_s16 }
 0x975   :  { %v861_v54 = vpop.permute.xlu2 %860 }
 0x97f   :  { %v769_v32 = vpop.permute.xlu0 %768 }
 0x980   :  { %2378 = vmatmul.msk.f32.vlgmr.msra.gmra.mxu2 %vm128_vm0, %v769_v32  ;;  %2379 = vmatmul.msk.f32.vlgmr.msra.gmra.mxu3 %vm128_vm0, %v769_v32 }
 0x981   :  { %922 = vmatpush.msra.mxu2 %v3040_v22  ;;  %1032 = vmatpush.msra.mxu3 %v2784_v6 }
 0x983   :  { %923 = vmatpush.msra.mxu2 %v3044_v26  ;;  %1033 = vmatpush.msra.mxu3 %v2787_v7 }
 0x985   :  { %924 = vmatpush.msra.mxu2 %v3049_v29  ;;  %1034 = vmatpush.msra.mxu3 %v2791_v8 }
 0x987   :  { %v815_v23 = vpop.permute.xlu1 %814  ;;  %925 = vmatpush.msra.mxu2 %v3053_v30  ;;  %1035 = vmatpush.msra.mxu3 %v2795_v9 }
 0x988   :  { %2380 = vmatmul.msk.f32.vlgmr.msrb.gmra.mxu1 %vm128_vm0, %v815_v23  ;;  %2381 = vmatmul.msk.f32.vlgmr.msrb.gmra.mxu2 %vm128_vm0, %v815_v23 }
 0x989   :  { %2382 = vmatmul.msk.f32.vlgmr.msrb.gmra.mxu3 %vm128_vm0, %v861_v54  ;;  %1078 = vmatpush.msrb.mxu1 %v2875_v44 }
 0x98a   :  { %1099 = vmatpush.msrb.mxu2 %v2938_v34  ;;  %1124 = vmatpush.msrb.mxu3 %v2942_v40 }
 0x98b   :  { %1079 = vmatpush.msrb.mxu1 %v2877_v45 }
 0x98c   :  { %1100 = vmatpush.msrb.mxu2 %v2940_v35  ;;  %1125 = vmatpush.msrb.mxu3 %v2946_v41 }
 0x98d   :  { %1080 = vmatpush.msrb.mxu1 %v2884_v47 }
 0x98e   :  { %1101 = vmatpush.msrb.mxu2 %v2948_v42  ;;  %1126 = vmatpush.msrb.mxu3 %v2950_v43 }
 0x98f   :  { %1081 = vmatpush.msrb.mxu1 %v2887_v48 }
 0x990   :  { %2383 = vmatmul.msk.f32.vlgmr.msra.gmra.mxu1 %vm128_vm0, %v861_v54  ;;  %1102 = vmatpush.msrb.mxu2 %v2954_v46 }
 0x991   :  { %v3161_v57 = vpop.permute.xlu0 %906  ;;  %1127 = vmatpush.msrb.mxu3 %v2959_v49  ;;  %1170 = vmatpush.msra.mxu1 %v3040_v22 }
 0x992   :  { %2384 = vmatmul.msk.f32.vlgmr.msra.gmra.mxu2 %vm128_vm0, %v3161_v57 }
 0x993   :  { %1171 = vmatpush.msra.mxu1 %v3044_v26  ;;  %1280 = vmatpush.msra.mxu2 %v2784_v6 }
 0x995   :  { %1172 = vmatpush.msra.mxu1 %v3049_v29  ;;  %1281 = vmatpush.msra.mxu2 %v2787_v7 }
 0x997   :  { %1173 = vmatpush.msra.mxu1 %v3053_v30  ;;  %1282 = vmatpush.msra.mxu2 %v2791_v8 }
 0x999   :  { %1283 = vmatpush.msra.mxu2 %v2795_v9 }
 0xa03   :  { %v789_v11 = vpop.f32.mrf.mxu2  ;;  %v810_v55 = vpop.f32.mrf.mxu3 }
 0xa04   :  { %v792_v59 = vadd.f32 %v789_v11, %v183_v61  ;;  %v811_v1 = vadd.f32 %v2914_v56, %v810_v55 }
 0xa05   :  { %v835_v63 = vpop.f32.mrf.mxu1 }
 0xa06   :  { %v931_v6 = vmul.f32 %v792_v59, %v2821_v20  ;;  %v838_v58 = vadd.f32 %v835_v63, %v811_v1 }
 0xa08   :  { %2492 = vtanh.f32 %v931_v6  ;;  %v952_v7 = vmul.f32 %v838_v58, %v2821_v20 }
 0xa0a   :  { %2494 = vtanh.f32 %v952_v7 }
 0xa0b   :  { %v856_v0 = vpop.f32.mrf.mxu2 }
 0xa0c   :  { %v857_v8 = vadd.f32 %v2991_v2, %v856_v0  ;;  %v881_v9 = vpop.f32.mrf.mxu3 }
 0xa0d   :  { %v902_v5 = vpop.f32.mrf.mxu1 }
 0xa0e   :  { %v2493_v12 = vpop.eup %2492  ;;  %v884_v62 = vadd.f32 %v881_v9, %v857_v8  ;;  %v903_v24 = vadd.f32 %v3093_v15, %v902_v5 }
 0xa0f   :  { %v933_v17 = vmul.f32 %v2493_v12, %v2821_v20 }
 0xa10   :  { %v2495_v50 = vpop.eup %2494  ;;  %v973_v4 = vmul.f32 %v884_v62, %v2821_v20 }
 0xa11   :  { %v934_v10 = vadd.f32 %v933_v17, %v2824_v25  ;;  %v954_v28 = vmul.f32 %v2495_v50, %v2821_v20 }
 0xa12   :  { %2496 = vtanh.f32 %v973_v4 }
 0xa13   :  { %937 = vrot.lane.b32.xlu1 %v934_v10, %s2728_s15  ;;  %v955_v13 = vadd.f32 %v954_v28, %v2824_v25  ;;  %v935_v62 = vmul.f32 %v934_v10, %v3124_v60 }
 0xa15   :  { %958 = vrot.lane.b32.xlu2 %v955_v13, %s2728_s15  ;;  %v927_v31 = vpop.f32.mrf.mxu2  ;;  %v956_v4 = vmul.f32 %v955_v13, %v3114_v27 }
 0xa16   :  { %v930_v32 = vadd.f32 %v927_v31, %v903_v24 }
 0xa18   :  { %v2497_v23 = vpop.eup %2496  ;;  %v994_v54 = vmul.f32 %v930_v32, %v2821_v20 }
 0xa19   :  { %v975_v61 = vmul.f32 %v2497_v23, %v2821_v20 }
 0xa1a   :  { %2498 = vtanh.f32 %v994_v54 }
 0xa1b   :  { %v976_v11 = vadd.f32 %v975_v61, %v2824_v25 }
 0xa1d   :  { %979 = vrot.lane.b32.xlu0 %v976_v11, %s2728_s15  ;;  %v977_v54 = vmul.f32 %v976_v11, %v3118_v33 }
 0xa20   :  { %v2499_v55 = vpop.eup %2498 }
 0xa21   :  { %v996_v59 = vmul.f32 %v2499_v55, %v2821_v20 }
 0xa23   :  { %v997_v1 = vadd.f32 %v996_v59, %v2824_v25 }
 0xa25   :  { %1000 = vrot.lane.b32.xlu1 %v997_v1, %s2728_s15  ;;  %v998_v60 = vmul.f32 %v997_v1, %v3128_v3 }
 0xa6f   :  { %v959_v63 = vpop.permute.xlu2 %958 }
 0xa70   :  { %v961_v6 = vmul.f32 %v959_v63, %v955_v13 }
 0xa72   :  { %963 = vrot.lane.b32.xlu0 %v961_v6, %s2729_s16 }
 0xa85   :  { %v938_v58 = vpop.permute.xlu1 %937 }
 0xa86   :  { %v940_v7 = vmul.f32 %v938_v58, %v934_v10 }
 0xa88   :  { %942 = vrot.lane.b32.xlu2 %v940_v7, %s2729_s16 }
 0xa8f   :  { %v980_v0 = vpop.permute.xlu0 %979 }
 0xa90   :  { %v982_v8 = vmul.f32 %v980_v0, %v976_v11 }
 0xa92   :  { %984 = vrot.lane.b32.xlu1 %v982_v8, %s2729_s16 }
 0xa97   :  { %v1001_v9 = vpop.permute.xlu1 %1000 }
 0xa98   :  { %v1003_v12 = vmul.f32 %v1001_v9, %v997_v1 }
 0xa9a   :  { %1005 = vrot.lane.b32.xlu2 %v1003_v12, %s2729_s16 }
 0xae2   :  { %v943_v17 = vpop.permute.xlu2 %942 }
 0xae3   :  { %v3200_v50 = vadd.f32 %v943_v17, %v935_v62 }
 0xae4   :  { %v964_v5 = vpop.permute.xlu0 %963 }
 0xae5   :  { %2500 = vtanh.f32 %v3200_v50  ;;  %v3204_v28 = vadd.f32 %v964_v5, %v956_v4 }
 0xae7   :  { %2502 = vtanh.f32 %v3204_v28 }
 0xaeb   :  { %v2501_v24 = vpop.eup %2500 }
 0xaec   :  { %948 = vrot.lane.b32.xlu0 %v2501_v24, %s2728_s15 }
 0xaed   :  { %v2503_v31 = vpop.eup %2502 }
 0xaee   :  { %969 = vrot.lane.b32.xlu1 %v2503_v31, %s2728_s15 }
 0xaf4   :  { %v1006_v32 = vpop.permute.xlu2 %1005 }
 0xaf5   :  { %v3210_v23 = vadd.f32 %v1006_v32, %v998_v60 }
 0xaf7   :  { %2504 = vtanh.f32 %v3210_v23 }
 0xafd   :  { %v2505_v27 = vpop.eup %2504 }
 0xafe   :  { %1011 = vrot.lane.b32.xlu0 %v2505_v27, %s2728_s15 }
 0xb04   :  { %v985_v61 = vpop.permute.xlu1 %984 }
 0xb05   :  { %v3215_v55 = vadd.f32 %v985_v61, %v977_v54 }
 0xb07   :  { %2506 = vtanh.f32 %v3215_v55 }
 0xb0d   :  { %v2507_v59 = vpop.eup %2506 }
 0xb0e   :  { %990 = vrot.lane.b32.xlu2 %v2507_v59, %s2728_s15 }
 0xb5e   :  { %v949_v63 = vpop.permute.xlu0 %948 }
 0xb5f   :  { %v951_v3 = vmul.f32 %v949_v63, %v934_v10 }
 0xb60   :  { %v970_v6 = vpop.permute.xlu1 %969 }
 0xb61   :  { %v972_v58 = vmul.f32 %v970_v6, %v955_v13  ;;  %1016 = vrot.lane.b32.xlu1 %v951_v3, %s2729_s16 }
 0xb63   :  { %1062 = vrot.lane.b32.xlu2 %v972_v58, %s2729_s16 }
 0xb68   :  { %v991_v7 = vpop.permute.xlu2 %990 }
 0xb69   :  { %v993_v0 = vmul.f32 %v991_v7, %v976_v11 }
 0xb6b   :  { %1108 = vrot.lane.b32.xlu0 %v993_v0, %s2729_s16 }
 0xb70   :  { %v1012_v33 = vpop.permute.xlu0 %1011 }
 0xb71   :  { %v1014_v8 = vmul.f32 %v1012_v33, %v997_v1 }
 0xb73   :  { %1154 = vrot.lane.b32.xlu1 %v1014_v8, %s2729_s16 }
 0xbbd   :  { %v1063_v9 = vpop.permute.xlu2 %1062 }
 0xbbe   :  { %2387 = vmatmul.msk.f32.vlgmr.msrb.gmra.mxu1 %vm128_vm0, %v1063_v9  ;;  %2388 = vmatmul.msk.f32.vlgmr.msrb.gmra.mxu2 %vm128_vm0, %v1063_v9 }
 0xbbf   :  { %1347 = vmatpush.msrb.mxu1 %v2938_v34  ;;  %1372 = vmatpush.msrb.mxu2 %v2942_v40 }
 0xbc1   :  { %1348 = vmatpush.msrb.mxu1 %v2940_v35  ;;  %1373 = vmatpush.msrb.mxu2 %v2946_v41 }
 0xbc3   :  { %1349 = vmatpush.msrb.mxu1 %v2948_v42  ;;  %1374 = vmatpush.msrb.mxu2 %v2950_v43  ;;  %v3261_v42 = vld [vmem:[%s3695_s3] ss:$0 sm:$0xff] }
 0xbc4   :  { %v186_v13 = vadd.f32 %v3261_v42, %v2906_v52 }
 0xbc5   :  { %1350 = vmatpush.msrb.mxu1 %v2954_v46  ;;  %1375 = vmatpush.msrb.mxu2 %v2959_v49 }
 0xbd3   :  { %v1017_v10 = vpop.permute.xlu1 %1016 }
 0xbd4   :  { %2385 = vmatmul.msk.f32.vlgmr.msra.gmra.mxu3 %vm128_vm0, %v1017_v10  ;;  %2386 = vmatmul.msk.f32.vlgmr.msrb.gmra.mxu0 %vm128_vm0, %v1017_v10 }
 0xbd5   :  { %1301 = vmatpush.msra.mxu3 %v2840_v36  ;;  %1326 = vmatpush.msrb.mxu0 %v2875_v44  ;;  %v2615_v44 = vld [vmem:[#allocation5] sm:$0xff] }
 0xbd7   :  { %1302 = vmatpush.msra.mxu3 %v2844_v37  ;;  %1327 = vmatpush.msrb.mxu0 %v2877_v45  ;;  %v2612_v37 = vld [vmem:[#allocation5 + $0x18] sm:$0xff] }
 0xbd9   :  { %1303 = vmatpush.msra.mxu3 %v2848_v38  ;;  %1328 = vmatpush.msrb.mxu0 %v2884_v47  ;;  %v2613_v38 = vld [vmem:[#allocation5 + $0x10] sm:$0xff] }
 0xbdb   :  { %1304 = vmatpush.msra.mxu3 %v2853_v39  ;;  %1329 = vmatpush.msrb.mxu0 %v2887_v48  ;;  %v2614_v39 = vld [vmem:[#allocation5 + $0x8] sm:$0xff] }
 0xbdd   :  { %v1109_v34 = vpop.permute.xlu0 %1108 }
 0xbde   :  { %2389 = vmatmul.msk.f32.vlgmr.msrb.gmra.mxu3 %vm128_vm0, %v1109_v34  ;;  %2390 = vmatmul.msk.f32.vlgmr.msra.gmra.mxu0 %vm128_vm0, %v1109_v34 }
 0xbdf   :  { %1418 = vmatpush.msra.mxu0 %v3040_v22  ;;  %1393 = vmatpush.msrb.mxu3 %v3024_v16 }
 0xbe1   :  { %1419 = vmatpush.msra.mxu0 %v3044_v26  ;;  %1394 = vmatpush.msrb.mxu3 %v3026_v18 }
 0xbe3   :  { %1420 = vmatpush.msra.mxu0 %v3049_v29  ;;  %1395 = vmatpush.msrb.mxu3 %v3030_v21 }
 0xbe5   :  { %v3251_v36 = vpop.permute.xlu1 %1154  ;;  %1421 = vmatpush.msra.mxu0 %v3053_v30  ;;  %1396 = vmatpush.msrb.mxu3 %v3036_v19 }
 0xbe6   :  { %2391 = vmatmul.msk.f32.vlgmr.msra.gmra.mxu1 %vm128_vm0, %v3251_v36 }
 0xbe7   :  { %1528 = vmatpush.msra.mxu1 %v2612_v37 }
 0xbe9   :  { %1529 = vmatpush.msra.mxu1 %v2613_v38 }
 0xbeb   :  { %1530 = vmatpush.msra.mxu1 %v2614_v39 }
 0xbed   :  { %1531 = vmatpush.msra.mxu1 %v2615_v44 }
 0xc3b   :  { %v1083_v48 = vpop.f32.mrf.mxu1 }
 0xc41   :  { %v1104_v17 = vpop.f32.mrf.mxu2 }
 0xc42   :  { %v1105_v24 = vadd.f32 %v2991_v2, %v1104_v17 }
 0xc51   :  { %v1058_v45 = vpop.f32.mrf.mxu0 }
 0xc52   :  { %v1059_v47 = vadd.f32 %v2914_v56, %v1058_v45 }
 0xc54   :  { %v1086_v35 = vadd.f32 %v1083_v48, %v1059_v47 }
 0xc56   :  { %v1200_v11 = vmul.f32 %v1086_v35, %v2821_v20 }
 0xc57   :  { %v1037_v1 = vpop.f32.mrf.mxu3 }
 0xc58   :  { %2508 = vtanh.f32 %v1200_v11  ;;  %v1040_v12 = vadd.f32 %v1037_v1, %v186_v13 }
 0xc5a   :  { %v1179_v62 = vmul.f32 %v1040_v12, %v2821_v20 }
 0xc5b   :  { %v1150_v4 = vpop.f32.mrf.mxu0 }
 0xc5c   :  { %2510 = vtanh.f32 %v1179_v62  ;;  %v1151_v52 = vadd.f32 %v3093_v15, %v1150_v4 }
 0xc5e   :  { %v2509_v56 = vpop.eup %2508 }
 0xc5f   :  { %v1202_v5 = vmul.f32 %v2509_v56, %v2821_v20 }
 0xc61   :  { %v1129_v31 = vpop.f32.mrf.mxu3  ;;  %v1203_v60 = vadd.f32 %v1202_v5, %v2824_v25 }
 0xc62   :  { %v2511_v32 = vpop.eup %2510  ;;  %v1132_v27 = vadd.f32 %v1129_v31, %v1105_v24 }
 0xc63   :  { %1206 = vrot.lane.b32.xlu0 %v1203_v60, %s2728_s15  ;;  %v1175_v54 = vpop.f32.mrf.mxu1  ;;  %v1181_v61 = vmul.f32 %v2511_v32, %v2821_v20  ;;  %v1204_v5 = vmul.f32 %v1203_v60, %v3204_v28 }
 0xc64   :  { %v1221_v59 = vmul.f32 %v1132_v27, %v2821_v20  ;;  %v1178_v63 = vadd.f32 %v1175_v54, %v1151_v52 }
 0xc65   :  { %v1182_v3 = vadd.f32 %v1181_v61, %v2824_v25 }
 0xc66   :  { %2512 = vtanh.f32 %v1221_v59  ;;  %v1242_v6 = vmul.f32 %v1178_v63, %v2821_v20 }
 0xc67   :  { %1185 = vrot.lane.b32.xlu2 %v1182_v3, %s2728_s15  ;;  %v1183_v48 = vmul.f32 %v1182_v3, %v3200_v50 }
 0xc68   :  { %2514 = vtanh.f32 %v1242_v6 }
 0xc6c   :  { %v2513_v58 = vpop.eup %2512 }
 0xc6d   :  { %v1223_v7 = vmul.f32 %v2513_v58, %v2821_v20  ;;  %v3313_v58 = vld [vmem:[#allocation5 + $0x38] sm:$0xff] }
 0xc6e   :  { %v2515_v0 = vpop.eup %2514 }
 0xc6f   :  { %v1224_v33 = vadd.f32 %v1223_v7, %v2824_v25  ;;  %v1244_v8 = vmul.f32 %v2515_v0, %v2821_v20  ;;  %v3316_v7 = vld [vmem:[#allocation5 + $0x30] sm:$0xff]  ;;  %v2621_v0 = vld [vmem:[#allocation2 + $0x28] sm:$0xff] }
 0xc71   :  { %1227 = vrot.lane.b32.xlu1 %v1224_v33, %s2728_s15  ;;  %v1245_v9 = vadd.f32 %v1244_v8, %v2824_v25  ;;  %v1225_v1 = vmul.f32 %v1224_v33, %v3215_v55  ;;  %v2623_v8 = vld [vmem:[#allocation2 + $0x20] sm:$0xff] }
 0xc73   :  { %1248 = vrot.lane.b32.xlu2 %v1245_v9, %s2728_s15  ;;  %v1246_v17 = vmul.f32 %v1245_v9, %v3210_v23 }
 0xcc1   :  { %v1186_v10 = vpop.permute.xlu2 %1185 }
 0xcc2   :  { %v1188_v34 = vmul.f32 %v1186_v10, %v1182_v3 }
 0xcc4   :  { %1190 = vrot.lane.b32.xlu0 %v1188_v34, %s2729_s16  ;;  %v3328_v34 = vld [vmem:[#allocation2 + $0x58] sm:$0xff] }
 0xccd   :  { %v1249_v37 = vpop.permute.xlu2 %1248 }
 0xcce   :  { %v1251_v38 = vmul.f32 %v1249_v37, %v1245_v9  ;;  %v3332_v37 = vld [vmem:[#allocation2 + $0x50] sm:$0xff] }
 0xcd0   :  { %1253 = vrot.lane.b32.xlu0 %v1251_v38, %s2729_s16  ;;  %v3336_v38 = vld [vmem:[#allocation2 + $0x48] sm:$0xff] }
 0xcd5   :  { %v1207_v39 = vpop.permute.xlu0 %1206 }
 0xcd6   :  { %v1209_v44 = vmul.f32 %v1207_v39, %v1203_v60 }
 0xcd8   :  { %1211 = vrot.lane.b32.xlu1 %v1209_v44, %s2729_s16 }
 0xce3   :  { %v1228_v45 = vpop.permute.xlu1 %1227 }
 0xce4   :  { %v1230_v47 = vmul.f32 %v1228_v45, %v1224_v33 }
 0xce6   :  { %1232 = vrot.lane.b32.xlu2 %v1230_v47, %s2729_s16 }
 0xd36   :  { %v1191_v35 = vpop.permute.xlu0 %1190 }
 0xd37   :  { %v3288_v13 = vadd.f32 %v1191_v35, %v1183_v48 }
 0xd39   :  { %2516 = vtanh.f32 %v3288_v13 }
 0xd3f   :  { %v2517_v11 = vpop.eup %2516 }
 0xd40   :  { %v1233_v12 = vpop.permute.xlu2 %1232  ;;  %1196 = vrot.lane.b32.xlu1 %v2517_v11, %s2728_s15 }
 0xd41   :  { %v3293_v62 = vadd.f32 %v1233_v12, %v1225_v1 }
 0xd42   :  { %v1254_v56 = vpop.permute.xlu0 %1253 }
 0xd43   :  { %2518 = vtanh.f32 %v3293_v62  ;;  %v3297_v4 = vadd.f32 %v1254_v56, %v1246_v17 }
 0xd45   :  { %2520 = vtanh.f32 %v3297_v4 }
 0xd49   :  { %v2519_v50 = vpop.eup %2518 }
 0xd4a   :  { %1238 = vrot.lane.b32.xlu0 %v2519_v50, %s2728_s15  ;;  %v1212_v55 = vpop.permute.xlu1 %1211 }
 0xd4b   :  { %v2521_v24 = vpop.eup %2520  ;;  %v3302_v31 = vadd.f32 %v1212_v55, %v1204_v5 }
 0xd4c   :  { %1259 = vrot.lane.b32.xlu1 %v2521_v24, %s2728_s15 }
 0xd4d   :  { %2522 = vtanh.f32 %v3302_v31 }
 0xd53   :  { %v2523_v23 = vpop.eup %2522 }
 0xd54   :  { %1217 = vrot.lane.b32.xlu2 %v2523_v23, %s2728_s15 }
 0xdae   :  { %v1218_v32 = vpop.permute.xlu2 %1217 }
 0xdaf   :  { %v1220_v52 = vmul.f32 %v1218_v32, %v1203_v60  ;;  %v2617_v60 = vld [vmem:[#allocation2 + $0x38] sm:$0xff] }
 0xdb1   :  { %1310 = vrot.lane.b32.xlu0 %v1220_v52, %s2729_s16 }
 0xdb2   :  { %v1197_v27 = vpop.permute.xlu1 %1196 }
 0xdb3   :  { %v1199_v54 = vmul.f32 %v1197_v27, %v1182_v3  ;;  %v2619_v3 = vld [vmem:[#allocation2 + $0x30] sm:$0xff] }
 0xdb5   :  { %1264 = vrot.lane.b32.xlu2 %v1199_v54, %s2729_s16 }
 0xdbc   :  { %v1239_v28 = vpop.permute.xlu0 %1238 }
 0xdbd   :  { %v1241_v61 = vmul.f32 %v1239_v28, %v1224_v33  ;;  %v3319_v33 = vld [vmem:[#allocation5 + $0x28] sm:$0xff] }
 0xdbe   :  { %v1260_v59 = vpop.permute.xlu1 %1259 }
 0xdbf   :  { %v1262_v63 = vmul.f32 %v1260_v59, %v1245_v9  ;;  %1356 = vrot.lane.b32.xlu1 %v1241_v61, %s2729_s16  ;;  %v3322_v9 = vld [vmem:[#allocation5 + $0x20] sm:$0xff] }
 0xdc1   :  { %1402 = vrot.lane.b32.xlu2 %v1262_v63, %s2729_s16 }
 0xe0f   :  { %v1265_v6 = vpop.permute.xlu2 %1264 }
 0xe10   :  { %2392 = vmatmul.msk.f32.vlgmr.msra.gmra.mxu2 %vm128_vm0, %v1265_v6  ;;  %2393 = vmatmul.msk.f32.vlgmr.msra.gmra.mxu3 %vm128_vm0, %v1265_v6 }
 0xe11   :  { %1549 = vmatpush.msra.mxu2 %v2617_v60  ;;  %1574 = vmatpush.msra.mxu3 %v3313_v58 }
 0xe13   :  { %1550 = vmatpush.msra.mxu2 %v2619_v3  ;;  %1575 = vmatpush.msra.mxu3 %v3316_v7 }
 0xe15   :  { %1551 = vmatpush.msra.mxu2 %v2621_v0  ;;  %1576 = vmatpush.msra.mxu3 %v3319_v33 }
 0xe17   :  { %1552 = vmatpush.msra.mxu2 %v2623_v8  ;;  %1577 = vmatpush.msra.mxu3 %v3322_v9 }
 0xe1b   :  { %v3339_v39 = vpop.permute.xlu2 %1402 }
 0xe23   :  { %v1311_v10 = vpop.permute.xlu0 %1310 }
 0xe24   :  { %2394 = vmatmul.msk.f32.vlgmr.msrb.gmra.mxu0 %vm128_vm0, %v1311_v10  ;;  %2395 = vmatmul.msk.f32.vlgmr.msrb.gmra.mxu1 %vm128_vm0, %v1311_v10 }
 0xe25   :  { %1620 = vmatpush.msrb.mxu1 %v2942_v40  ;;  %1595 = vmatpush.msrb.mxu0 %v3328_v34 }
 0xe27   :  { %1621 = vmatpush.msrb.mxu1 %v2946_v41  ;;  %1596 = vmatpush.msrb.mxu0 %v3332_v37  ;;  %v189_v41 = vadd.f32 %v3261_v42, %v2904_v51 }
 0xe29   :  { %1622 = vmatpush.msrb.mxu1 %v2950_v43  ;;  %1597 = vmatpush.msrb.mxu0 %v3336_v38 }
 0xe2b   :  { %1623 = vmatpush.msrb.mxu1 %v2959_v49  ;;  %1598 = vmatpush.msrb.mxu0 %v2954_v46 }
 0xe2c   :  { %2398 = vmatmul.msk.f32.vlgmr.msra.gmra.mxu0 %vm128_vm0, %v3339_v39 }
 0xe2d   :  { %1776 = vmatpush.msra.mxu0 %v2617_v60 }
 0xe2f   :  { %1777 = vmatpush.msra.mxu0 %v2619_v3 }
 0xe31   :  { %v1357_v40 = vpop.permute.xlu1 %1356  ;;  %1778 = vmatpush.msra.mxu0 %v2621_v0 }
 0xe32   :  { %2396 = vmatmul.msk.f32.vlgmr.msrb.gmra.mxu2 %vm128_vm0, %v1357_v40  ;;  %2397 = vmatmul.msk.f32.vlgmr.msrb.gmra.mxu3 %vm128_vm0, %v1357_v40 }
 0xe33   :  { %1641 = vmatpush.msrb.mxu2 %v3024_v16  ;;  %1666 = vmatpush.msrb.mxu3 %v3040_v22 }
 0xe34   :  { %1779 = vmatpush.msra.mxu0 %v2623_v8 }
 0xe35   :  { %1642 = vmatpush.msrb.mxu2 %v3026_v18  ;;  %1667 = vmatpush.msrb.mxu3 %v3044_v26 }
 0xe37   :  { %1643 = vmatpush.msrb.mxu2 %v3030_v21  ;;  %1668 = vmatpush.msrb.mxu3 %v3049_v29  ;;  %v3362_v21 = vld [vmem:[%s3695_s3 + $0x1] ss:$0 sm:$0xff] }
 0xe39   :  { %1644 = vmatpush.msrb.mxu2 %v3036_v19  ;;  %1669 = vmatpush.msrb.mxu3 %v3053_v30 }
 0xe93   :  { %v1285_v43 = vpop.f32.mrf.mxu2  ;;  %v1306_v16 = vpop.f32.mrf.mxu3 }
 0xe94   :  { %v1288_v46 = vadd.f32 %v1285_v43, %v189_v41  ;;  %v1307_v19 = vadd.f32 %v3362_v21, %v1306_v16 }
 0xe96   :  { %v1427_v49 = vmul.f32 %v1288_v46, %v2821_v20 }
 0xe98   :  { %2524 = vtanh.f32 %v1427_v49 }
 0xe9e   :  { %v2525_v18 = vpop.eup %2524 }
 0xe9f   :  { %v1429_v22 = vmul.f32 %v2525_v18, %v2821_v20 }
 0xea1   :  { %v1331_v26 = vpop.f32.mrf.mxu0  ;;  %v3366_v29 = vadd.f32 %v1429_v22, %v2824_v25  ;;  %v1352_v48 = vpop.f32.mrf.mxu1 }
 0xea2   :  { %v1334_v51 = vadd.f32 %v1331_v26, %v1307_v19  ;;  %v1353_v35 = vadd.f32 %v2991_v2, %v1352_v48 }
 0xea3   :  { %1433 = vrot.lane.b32.xlu0 %v3366_v29, %s2728_s15  ;;  %v1431_v40 = vmul.f32 %v3366_v29, %v3288_v13 }
 0xea4   :  { %v1448_v30 = vmul.f32 %v1334_v51, %v2821_v20 }
 0xea6   :  { %2526 = vtanh.f32 %v1448_v30 }
 0xea9   :  { %v1423_v56 = vpop.f32.mrf.mxu0 }
 0xeac   :  { %v2527_v44 = vpop.eup %2526 }
 0xead   :  { %v1450_v45 = vmul.f32 %v2527_v44, %v2821_v20 }
 0xeaf   :  { %v1451_v47 = vadd.f32 %v1450_v45, %v2824_v25 }
 0xeb1   :  { %1454 = vrot.lane.b32.xlu1 %v1451_v47, %s2728_s15  ;;  %v1452_v3 = vmul.f32 %v1451_v47, %v3302_v31 }
 0xeb5   :  { %v1377_v11 = vpop.f32.mrf.mxu2  ;;  %v1398_v1 = vpop.f32.mrf.mxu3 }
 0xeb6   :  { %v1380_v12 = vadd.f32 %v1377_v11, %v1353_v35  ;;  %v1399_v17 = vadd.f32 %v3093_v15, %v1398_v1  ;;  %v3430_v1 = vld [vmem:[#allocation5 + $0x70] sm:$0xff] }
 0xeb8   :  { %v1469_v50 = vmul.f32 %v1380_v12, %v2821_v20  ;;  %v1426_v5 = vadd.f32 %v1423_v56, %v1399_v17  ;;  %v3439_v12 = vld [vmem:[#allocation5 + $0x68] sm:$0xff]  ;;  %v3443_v17 = vld [vmem:[#allocation2 + $0x70] sm:$0xff] }
 0xeb9   :  { %v2638_v56 = vld [vmem:[#allocation5 + $0x48] sm:$0xff] }
 0xeba   :  { %2528 = vtanh.f32 %v1469_v50  ;;  %v1490_v55 = vmul.f32 %v1426_v5, %v2821_v20  ;;  %v3449_v50 = vld [vmem:[#allocation2 + $0x68] sm:$0xff]  ;;  %v2640_v5 = vld [vmem:[#allocation5 + $0x40] sm:$0xff] }
 0xebc   :  { %2530 = vtanh.f32 %v1490_v55 }
 0xec0   :  { %v2529_v24 = vpop.eup %2528 }
 0xec1   :  { %v1471_v23 = vmul.f32 %v2529_v24, %v2821_v20  ;;  %v192_v24 = vadd.f32 %v3261_v42, %v2908_v53 }
 0xec2   :  { %v2531_v32 = vpop.eup %2530 }
 0xec3   :  { %v1472_v52 = vadd.f32 %v1471_v23, %v2824_v25  ;;  %v1492_v2 = vmul.f32 %v2531_v32, %v2821_v20 }
 0xec5   :  { %1475 = vrot.lane.b32.xlu2 %v1472_v52, %s2728_s15  ;;  %v1493_v15 = vadd.f32 %v1492_v2, %v2824_v25  ;;  %v1473_v49 = vmul.f32 %v1472_v52, %v3293_v62 }
 0xec7   :  { %1496 = vrot.lane.b32.xlu0 %v1493_v15, %s2728_s15  ;;  %v1494_v13 = vmul.f32 %v1493_v15, %v3297_v4 }
 0xf15   :  { %v1434_v27 = vpop.permute.xlu0 %1433 }
 0xf16   :  { %v1436_v54 = vmul.f32 %v1434_v27, %v3366_v29 }
 0xf18   :  { %1438 = vrot.lane.b32.xlu1 %v1436_v54, %s2729_s16 }
 0xf1f   :  { %v1476_v28 = vpop.permute.xlu2 %1475 }
 0xf20   :  { %v1478_v61 = vmul.f32 %v1476_v28, %v1472_v52  ;;  %v3469_v28 = vld [vmem:[%s3695_s3 + $0x2] ss:$0 sm:$0xff] }
 0xf22   :  { %1480 = vrot.lane.b32.xlu0 %v1478_v61, %s2729_s16 }
 0xf23   :  { %v1455_v59 = vpop.permute.xlu1 %1454 }
 0xf24   :  { %v1457_v63 = vmul.f32 %v1455_v59, %v1451_v47 }
 0xf26   :  { %1459 = vrot.lane.b32.xlu2 %v1457_v63, %s2729_s16 }
 0xf39   :  { %v1497_v6 = vpop.permute.xlu0 %1496 }
 0xf3a   :  { %v1499_v60 = vmul.f32 %v1497_v6, %v1493_v15 }
 0xf3c   :  { %1501 = vrot.lane.b32.xlu1 %v1499_v60, %s2729_s16 }
 0xf80   :  { %v1460_v0 = vpop.permute.xlu2 %1459 }
 0xf81   :  { %v3390_v8 = vadd.f32 %v1460_v0, %v1452_v3 }
 0xf83   :  { %2532 = vtanh.f32 %v3390_v8 }
 0xf89   :  { %v2533_v10 = vpop.eup %2532 }
 0xf8a   :  { %1465 = vrot.lane.b32.xlu0 %v2533_v10, %s2728_s15  ;;  %v1439_v41 = vpop.permute.xlu1 %1438 }
 0xf8b   :  { %v3396_v43 = vadd.f32 %v1439_v41, %v1431_v40 }
 0xf8d   :  { %2534 = vtanh.f32 %v3396_v43 }
 0xf93   :  { %v2535_v46 = vpop.eup %2534 }
 0xf94   :  { %1444 = vrot.lane.b32.xlu2 %v2535_v46, %s2728_s15  ;;  %v1481_v31 = vpop.permute.xlu0 %1480 }
 0xf95   :  { %v3401_v16 = vadd.f32 %v1481_v31, %v1473_v49 }
 0xf97   :  { %2536 = vtanh.f32 %v3401_v16 }
 0xf9d   :  { %v2537_v18 = vpop.eup %2536 }
 0xf9e   :  { %1486 = vrot.lane.b32.xlu1 %v2537_v18, %s2728_s15 }
 0xfae   :  { %v1502_v22 = vpop.permute.xlu1 %1501 }
 0xfaf   :  { %v3406_v19 = vadd.f32 %v1502_v22, %v1494_v13  ;;  %v3486_v13 = vld [vmem:[%s3695_s3 + $0x3] ss:$0 sm:$0xff] }
 0xfb1   :  { %2538 = vtanh.f32 %v3406_v19 }
 0xfb7   :  { %v2539_v26 = vpop.eup %2538 }
 0xfb8   :  { %1507 = vrot.lane.b32.xlu2 %v2539_v26, %s2728_s15 }
 0xfee   :  { %v1445_v62 = vpop.permute.xlu2 %1444 }
 0xfef   :  { %v1447_v51 = vmul.f32 %v1445_v62, %v3366_v29  ;;  %v2629_v29 = vld [vmem:[#allocation2 + $0x40] sm:$0xff] }
 0xff1   :  { %1512 = vrot.lane.b32.xlu0 %v1447_v51, %s2729_s16 }
 0xffc   :  { %v1466_v30 = vpop.permute.xlu0 %1465 }
 0xffd   :  { %v1468_v44 = vmul.f32 %v1466_v30, %v1451_v47 }
 0xfff   :  { %1558 = vrot.lane.b32.xlu1 %v1468_v44, %s2729_s16 }
0x1010   :  { %v1487_v45 = vpop.permute.xlu1 %1486 }
0x1011   :  { %v1489_v48 = vmul.f32 %v1487_v45, %v1472_v52 }
0x1012   :  { %v1508_v4 = vpop.permute.xlu2 %1507 }
0x1013   :  { %v1510_v35 = vmul.f32 %v1508_v4, %v1493_v15  ;;  %1604 = vrot.lane.b32.xlu2 %v1489_v48, %s2729_s16 }
0x1015   :  { %1650 = vrot.lane.b32.xlu0 %v1510_v35, %s2729_s16 }
0x1063   :  { %v1513_v11 = vpop.permute.xlu0 %1512 }
0x1064   :  { %2399 = vmatmul.msk.f32.vlgmr.msra.gmra.mxu1 %vm128_vm0, %v1513_v11  ;;  %2400 = vmatmul.msk.f32.vlgmr.msra.gmra.mxu2 %vm128_vm0, %v1513_v11 }
0x1065   :  { %1801 = vmatpush.msra.mxu1 %v3313_v58  ;;  %1822 = vmatpush.msra.mxu2 %v3328_v34  ;;  %v3426_v58 = vld [vmem:[#allocation5 + $0x78] sm:$0xff] }
0x1067   :  { %1802 = vmatpush.msra.mxu1 %v3316_v7  ;;  %1823 = vmatpush.msra.mxu2 %v3332_v37 }
0x1069   :  { %1803 = vmatpush.msra.mxu1 %v3319_v33  ;;  %1824 = vmatpush.msra.mxu2 %v3336_v38  ;;  %v2632_v33 = vld [vmem:[#allocation5 + $0x58] sm:$0xff] }
0x106b   :  { %1804 = vmatpush.msra.mxu1 %v3322_v9  ;;  %1825 = vmatpush.msra.mxu2 %v2629_v29  ;;  %v3436_v9 = vld [vmem:[#allocation2 + $0x78] sm:$0xff] }
0x106d   :  { %v1605_v47 = vpop.permute.xlu2 %1604 }
0x106e   :  { %2403 = vmatmul.msk.f32.vlgmr.msrb.gmra.mxu1 %vm128_vm0, %v1605_v47  ;;  %2404 = vmatmul.msk.f32.vlgmr.msrb.gmra.mxu2 %vm128_vm0, %v1605_v47 }
0x106f   :  { %1893 = vmatpush.msrb.mxu1 %v3426_v58  ;;  %1982 = vmatpush.msrb.mxu2 %v3328_v34  ;;  %v2635_v34 = vld [vmem:[#allocation5 + $0x50] sm:$0xff] }
0x1071   :  { %v1559_v7 = vpop.permute.xlu1 %1558  ;;  %1894 = vmatpush.msrb.mxu1 %v3430_v1  ;;  %1983 = vmatpush.msrb.mxu2 %v3332_v37  ;;  %v3446_v37 = vld [vmem:[#allocation5 + $0x60] sm:$0xff] }
0x1072   :  { %2401 = vmatmul.msk.f32.vlgmr.msra.gmra.mxu3 %vm128_vm0, %v1559_v7  ;;  %2402 = vmatmul.msk.f32.vlgmr.msrb.gmra.mxu0 %vm128_vm0, %v1559_v7 }
0x1073   :  { %1847 = vmatpush.msra.mxu3 %v2632_v33  ;;  %1868 = vmatpush.msrb.mxu0 %v3436_v9 }
0x1074   :  { %1895 = vmatpush.msrb.mxu1 %v3439_v12  ;;  %1984 = vmatpush.msrb.mxu2 %v3336_v38  ;;  %v3452_v38 = vld [vmem:[#allocation2 + $0x60] sm:$0xff] }
0x1075   :  { %1848 = vmatpush.msra.mxu3 %v2635_v34  ;;  %1869 = vmatpush.msrb.mxu0 %v3443_v17 }
0x1076   :  { %1896 = vmatpush.msrb.mxu1 %v3446_v37  ;;  %1985 = vmatpush.msrb.mxu2 %v2629_v29 }
0x1077   :  { %1849 = vmatpush.msra.mxu3 %v2638_v56  ;;  %1870 = vmatpush.msrb.mxu0 %v3449_v50 }
0x1079   :  { %1850 = vmatpush.msra.mxu3 %v2640_v5  ;;  %1871 = vmatpush.msrb.mxu0 %v3452_v38 }
0x1087   :  { %v3455_v55 = vpop.permute.xlu0 %1650 }
0x1088   :  { %2405 = vmatmul.msk.f32.vlgmr.msrb.gmra.mxu3 %vm128_vm0, %v3455_v55 }
0x1089   :  { %2007 = vmatpush.msrb.mxu3 %v2632_v33 }
0x108b   :  { %2008 = vmatpush.msrb.mxu3 %v2635_v34 }
0x108d   :  { %2009 = vmatpush.msrb.mxu3 %v2638_v56 }
0x108f   :  { %2010 = vmatpush.msrb.mxu3 %v2640_v5 }
0x10e1   :  { %v1533_v23 = vpop.f32.mrf.mxu1 }
0x10e2   :  { %v1536_v32 = vadd.f32 %v1533_v23, %v192_v24 }
0x10e4   :  { %v1675_v52 = vmul.f32 %v1536_v32, %v2821_v20 }
0x10e6   :  { %2540 = vtanh.f32 %v1675_v52 }
0x10e7   :  { %v1554_v53 = vpop.f32.mrf.mxu2 }
0x10e8   :  { %v1555_v63 = vadd.f32 %v3362_v21, %v1554_v53 }
0x10eb   :  { %v1625_v42 = vpop.f32.mrf.mxu1 }
0x10ec   :  { %v2541_v2 = vpop.eup %2540 }
0x10ed   :  { %v1677_v15 = vmul.f32 %v2541_v2, %v2821_v20 }
0x10ef   :  { %v1600_v27 = vpop.f32.mrf.mxu0  ;;  %v3464_v54 = vadd.f32 %v1677_v15, %v2824_v25 }
0x10f0   :  { %v1601_v61 = vadd.f32 %v3469_v28, %v1600_v27 }
0x10f1   :  { %1681 = vrot.lane.b32.xlu0 %v3464_v54, %s2728_s15  ;;  %v1646_v18 = vpop.f32.mrf.mxu2  ;;  %v1679_v52 = vmul.f32 %v3464_v54, %v3396_v43 }
0x10f2   :  { %v1628_v59 = vadd.f32 %v1625_v42, %v1601_v61  ;;  %v1647_v22 = vadd.f32 %v3486_v13, %v1646_v18 }
0x10f4   :  { %v1717_v6 = vmul.f32 %v1628_v59, %v2821_v20 }
0x10f5   :  { %v1579_v60 = vpop.f32.mrf.mxu3 }
0x10f6   :  { %2542 = vtanh.f32 %v1717_v6  ;;  %v1582_v3 = vadd.f32 %v1579_v60, %v1555_v63 }
0x10f8   :  { %v1696_v0 = vmul.f32 %v1582_v3, %v2821_v20 }
0x10fa   :  { %2544 = vtanh.f32 %v1696_v0 }
0x10fc   :  { %v2543_v10 = vpop.eup %2542 }
0x10fd   :  { %v1719_v40 = vmul.f32 %v2543_v10, %v2821_v20 }
0x10ff   :  { %v1720_v41 = vadd.f32 %v1719_v40, %v2824_v25 }
0x1100   :  { %v2545_v46 = vpop.eup %2544 }
0x1101   :  { %1723 = vrot.lane.b32.xlu2 %v1720_v41, %s2728_s15  ;;  %v1698_v49 = vmul.f32 %v2545_v46, %v2821_v20  ;;  %v1721_v34 = vmul.f32 %v1720_v41, %v3401_v16 }
0x1103   :  { %v1699_v31 = vadd.f32 %v1698_v49, %v2824_v25 }
0x1105   :  { %1702 = vrot.lane.b32.xlu1 %v1699_v31, %s2728_s15  ;;  %v1700_v24 = vmul.f32 %v1699_v31, %v3390_v8 }
0x110b   :  { %v1671_v26 = vpop.f32.mrf.mxu3 }
0x110c   :  { %v1674_v62 = vadd.f32 %v1671_v26, %v1647_v22 }
0x110e   :  { %v1738_v51 = vmul.f32 %v1674_v62, %v2821_v20 }
0x1110   :  { %2546 = vtanh.f32 %v1738_v51 }
0x1116   :  { %v2547_v30 = vpop.eup %2546 }
0x1117   :  { %v1740_v44 = vmul.f32 %v2547_v30, %v2821_v20 }
0x1119   :  { %v1741_v45 = vadd.f32 %v1740_v44, %v2824_v25 }
0x111b   :  { %1744 = vrot.lane.b32.xlu1 %v1741_v45, %s2728_s15  ;;  %v1742_v8 = vmul.f32 %v1741_v45, %v3406_v19 }
0x115b   :  { %v1724_v48 = vpop.permute.xlu2 %1723 }
0x115c   :  { %v1726_v4 = vmul.f32 %v1724_v48, %v1720_v41 }
0x115e   :  { %1728 = vrot.lane.b32.xlu0 %v1726_v4, %s2729_s16 }
0x1163   :  { %v1682_v35 = vpop.permute.xlu0 %1681 }
0x1164   :  { %v1684_v11 = vmul.f32 %v1682_v35, %v3464_v54 }
0x1166   :  { %1686 = vrot.lane.b32.xlu1 %v1684_v11, %s2729_s16 }
0x1177   :  { %v1703_v29 = vpop.permute.xlu1 %1702 }
0x1178   :  { %v1705_v47 = vmul.f32 %v1703_v29, %v1699_v31 }
0x117a   :  { %1707 = vrot.lane.b32.xlu2 %v1705_v47, %s2729_s16 }
0x118d   :  { %v1745_v7 = vpop.permute.xlu1 %1744 }
0x118e   :  { %v1747_v33 = vmul.f32 %v1745_v7, %v1741_v45 }
0x1190   :  { %1749 = vrot.lane.b32.xlu2 %v1747_v33, %s2729_s16 }
0x11d0   :  { %v1729_v56 = vpop.permute.xlu0 %1728 }
0x11d1   :  { %v3499_v5 = vadd.f32 %v1729_v56, %v1721_v34 }
0x11d3   :  { %2548 = vtanh.f32 %v3499_v5 }
0x11d4   :  { %v1708_v23 = vpop.permute.xlu2 %1707 }
0x11d5   :  { %v3503_v32 = vadd.f32 %v1708_v23, %v1700_v24 }
0x11d7   :  { %2550 = vtanh.f32 %v3503_v32 }
0x11d8   :  { %v1687_v2 = vpop.permute.xlu1 %1686 }
0x11d9   :  { %v2549_v15 = vpop.eup %2548  ;;  %v1689_v27 = vadd.f32 %v1687_v2, %v1679_v52 }
0x11da   :  { %1734 = vrot.lane.b32.xlu1 %v2549_v15, %s2728_s15 }
0x11db   :  { %2552 = vtanh.f32 %v1689_v27 }
0x11dd   :  { %v2551_v16 = vpop.eup %2550 }
0x11de   :  { %1713 = vrot.lane.b32.xlu0 %v2551_v16, %s2728_s15 }
0x11e1   :  { %v2553_v61 = vpop.eup %2552 }
0x11e2   :  { %1692 = vrot.lane.b32.xlu2 %v2553_v61, %s2728_s15 }
0x11ea   :  { %v1750_v53 = vpop.permute.xlu2 %1749 }
0x11eb   :  { %v3512_v42 = vadd.f32 %v1750_v53, %v1742_v8 }
0x11ed   :  { %2554 = vtanh.f32 %v3512_v42 }
0x11f3   :  { %v2555_v43 = vpop.eup %2554 }
0x11f4   :  { %1755 = vrot.lane.b32.xlu0 %v2555_v43, %s2728_s15 }
0x123c   :  { %v1693_v59 = vpop.permute.xlu2 %1692 }
0x123d   :  { %v1695_v63 = vmul.f32 %v1693_v59, %v3464_v54 }
0x123f   :  { %1760 = vrot.lane.b32.xlu0 %v1695_v63, %s2729_s16 }
0x124c   :  { %v1735_v6 = vpop.permute.xlu1 %1734 }
0x124d   :  { %v1737_v60 = vmul.f32 %v1735_v6, %v1720_v41 }
0x124f   :  { %1831 = vrot.lane.b32.xlu2 %v1737_v60, %s2729_s16 }
0x1250   :  { %v1714_v3 = vpop.permute.xlu0 %1713 }
0x1251   :  { %v1716_v0 = vmul.f32 %v1714_v3, %v1699_v31 }
0x1253   :  { %1785 = vrot.lane.b32.xlu1 %v1716_v0, %s2729_s16 }
0x1266   :  { %v1756_v19 = vpop.permute.xlu0 %1755 }
0x1267   :  { %v1758_v10 = vmul.f32 %v1756_v19, %v1741_v45  ;;  %v2179_v19 = vld [vmem:[%s3696_s4 + $0x18] sm:$0xff] }
0x1269   :  { %1877 = vrot.lane.b32.xlu1 %v1758_v10, %s2729_s16  ;;  %v2178_v10 = vld [vmem:[%s3696_s4 + $0x10] sm:$0xff] }
0x12a9   :  { %v1832_v40 = vpop.permute.xlu2 %1831 }
0x12aa   :  { %2409 = vmatmul.msk.f32.vlgmr.msra.gmra.mxu3 %vm128_vm0, %v1832_v40 }
0x12ab   :  { %2146 = vmatpush.msra.mxu3 %v3426_v58 }
0x12ad   :  { %2147 = vmatpush.msra.mxu3 %v3430_v1 }
0x12af   :  { %2148 = vmatpush.msra.mxu3 %v3439_v12 }
0x12b1   :  { %v1761_v54 = vpop.permute.xlu0 %1760  ;;  %2149 = vmatpush.msra.mxu3 %v3446_v37 }
0x12b2   :  { %2406 = vmatmul.msk.f32.vlgmr.msra.gmra.mxu0 %vm128_vm0, %v1761_v54  ;;  %v2176_v54 = vld [vmem:[%s3696_s4] sm:$0xff] }
0x12b3   :  { %2028 = vmatpush.msra.mxu0 %v3436_v9 }
0x12b5   :  { %2029 = vmatpush.msra.mxu0 %v3443_v17 }
0x12b7   :  { %2030 = vmatpush.msra.mxu0 %v3449_v50 }
0x12b9   :  { %2031 = vmatpush.msra.mxu0 %v3452_v38 }
0x12ba   :  { %2410 = vmatmul.msk.f32.vlgmr.msrb.gmra.mxu0 %vm128_vm0, %v1832_v40  ;;  %v2177_v40 = vld [vmem:[%s3696_s4 + $0x8] sm:$0xff] }
0x12bb   :  { %2201 = vmatpush.msrb.mxu0 %v2179_v19 }
0x12bd   :  { %2202 = vmatpush.msrb.mxu0 %v2178_v10 }
0x12bf   :  { %2203 = vmatpush.msrb.mxu0 %v2177_v40 }
0x12c1   :  { %2204 = vmatpush.msrb.mxu0 %v2176_v54 }
0x12c5   :  { %v1786_v41 = vpop.permute.xlu1 %1785 }
0x12c6   :  { %2407 = vmatmul.msk.f32.vlgmr.msra.gmra.mxu1 %vm128_vm0, %v1786_v41  ;;  %2408 = vmatmul.msk.f32.vlgmr.msra.gmra.mxu2 %vm128_vm0, %v1786_v41 }
0x12c7   :  { %2053 = vmatpush.msra.mxu1 %v3426_v58  ;;  %2121 = vmatpush.msra.mxu2 %v3436_v9 }
0x12c9   :  { %2054 = vmatpush.msra.mxu1 %v3430_v1  ;;  %2122 = vmatpush.msra.mxu2 %v3443_v17 }
0x12cb   :  { %2055 = vmatpush.msra.mxu1 %v3439_v12  ;;  %2123 = vmatpush.msra.mxu2 %v3449_v50 }
0x12cd   :  { %2056 = vmatpush.msra.mxu1 %v3446_v37  ;;  %2124 = vmatpush.msra.mxu2 %v3452_v38 }
0x12db   :  { %v3542_v46 = vpop.permute.xlu1 %1877 }
0x12dc   :  { %2411 = vmatmul.msk.f32.vlgmr.msrb.gmra.mxu1 %vm128_vm0, %v3542_v46 }
0x132d   :  { %v1852_v31 = vpop.f32.mrf.mxu3 }
0x132f   :  { %v1781_v58 = vpop.f32.mrf.mxu0 }
0x1330   :  { %v1782_v9 = vadd.f32 %v3362_v21, %v1781_v58 }
0x1337   :  { %v1873_v21 = vpop.f32.mrf.mxu0 }
0x1338   :  { %v1874_v30 = vadd.f32 %v3486_v13, %v1873_v21 }
0x1343   :  { %v1806_v49 = vpop.f32.mrf.mxu1 }
0x1344   :  { %v1809_v1 = vadd.f32 %v1806_v49, %v1782_v9 }
0x1346   :  { %v1902_v17 = vmul.f32 %v1809_v1, %v2821_v20 }
0x1348   :  { %2556 = vtanh.f32 %v1902_v17 }
0x1349   :  { %v1827_v12 = vpop.f32.mrf.mxu2 }
0x134a   :  { %v1828_v50 = vadd.f32 %v3469_v28, %v1827_v12 }
0x134c   :  { %v1855_v37 = vadd.f32 %v1852_v31, %v1828_v50 }
0x134e   :  { %v2557_v18 = vpop.eup %2556  ;;  %v1923_v38 = vmul.f32 %v1855_v37, %v2821_v20 }
0x134f   :  { %v1904_v22 = vmul.f32 %v2557_v18, %v2821_v20 }
0x1350   :  { %2558 = vtanh.f32 %v1923_v38 }
0x1351   :  { %v1905_v26 = vadd.f32 %v1904_v22, %v2824_v25 }
0x1353   :  { %1908 = vrot.lane.b32.xlu2 %v1905_v26, %s2728_s15  ;;  %v1906_v23 = vmul.f32 %v1905_v26, %v3503_v32 }
0x1356   :  { %v2559_v62 = vpop.eup %2558 }
0x1357   :  { %v1925_v51 = vmul.f32 %v2559_v62, %v2821_v20 }
0x1359   :  { %v1898_v44 = vpop.f32.mrf.mxu1  ;;  %v1926_v45 = vadd.f32 %v1925_v51, %v2824_v25 }
0x135a   :  { %v1901_v48 = vadd.f32 %v1898_v44, %v1874_v30 }
0x135b   :  { %1929 = vrot.lane.b32.xlu0 %v1926_v45, %s2728_s15  ;;  %v1927_v27 = vmul.f32 %v1926_v45, %v3499_v5 }
0x135c   :  { %v1944_v4 = vmul.f32 %v1901_v48, %v2821_v20 }
0x135e   :  { %2560 = vtanh.f32 %v1944_v4 }
0x1364   :  { %v2561_v35 = vpop.eup %2560 }
0x1365   :  { %v1946_v11 = vmul.f32 %v2561_v35, %v2821_v20 }
0x1367   :  { %v1947_v29 = vadd.f32 %v1946_v11, %v2824_v25 }
0x1369   :  { %1950 = vrot.lane.b32.xlu1 %v1947_v29, %s2728_s15  ;;  %v1948_v53 = vmul.f32 %v1947_v29, %v3512_v42 }
0x13ad   :  { %v1909_v47 = vpop.permute.xlu2 %1908 }
0x13ae   :  { %v1911_v7 = vmul.f32 %v1909_v47, %v1905_v26 }
0x13b0   :  { %1913 = vrot.lane.b32.xlu2 %v1911_v7, %s2729_s16 }
0x13cd   :  { %v1930_v33 = vpop.permute.xlu0 %1929 }
0x13ce   :  { %v1932_v34 = vmul.f32 %v1930_v33, %v1926_v45 }
0x13d0   :  { %1934 = vrot.lane.b32.xlu0 %v1932_v34, %s2729_s16 }
0x13db   :  { %v1951_v56 = vpop.permute.xlu1 %1950 }
0x13dc   :  { %v1953_v24 = vmul.f32 %v1951_v56, %v1947_v29 }
0x13de   :  { %1955 = vrot.lane.b32.xlu1 %v1953_v24, %s2729_s16 }
0x140a   :  { %v1914_v52 = vpop.permute.xlu2 %1913 }
0x140b   :  { %v1916_v2 = vadd.f32 %v1914_v52, %v1906_v23 }
0x140d   :  { %2562 = vtanh.f32 %v1916_v2 }
0x1413   :  { %v2563_v15 = vpop.eup %2562 }
0x1414   :  { %1919 = vrot.lane.b32.xlu2 %v2563_v15, %s2728_s15 }
0x1442   :  { %v1935_v16 = vpop.permute.xlu0 %1934 }
0x1443   :  { %v3567_v61 = vadd.f32 %v1935_v16, %v1927_v27 }
0x1445   :  { %2564 = vtanh.f32 %v3567_v61 }
0x144b   :  { %v2565_v8 = vpop.eup %2564 }
0x144c   :  { %1940 = vrot.lane.b32.xlu0 %v2565_v8, %s2728_s15 }
0x1450   :  { %v1956_v43 = vpop.permute.xlu1 %1955 }
0x1451   :  { %v3572_v32 = vadd.f32 %v1956_v43, %v1948_v53 }
0x1453   :  { %2566 = vtanh.f32 %v3572_v32 }
0x1459   :  { %v2567_v59 = vpop.eup %2566 }
0x145a   :  { %1961 = vrot.lane.b32.xlu1 %v2567_v59, %s2728_s15 }
0x146e   :  { %v1920_v63 = vpop.permute.xlu2 %1919 }
0x146f   :  { %v1922_v5 = vmul.f32 %v1920_v63, %v1905_v26 }
0x1471   :  { %1966 = vrot.lane.b32.xlu2 %v1922_v5, %s2729_s16 }
0x14be   :  { %v1941_v6 = vpop.permute.xlu0 %1940 }
0x14bf   :  { %v1943_v60 = vmul.f32 %v1941_v6, %v1926_v45 }
0x14c1   :  { %1991 = vrot.lane.b32.xlu0 %v1943_v60, %s2729_s16 }
0x14cb   :  { %v1967_v3 = vpop.permute.xlu2 %1966 }
0x14cc   :  { %v1962_v0 = vpop.permute.xlu1 %1961  ;;  %2412 = vmatmul.msk.f32.vlgmr.msrb.gmra.mxu2 %vm128_vm0, %v1967_v3 }
0x14cd   :  { %v1964_v42 = vmul.f32 %v1962_v0, %v1947_v29 }
0x14cf   :  { %2037 = vrot.lane.b32.xlu1 %v1964_v42, %s2729_s16 }
0x1533   :  { %v1992_v41 = vpop.permute.xlu0 %1991 }
0x1534   :  { %2413 = vmatmul.msk.f32.vlgmr.msrb.gmra.mxu3 %vm128_vm0, %v1992_v41  ;;  %2414 = vmatmul.msk.f32.vlgmr.msra.gmra.mxu0 %vm128_vm0, %v1992_v41 }
0x153c   :  { %2418 = vmatmul.msk.f32.vlgmr.msrb.gmra.mxu0 %vm128_vm0, %v3161_v57 }
0x1541   :  { %v2038_v58 = vpop.permute.xlu1 %2037 }
0x1542   :  { %2415 = vmatmul.msk.f32.vlgmr.msra.gmra.mxu1 %vm128_vm0, %v2038_v58 }
0x1544   :  { %2419 = vmatmul.msk.f32.gmra.mxu0 %vm128_vm0, %v3251_v36 }
0x154c   :  { %2420 = vmatmul.msk.f32.gmra.mxu0 %vm128_vm0, %v3339_v39 }
0x154f   :  { %v1987_v9 = vpop.f32.mrf.mxu2 }
0x1550   :  { %v1988_v57 = vadd.f32 %v3469_v28, %v1987_v9 }
0x1554   :  { %2421 = vmatmul.msk.f32.gmra.mxu0 %vm128_vm0, %v3455_v55 }
0x155c   :  { %2422 = vmatmul.msk.f32.gmra.mxu0 %vm128_vm0, %v3542_v46 }
0x1564   :  { %2423 = vmatmul.msk.f32.gmra.mxu0 %vm128_vm0, %v2038_v58 }
0x15b1   :  { %v2033_v12 = vpop.f32.mrf.mxu0 }
0x15b2   :  { %v2034_v36 = vadd.f32 %v3486_v13, %v2033_v12 }
0x15b7   :  { %v2012_v49 = vpop.f32.mrf.mxu3 }
0x15b8   :  { %v2015_v1 = vadd.f32 %v2012_v49, %v1988_v57 }
0x15b9   :  { %v2206_v43 = vpop.f32.mrf.mxu0 }
0x15ba   :  { %v2062_v17 = vmul.f32 %v2015_v1, %v2821_v20 }
0x15bc   :  { %2568 = vtanh.f32 %v2062_v17 }
0x15bf   :  { %v2058_v39 = vpop.f32.mrf.mxu1 }
0x15c0   :  { %v2061_v50 = vadd.f32 %v2058_v39, %v2034_v36 }
0x15c2   :  { %v2569_v31 = vpop.eup %2568  ;;  %v2083_v55 = vmul.f32 %v2061_v50, %v2821_v20 }
0x15c3   :  { %v2064_v46 = vmul.f32 %v2569_v31, %v2821_v20 }
0x15c4   :  { %2570 = vtanh.f32 %v2083_v55 }
0x15c5   :  { %v2065_v37 = vadd.f32 %v2064_v46, %v2824_v25 }
0x15c7   :  { %2068 = vrot.lane.b32.xlu2 %v2065_v37, %s2728_s15  ;;  %v2066_v51 = vmul.f32 %v2065_v37, %v3567_v61 }
0x15ca   :  { %v2571_v28 = vpop.eup %2570 }
0x15cb   :  { %v2085_v18 = vmul.f32 %v2571_v28, %v2821_v20 }
0x15cd   :  { %v2086_v38 = vadd.f32 %v2085_v18, %v2824_v25 }
0x15cf   :  { %2089 = vrot.lane.b32.xlu0 %v2086_v38, %s2728_s15  ;;  %v2087_v45 = vmul.f32 %v2086_v38, %v3572_v32  ;;  %v2209_v32 = vpop.f32.mrf.mxu0 }
0x15d7   :  { %v2212_v59 = vpop.f32.mrf.mxu0 }
0x1621   :  { %v2069_v22 = vpop.permute.xlu2 %2068 }
0x1622   :  { %v2071_v26 = vmul.f32 %v2069_v22, %v2065_v37 }
0x1624   :  { %2073 = vrot.lane.b32.xlu1 %v2071_v26, %s2729_s16 }
0x1641   :  { %v2090_v21 = vpop.permute.xlu0 %2089 }
0x1642   :  { %v2092_v62 = vmul.f32 %v2090_v21, %v2086_v38 }
0x1644   :  { %2094 = vrot.lane.b32.xlu2 %v2092_v62, %s2729_s16 }
0x1696   :  { %v2074_v30 = vpop.permute.xlu1 %2073 }
0x1697   :  { %v2076_v44 = vadd.f32 %v2074_v30, %v2066_v51 }
0x1699   :  { %2572 = vtanh.f32 %v2076_v44 }
0x169e   :  { %v2095_v48 = vpop.permute.xlu2 %2094 }
0x169f   :  { %v2573_v4 = vpop.eup %2572  ;;  %v2097_v35 = vadd.f32 %v2095_v48, %v2087_v45 }
0x16a0   :  { %2079 = vrot.lane.b32.xlu0 %v2573_v4, %s2728_s15 }
0x16a1   :  { %2574 = vtanh.f32 %v2097_v35 }
0x16a7   :  { %v2575_v11 = vpop.eup %2574 }
0x16a8   :  { %2100 = vrot.lane.b32.xlu1 %v2575_v11, %s2728_s15 }
0x1712   :  { %v2080_v29 = vpop.permute.xlu0 %2079 }
0x1713   :  { %v2082_v47 = vmul.f32 %v2080_v29, %v2065_v37 }
0x1715   :  { %2105 = vrot.lane.b32.xlu2 %v2082_v47, %s2729_s16 }
0x171a   :  { %v2101_v7 = vpop.permute.xlu1 %2100 }
0x171b   :  { %v2103_v33 = vmul.f32 %v2101_v7, %v2086_v38 }
0x171d   :  { %2130 = vrot.lane.b32.xlu0 %v2103_v33, %s2729_s16 }
0x176f   :  { %v2106_v34 = vpop.permute.xlu2 %2105 }
0x1770   :  { %2416 = vmatmul.msk.f32.vlgmr.msra.gmra.mxu2 %vm128_vm0, %v2106_v34 }
0x178f   :  { %v2131_v56 = vpop.permute.xlu0 %2130 }
0x1790   :  { %2417 = vmatmul.msk.f32.vlgmr.msra.gmra.mxu3 %vm128_vm0, %v2131_v56  ;;  %2424 = vmatmul.msk.f32.gmra.mxu0 %vm128_vm0, %v2131_v56 }
0x17f3   :  { %v2126_v24 = vpop.f32.mrf.mxu2 }
0x17f4   :  { %v2127_v23 = vadd.f32 %v3486_v13, %v2126_v24  ;;  %v3636_v13 = vld [vmem:[%s3697_s5] ss:$0 sm:$0xff]  ;;  %s2730_s5 = smov [#allocation7]  }
0x17f5   :  { %v2207_v63 = vadd.f32 %v3636_v13, %v2206_v43  ;;  %v2210_v54 = vadd.f32 %v3636_v13, %v2209_v32  ;;  %v2213_v18 = vadd.f32 %v3636_v13, %v2212_v59 }
0x17f7   :  { %v2232_v41 = vsel %vm2230_vm4, %v2210_v54, -1e+30  ;;  %v2233_v26 = vsel %vm2230_vm4, %v2213_v18, -1e+30 }
0x1813   :  { %v2151_v52 = vpop.f32.mrf.mxu3 }
0x1814   :  { %v2154_v2 = vadd.f32 %v2151_v52, %v2127_v23 }
0x1816   :  { %v2155_v15 = vmul.f32 %v2154_v2, %v2821_v20 }
0x1818   :  { %2576 = vtanh.f32 %v2155_v15 }
0x181e   :  { %v2577_v27 = vpop.eup %2576 }
0x181f   :  { %v2157_v16 = vmul.f32 %v2577_v27, %v2821_v20  ;;  %v2215_v20 = vpop.f32.mrf.mxu0 }
0x1820   :  { %v2216_v5 = vadd.f32 %v3636_v13, %v2215_v20 }
0x1821   :  { %v2158_v61 = vadd.f32 %v2157_v16, %v2824_v25  ;;  %v2231_v25 = vsel %vm2230_vm4, %v2207_v63, -1e+30 }
0x1822   :  { %v2234_v6 = vsel %vm2230_vm4, %v2216_v5, -1e+30 }
0x1823   :  { %2161 = vrot.lane.b32.xlu1 %v2158_v61, %s2728_s15  ;;  %v2159_v42 = vmul.f32 %v2158_v61, %v2097_v35 }
0x1827   :  { %v2218_v60 = vpop.f32.mrf.mxu0 }
0x1828   :  { %v2219_v3 = vadd.f32 %v3636_v13, %v2218_v60 }
0x182a   :  { %v2235_v0 = vsel %vm2230_vm4, %v2219_v3, -1e+30 }
0x182f   :  { %v2221_v58 = vpop.f32.mrf.mxu0 }
0x1830   :  { %v2222_v9 = vadd.f32 %v3636_v13, %v2221_v58 }
0x1832   :  { %v3655_v57 = vsel %vm2230_vm4, %v2222_v9, -1e+30 }
0x1837   :  { %v2224_v21 = vpop.f32.mrf.mxu0 }
0x1838   :  { %v2225_v51 = vadd.f32 %v3636_v13, %v2224_v21 }
0x183a   :  { %v2237_v45 = vsel %vm2230_vm4, %v2225_v51, -1e+30 }
0x1895   :  { %v2162_v8 = vpop.permute.xlu1 %2161 }
0x1896   :  { %v2164_v53 = vmul.f32 %v2162_v8, %v2158_v61 }
0x1898   :  { %2166 = vrot.lane.b32.xlu2 %v2164_v53, %s2729_s16 }
0x18c1   :  { %2239 = vmax.xlane.f32.xlu2 %v2231_v25 }
0x18c9   :  { %2245 = vmax.xlane.f32.xlu2 %v2234_v6 }
0x18d1   :  { %2247 = vmax.xlane.f32.xlu2 %v2235_v0 }
0x18f2   :  { %v2167_v19 = vpop.permute.xlu2 %2166 }
0x18f3   :  { %v2169_v10 = vadd.f32 %v2167_v19, %v2159_v42 }
0x18f5   :  { %2578 = vtanh.f32 %v2169_v10 }
0x18fb   :  { %v2579_v40 = vpop.eup %2578 }
0x18fc   :  { %2172 = vrot.lane.b32.xlu0 %v2579_v40, %s2728_s15  ;;  %s2339_s15 = sshll.u32 %s2730_s5, 4  ;;  %s2340_s15 = int_to_ptr.vmem [resolvable:$true] %s2339_s15 }
0x1926   :  { %2241 = vmax.xlane.f32.xlu0 %v2232_v41 }
0x192e   :  { %2249 = vmax.xlane.f32.xlu0 %v3655_v57 }
0x1934   :  { %v2240_v49 = vpop.xlane.xlu2 %2239 }
0x1935   :  { %v2255_v1 = vsub.f32 %v2231_v25, %v2240_v49 }
0x1937   :  { %v2263_v17 = vmul.f32 1.442695, %v2255_v1 }
0x1939   :  { %2580 = vpow2.f32 %v2263_v17 }
0x193c   :  { %v2246_v12 = vpop.xlane.xlu2 %2245 }
0x193d   :  { %v2258_v36 = vsub.f32 %v2234_v6, %v2246_v12 }
0x193f   :  { %v2581_v39 = vpop.eup %2580  ;;  %v2269_v50 = vmul.f32 1.442695, %v2258_v36 }
0x1940   :  { %v2279_v31 = vsel %vm2230_vm4, %v2581_v39, 0.0 }
0x1941   :  { %2582 = vpow2.f32 %v2269_v50  ;;  %2287 = vadd.xlane.f32.xlu0 %v2279_v31 }
0x1944   :  { %v2248_v30 = vpop.xlane.xlu2 %2247 }
0x1945   :  { %v2259_v44 = vsub.f32 %v2235_v0, %v2248_v30 }
0x1947   :  { %v2583_v55 = vpop.eup %2582  ;;  %v2271_v48 = vmul.f32 1.442695, %v2259_v44 }
0x1948   :  { %v2282_v46 = vsel %vm2230_vm4, %v2583_v55, 0.0 }
0x1949   :  { %2293 = vadd.xlane.f32.xlu0 %v2282_v46 }
0x196e   :  { %v2173_v37 = vpop.permute.xlu0 %2172 }
0x196f   :  { %v2175_v28 = vmul.f32 %v2173_v37, %v2158_v61 }
0x1971   :  { %2185 = vrot.lane.b32.xlu1 %v2175_v28, %s2729_s16 }
0x1999   :  { %v2242_v38 = vpop.xlane.xlu0 %2241 }
0x199a   :  { %v2256_v22 = vsub.f32 %v2232_v41, %v2242_v38 }
0x199b   :  { %2243 = vmax.xlane.f32.xlu1 %v2233_v26 }
0x199c   :  { %v2265_v62 = vmul.f32 1.442695, %v2256_v22 }
0x199e   :  { %2584 = vpow2.f32 %v2265_v62 }
0x199f   :  { %2586 = vpow2.f32 %v2271_v48 }
0x19a1   :  { %v2250_v11 = vpop.xlane.xlu0 %2249 }
0x19a2   :  { %v2260_v10 = vsub.f32 %v3655_v57, %v2250_v11 }
0x19a3   :  { %2251 = vmax.xlane.f32.xlu1 %v2237_v45 }
0x19a4   :  { %v2585_v4 = vpop.eup %2584  ;;  %v2273_v54 = vmul.f32 1.442695, %v2260_v10 }
0x19a5   :  { %v2280_v35 = vsel %vm2230_vm4, %v2585_v4, 0.0  ;;  %v2587_v29 = vpop.eup %2586 }
0x19a6   :  { %v2283_v47 = vsel %vm2230_vm4, %v2587_v29, 0.0 }
0x19ab   :  { %2289 = vadd.xlane.f32.xlu1 %v2280_v35 }
0x19b3   :  { %2295 = vadd.xlane.f32.xlu1 %v2283_v47 }
0x19b4   :  { %v2288_v7 = vpop.xlane.xlu0 %2287 }
0x19b5   :  { %2588 = vlog2.f32 %v2288_v7 }
0x19bb   :  { %v2589_v33 = vpop.eup %2588 }
0x19bc   :  { %v2304_v34 = vmul.f32 0.6931472, %v2589_v33  ;;  %v2294_v56 = vpop.xlane.xlu0 %2293 }
0x19bd   :  { %2590 = vlog2.f32 %v2294_v56 }
0x19be   :  { %v2319_v24 = vsub.f32 %v2255_v1, %v2304_v34 }
0x19c0   :  { %2327 = vst [vmem:[#allocation7] sm:$0xff] %v2319_v24 }
0x19c3   :  { %v2591_v23 = vpop.eup %2590 }
0x19c4   :  { %v2310_v52 = vmul.f32 0.6931472, %v2591_v23 }
0x19c6   :  { %v2322_v2 = vsub.f32 %v2258_v36, %v2310_v52 }
0x19c8   :  { %2330 = vst [vmem:[#allocation7 + $0x18] sm:$0xff] %v2322_v2 }
0x19e3   :  { %v2186_v15 = vpop.permute.xlu1 %2185 }
0x19e4   :  { %2425 = vmatmul.msk.f32.gmra.mxu0 %vm128_vm0, %v2186_v15 }
0x1a0e   :  { %v2244_v27 = vpop.xlane.xlu1 %2243 }
0x1a0f   :  { %v2257_v3 = vsub.f32 %v2233_v26, %v2244_v27 }
0x1a11   :  { %v2267_v0 = vmul.f32 1.442695, %v2257_v3 }
0x1a16   :  { %v2252_v16 = vpop.xlane.xlu1 %2251 }
0x1a17   :  { %v2261_v61 = vsub.f32 %v2237_v45, %v2252_v16 }
0x1a19   :  { %v2275_v8 = vmul.f32 1.442695, %v2261_v61 }
0x1a1b   :  { %2592 = vpow2.f32 %v2275_v8 }
0x1a1e   :  { %v2290_v53 = vpop.xlane.xlu1 %2289 }
0x1a1f   :  { %2594 = vlog2.f32 %v2290_v53 }
0x1a21   :  { %v2593_v43 = vpop.eup %2592 }
0x1a22   :  { %v2285_v32 = vsel %vm2230_vm4, %v2593_v43, 0.0 }
0x1a23   :  { %2299 = vadd.xlane.f32.xlu0 %v2285_v32 }
0x1a25   :  { %v2595_v59 = vpop.eup %2594 }
0x1a26   :  { %v2306_v63 = vmul.f32 0.6931472, %v2595_v59  ;;  %v2296_v20 = vpop.xlane.xlu1 %2295 }
0x1a27   :  { %2596 = vlog2.f32 %v2296_v20 }
0x1a28   :  { %v2320_v25 = vsub.f32 %v2256_v22, %v2306_v63  ;;  %2598 = vpow2.f32 %v2267_v0 }
0x1a29   :  { %2600 = vpow2.f32 %v2273_v54 }
0x1a2a   :  { %2328 = vst [vmem:[#allocation7 + $0x8] sm:$0xff] %v2320_v25 }
0x1a2d   :  { %v2597_v5 = vpop.eup %2596 }
0x1a2e   :  { %v2312_v6 = vmul.f32 0.6931472, %v2597_v5  ;;  %v2599_v41 = vpop.eup %2598 }
0x1a2f   :  { %v2281_v58 = vsel %vm2230_vm4, %v2599_v41, 0.0  ;;  %v2601_v9 = vpop.eup %2600 }
0x1a30   :  { %v2323_v60 = vsub.f32 %v2259_v44, %v2312_v6  ;;  %v2284_v49 = vsel %vm2230_vm4, %v2601_v9, 0.0 }
0x1a32   :  { %2331 = vst [vmem:[#allocation7 + $0x20] sm:$0xff] %v2323_v60 }
0x1a61   :  { %v2227_v42 = vpop.f32.mrf.mxu0 }
0x1a62   :  { %v2228_v19 = vadd.f32 %v3636_v13, %v2227_v42 }
0x1a64   :  { %v2238_v40 = vsel %vm2230_vm4, %v2228_v19, -1e+30 }
0x1a65   :  { %2253 = vmax.xlane.f32.xlu2 %v2238_v40 }
0x1a6d   :  { %2291 = vadd.xlane.f32.xlu2 %v2281_v58 }
0x1a75   :  { %2297 = vadd.xlane.f32.xlu2 %v2284_v49 }
0x1a96   :  { %v2300_v13 = vpop.xlane.xlu0 %2299 }
0x1a97   :  { %2602 = vlog2.f32 %v2300_v13 }
0x1a9d   :  { %v2603_v57 = vpop.eup %2602 }
0x1a9e   :  { %v2316_v1 = vmul.f32 0.6931472, %v2603_v57 }
0x1aa0   :  { %v2325_v17 = vsub.f32 %v2261_v61, %v2316_v1 }
0x1aa2   :  { %2333 = vst [vmem:[#allocation7 + $0x30] sm:$0xff] %v2325_v17 }
0x1ad8   :  { %v2254_v12 = vpop.xlane.xlu2 %2253 }
0x1ad9   :  { %v2262_v36 = vsub.f32 %v2238_v40, %v2254_v12 }
0x1adb   :  { %v2277_v39 = vmul.f32 1.442695, %v2262_v36 }
0x1add   :  { %2604 = vpow2.f32 %v2277_v39 }
0x1ae0   :  { %v2292_v50 = vpop.xlane.xlu2 %2291 }
0x1ae1   :  { %2606 = vlog2.f32 %v2292_v50 }
0x1ae3   :  { %v2605_v31 = vpop.eup %2604 }
0x1ae4   :  { %v2286_v55 = vsel %vm2230_vm4, %v2605_v31, 0.0 }
0x1ae5   :  { %2301 = vadd.xlane.f32.xlu1 %v2286_v55 }
0x1ae7   :  { %v2607_v46 = vpop.eup %2606 }
0x1ae8   :  { %v2308_v37 = vmul.f32 0.6931472, %v2607_v46  ;;  %v2298_v28 = vpop.xlane.xlu2 %2297 }
0x1ae9   :  { %2608 = vlog2.f32 %v2298_v28 }
0x1aea   :  { %v2321_v18 = vsub.f32 %v2257_v3, %v2308_v37 }
0x1aec   :  { %2329 = vst [vmem:[#allocation7 + $0x10] sm:$0xff] %v2321_v18 }
0x1aef   :  { %v2609_v38 = vpop.eup %2608 }
0x1af0   :  { %v2314_v22 = vmul.f32 0.6931472, %v2609_v38 }
0x1af2   :  { %v2324_v26 = vsub.f32 %v2260_v10, %v2314_v22 }
0x1af4   :  { %2332 = vst [vmem:[#allocation7 + $0x28] sm:$0xff] %v2324_v26 }
0x1b58   :  { %v2302_v21 = vpop.xlane.xlu1 %2301 }
0x1b59   :  { %2610 = vlog2.f32 %v2302_v21 }
0x1b5f   :  { %v2611_v62 = vpop.eup %2610 }
0x1b60   :  { %v2318_v14 = vmul.f32 0.6931472, %v2611_v62 }
0x1b62   :  { %v2326_v51 = vsub.f32 %v2262_v36, %v2318_v14 }
0x1b64   :  { %2334 = vst [vmem:[#allocation7 + $0x38] sm:$0xff] %v2326_v51 }
0x1b65   :  { %2347 = dma.vmem_to_hbm [thread:$0]  %s2340_s15, 1024, %s2342_s0, [#allocation4], %s2723_s29, %s2723_s29, %s2724_s30  }
0x1b66   :  { %2720 = dma.done.wait [#allocation4], 1024  }
0x1b67   :  { %2721 = vsyncadd [#allocation4], 4294966272 }
0x1b68   :  { %2352 = vsyncpa [#allocation3], 1 }
0x1b69   :  { %2353 = vsyncpa [#allocation6], 1 }
0x1b6a   :  { %2354 = vsyncpa [#allocation4], 1 }

</bundles_post_ra>
